<compile_context>
chip_gen: v7x
topology: tpu7x:2x2x1
jax: 0.10.0
libtpu: 0.0.40
codegen_flags: <defaults>
</compile_context>

<pallas_src>
import functools

import jax
import jax.numpy as jnp
from jax.experimental import pallas as pl
from jax.experimental.pallas import tpu as pltpu


def _dwconv3d_kernel(fs, nf, H, W, C, x_ref, w_ref, b_ref, out_ref, pad_ref):
    """One grid step: one batch element, `fs` output frames.

    x_ref  : (1, nf, H, W, C)    un-padded volume (block index invariant along the
                                 frame-tile axis -> DMA'd from HBM once per batch)
    w_ref  : (27, C)             depthwise taps, channels-last, row = dt*9 + dh*3 + dw
    b_ref  : (1, C)
    out_ref: (1, fs, H, W, C)
    pad_ref: (nf+2, H+2, W+2, C) VMEM scratch: zero-padded volume, built at t == 0.
    """
    t = pl.program_id(1)

    # Build the zero-padded volume in VMEM once per batch element (in-kernel padding
    # avoids an extra full HBM read+write that jnp.pad in the wrapper would cost).
    @pl.when(t == 0)
    def _():
        pad_ref[...] = jnp.zeros_like(pad_ref)
        pad_ref[pl.ds(1, nf), pl.ds(1, H), pl.ds(1, W), :] = x_ref[0]

    t0 = t * fs

    # Bias fused as the accumulator init (f32 accumulation).
    bias = b_ref[...].reshape(1, 1, 1, C).astype(jnp.float32)
    acc = jnp.broadcast_to(bias, (fs, H, W, C))

    # 27 shifted VPU multiply-accumulates; per-tap slab is loaded inside the loop so
    # only acc + one slab are live (low vreg pressure, no spill traffic).
    for dt in range(3):
        for dh in range(3):
            for dw in range(3):
                tap = w_ref[dt * 9 + dh * 3 + dw, :].reshape(1, 1, 1, C)
                slab = pad_ref[pl.ds(t0 + dt, fs), pl.ds(dh, H), pl.ds(dw, W), :]
                acc = acc + tap.astype(jnp.float32) * slab.astype(jnp.float32)

    out_ref[0] = acc.astype(out_ref.dtype)


def dwconv(x, weight, bias, nf, H, W, *, frames_per_step=None):
    """Depthwise 3-D conv matching DWConv.forward.

    x      : (B, N, C) with N == nf * H * W   (same layout as the PyTorch forward)
    weight : (3, 3, 3, C)  channels-last depthwise taps
             (== torch weight (C, 1, 3, 3, 3) transposed to (kD, kH, kW, C))
    bias   : (C,)
    returns: (B, N, C)
    """
    B, N, C = x.shape
    assert N == nf * H * W, "N must equal nf * H * W"

    if frames_per_step is None:
        # Largest divisor of nf whose f32 accumulator tile stays <= ~16 vregs.
        budget = 64 * 1024
        frames_per_step = 1
        for fs in range(nf, 0, -1):
            if nf % fs == 0 and fs * H * W * C * 4 <= budget:
                frames_per_step = fs
                break
    assert nf % frames_per_step == 0
    n_t = nf // frames_per_step

    # (B, N, C) -> (B, nf, H, W, C) is a pure reshape: channels stay on lanes.
    x5 = x.reshape(B, nf, H, W, C)
    w2 = weight.reshape(27, C)
    b2 = bias.reshape(1, C)

    nfp, Hp, Wp = nf + 2, H + 2, W + 2
    kernel = functools.partial(_dwconv3d_kernel, frames_per_step, nf, H, W, C)

    # Generous VMEM budget: double-buffered input block + padded scratch +
    # double-buffered output tile + slack (floored at the default 32 MiB scope).
    itemsize = jnp.dtype(x.dtype).itemsize
    vol = nf * H * W * C * itemsize
    pad_vol = nfp * Hp * Wp * C * itemsize
    out_tile = frames_per_step * H * W * C * itemsize
    vmem_bytes = 2 * vol + pad_vol + 2 * out_tile + (1 << 20)
    vmem_limit = int(min(max(vmem_bytes, 32 << 20), 128 << 20))

    out5 = pl.pallas_call(
        kernel,
        grid=(B, n_t),
        in_specs=[
            # Per-batch volume: index invariant along frame-tile axis -> one DMA per b.
            pl.BlockSpec((1, nf, H, W, C), lambda b, t: (b, 0, 0, 0, 0)),
            # Grid-invariant weights / bias (tiny).
            pl.BlockSpec((27, C), lambda b, t: (0, 0)),
            pl.BlockSpec((1, C), lambda b, t: (0, 0)),
        ],
        out_specs=pl.BlockSpec((1, frames_per_step, H, W, C),
                               lambda b, t: (b, t, 0, 0, 0)),
        out_shape=jax.ShapeDtypeStruct((B, nf, H, W, C), x.dtype),
        scratch_shapes=[pltpu.VMEM((nfp, Hp, Wp, C), x.dtype)],
        compiler_params=pltpu.CompilerParams(
            dimension_semantics=("parallel", "arbitrary"),
            vmem_limit_bytes=vmem_limit),
    )(x5, w2, b2)

    # (B, nf, H, W, C) -> (B, N, C): matches x.flatten(2).transpose(1, 2) in torch.
    return out5.reshape(B, N, C)


def reference(x, weight, bias, nf, H, W):
    """Pure-JAX reference via XLA's grouped conv (independent of the kernel's math)."""
    B, N, C = x.shape
    x5 = x.reshape(B, nf, H, W, C)
    out5 = jax.lax.conv_general_dilated(
        x5,
        weight.reshape(3, 3, 3, 1, C),
        window_strides=(1, 1, 1),
        padding="SAME",
        dimension_numbers=("NDHWC", "DHWIO", "NDHWC"),
        feature_group_count=C,
    )
    return (out5 + bias).reshape(B, N, C)


if __name__ == "__main__":
    # Small shapes consistent with the forward: x (B, N, C), N = nf * H * W.
    # C = 128 keeps everything lane-dense (the module default dim=768 is a multiple of 128).
    B, C = 2, 128
    nf, H, W = 4, 8, 8
    N = nf * H * W

    key = jax.random.PRNGKey(0)
    kx, kw, kb = jax.random.split(key, 3)
    x = jax.random.normal(kx, (B, N, C), jnp.float32)
    weight = jax.random.normal(kw, (3, 3, 3, C), jnp.float32) * 0.1
    bias = jax.random.normal(kb, (C,), jnp.float32) * 0.1

    out = dwconv(x, weight, bias, nf, H, W)
    jax.block_until_ready(out)

    ref = reference(x, weight, bias, nf, H, W)
    assert out.shape == (B, N, C)
    assert jnp.allclose(out, ref, atol=1e-4, rtol=1e-4), (
        float(jnp.max(jnp.abs(out - ref))))

    print("KERNEL_OK")
</pallas_src>

<mosaic_0001>
module attributes {stable_mosaic.version = 11 : i64} {
  func.func @_dwconv3d_kernel(%arg0: i32, %arg1: i32, %arg2: memref<1x4x8x8x128xf32, #tpu.memory_space<vmem>>, %arg3: memref<27x128xf32, #tpu.memory_space<vmem>>, %arg4: memref<1x128xf32, #tpu.memory_space<vmem>>, %arg5: memref<1x2x8x8x128xf32, #tpu.memory_space<vmem>>, %arg6: memref<6x10x10x128xf32, #tpu.memory_space<vmem>>) attributes {dimension_semantics = [#tpu.dimension_semantics<parallel>, #tpu.dimension_semantics<arbitrary>], iteration_bounds = array<i64: 2, 2>, scalar_prefetch = 0 : i64, scratch_operands = 1 : i64, tpu.core_type = #tpu.core_type<tc>, window_params = [{transform_indices = @transform_0, window_bounds = array<i64: 1, 4, 8, 8, 128>}, {pipeline_mode = #tpu.pipeline_mode<synchronous>, transform_indices = @transform_1, window_bounds = array<i64: 27, 128>}, {pipeline_mode = #tpu.pipeline_mode<synchronous>, transform_indices = @transform_2, window_bounds = array<i64: 1, 128>}, {transform_indices = @transform_3, window_bounds = array<i64: 1, 2, 8, 8, 128>}]} {
    %c0_i32 = arith.constant 0 : i32
    %0 = arith.cmpi eq, %arg1, %c0_i32 : i32
    %1 = arith.extui %0 : i1 to i32
    %c0_i32_0 = arith.constant 0 : i32
    %2 = arith.cmpi ne, %1, %c0_i32_0 : i32
    scf.if %2 {
      %cst = arith.constant 0.000000e+00 : f32
      %254 = vector.broadcast %cst : f32 to vector<6x10x10x128xf32>
      %c0_142 = arith.constant 0 : index
      %c0_143 = arith.constant 0 : index
      %c0_144 = arith.constant 0 : index
      %c0_145 = arith.constant 0 : index
      %255 = vector.load %arg6[%c0_142, %c0_143, %c0_144, %c0_145] : memref<6x10x10x128xf32, #tpu.memory_space<vmem>>, vector<6x10x10x128xf32>
      tpu.vector_store %arg6[%c0_142, %c0_143, %c0_144, %c0_145], %254 {strides = array<i32>} : memref<6x10x10x128xf32, #tpu.memory_space<vmem>>, vector<6x10x10x128xf32>,
      %c0_146 = arith.constant 0 : index
      %c0_147 = arith.constant 0 : index
      %c0_148 = arith.constant 0 : index
      %c0_149 = arith.constant 0 : index
      %c0_150 = arith.constant 0 : index
      %256 = vector.load %arg2[%c0_146, %c0_147, %c0_148, %c0_149, %c0_150] : memref<1x4x8x8x128xf32, #tpu.memory_space<vmem>>, vector<1x4x8x8x128xf32>
      %257 = vector.shape_cast %256 : vector<1x4x8x8x128xf32> to vector<4x8x8x128xf32>
      %c1_151 = arith.constant 1 : index
      %c1_152 = arith.constant 1 : index
      %c1_153 = arith.constant 1 : index
      %c0_154 = arith.constant 0 : index
      %258 = vector.load %arg6[%c1_151, %c1_152, %c1_153, %c0_154] : memref<6x10x10x128xf32, #tpu.memory_space<vmem>>, vector<4x8x8x128xf32>
      tpu.vector_store %arg6[%c1_151, %c1_152, %c1_153, %c0_154], %257 {strides = array<i32>} : memref<6x10x10x128xf32, #tpu.memory_space<vmem>>, vector<4x8x8x128xf32>,
    } else {
    }
    %c2_i32 = arith.constant 2 : i32
    %3 = arith.muli %arg1, %c2_i32 : i32
    %c0 = arith.constant 0 : index
    %c0_1 = arith.constant 0 : index
    %4 = vector.load %arg4[%c0, %c0_1] : memref<1x128xf32, #tpu.memory_space<vmem>>, vector<1x128xf32>
    %5 = vector.shape_cast %4 : vector<1x128xf32> to vector<1x1x1x128xf32>
    %6 = vector.shape_cast %5 : vector<1x1x1x128xf32> to vector<1x1x1x128xf32>
    %7 = vector.broadcast %6 : vector<1x1x1x128xf32> to vector<2x8x8x128xf32>
    %c0_2 = arith.constant 0 : index
    %c0_3 = arith.constant 0 : index
    %8 = vector.load %arg3[%c0_2, %c0_3] : memref<27x128xf32, #tpu.memory_space<vmem>>, vector<1x128xf32>
    %9 = vector.shape_cast %8 : vector<1x128xf32> to vector<128xf32>
    %10 = vector.shape_cast %9 : vector<128xf32> to vector<1x1x1x128xf32>
    %c0_i32_4 = arith.constant 0 : i32
    %11 = arith.addi %3, %c0_i32_4 : i32
    %12 = arith.index_cast %11 : i32 to index
    %c0_5 = arith.constant 0 : index
    %c0_6 = arith.constant 0 : index
    %c0_7 = arith.constant 0 : index
    %13 = vector.load %arg6[%12, %c0_5, %c0_6, %c0_7] : memref<6x10x10x128xf32, #tpu.memory_space<vmem>>, vector<2x8x8x128xf32>
    %14 = vector.broadcast %10 : vector<1x1x1x128xf32> to vector<2x8x8x128xf32>
    %15 = arith.mulf %14, %13 : vector<2x8x8x128xf32>
    %16 = arith.addf %7, %15 : vector<2x8x8x128xf32>
    %c1 = arith.constant 1 : index
    %c0_8 = arith.constant 0 : index
    %17 = vector.load %arg3[%c1, %c0_8] : memref<27x128xf32, #tpu.memory_space<vmem>>, vector<1x128xf32>
    %18 = vector.shape_cast %17 : vector<1x128xf32> to vector<128xf32>
    %19 = vector.shape_cast %18 : vector<128xf32> to vector<1x1x1x128xf32>
    %c0_i32_9 = arith.constant 0 : i32
    %20 = arith.addi %3, %c0_i32_9 : i32
    %21 = arith.index_cast %20 : i32 to index
    %c0_10 = arith.constant 0 : index
    %c1_11 = arith.constant 1 : index
    %c0_12 = arith.constant 0 : index
    %22 = vector.load %arg6[%21, %c0_10, %c1_11, %c0_12] : memref<6x10x10x128xf32, #tpu.memory_space<vmem>>, vector<2x8x8x128xf32>
    %23 = vector.broadcast %19 : vector<1x1x1x128xf32> to vector<2x8x8x128xf32>
    %24 = arith.mulf %23, %22 : vector<2x8x8x128xf32>
    %25 = arith.addf %16, %24 : vector<2x8x8x128xf32>
    %c2 = arith.constant 2 : index
    %c0_13 = arith.constant 0 : index
    %26 = vector.load %arg3[%c2, %c0_13] : memref<27x128xf32, #tpu.memory_space<vmem>>, vector<1x128xf32>
    %27 = vector.shape_cast %26 : vector<1x128xf32> to vector<128xf32>
    %28 = vector.shape_cast %27 : vector<128xf32> to vector<1x1x1x128xf32>
    %c0_i32_14 = arith.constant 0 : i32
    %29 = arith.addi %3, %c0_i32_14 : i32
    %30 = arith.index_cast %29 : i32 to index
    %c0_15 = arith.constant 0 : index
    %c2_16 = arith.constant 2 : index
    %c0_17 = arith.constant 0 : index
    %31 = vector.load %arg6[%30, %c0_15, %c2_16, %c0_17] : memref<6x10x10x128xf32, #tpu.memory_space<vmem>>, vector<2x8x8x128xf32>
    %32 = vector.broadcast %28 : vector<1x1x1x128xf32> to vector<2x8x8x128xf32>
    %33 = arith.mulf %32, %31 : vector<2x8x8x128xf32>
    %34 = arith.addf %25, %33 : vector<2x8x8x128xf32>
    %c3 = arith.constant 3 : index
    %c0_18 = arith.constant 0 : index
    %35 = vector.load %arg3[%c3, %c0_18] : memref<27x128xf32, #tpu.memory_space<vmem>>, vector<1x128xf32>
    %36 = vector.shape_cast %35 : vector<1x128xf32> to vector<128xf32>
    %37 = vector.shape_cast %36 : vector<128xf32> to vector<1x1x1x128xf32>
    %c0_i32_19 = arith.constant 0 : i32
    %38 = arith.addi %3, %c0_i32_19 : i32
    %39 = arith.index_cast %38 : i32 to index
    %c1_20 = arith.constant 1 : index
    %c0_21 = arith.constant 0 : index
    %c0_22 = arith.constant 0 : index
    %40 = vector.load %arg6[%39, %c1_20, %c0_21, %c0_22] : memref<6x10x10x128xf32, #tpu.memory_space<vmem>>, vector<2x8x8x128xf32>
    %41 = vector.broadcast %37 : vector<1x1x1x128xf32> to vector<2x8x8x128xf32>
    %42 = arith.mulf %41, %40 : vector<2x8x8x128xf32>
    %43 = arith.addf %34, %42 : vector<2x8x8x128xf32>
    %c4 = arith.constant 4 : index
    %c0_23 = arith.constant 0 : index
    %44 = vector.load %arg3[%c4, %c0_23] : memref<27x128xf32, #tpu.memory_space<vmem>>, vector<1x128xf32>
    %45 = vector.shape_cast %44 : vector<1x128xf32> to vector<128xf32>
    %46 = vector.shape_cast %45 : vector<128xf32> to vector<1x1x1x128xf32>
    %c0_i32_24 = arith.constant 0 : i32
    %47 = arith.addi %3, %c0_i32_24 : i32
    %48 = arith.index_cast %47 : i32 to index
    %c1_25 = arith.constant 1 : index
    %c1_26 = arith.constant 1 : index
    %c0_27 = arith.constant 0 : index
    %49 = vector.load %arg6[%48, %c1_25, %c1_26, %c0_27] : memref<6x10x10x128xf32, #tpu.memory_space<vmem>>, vector<2x8x8x128xf32>
    %50 = vector.broadcast %46 : vector<1x1x1x128xf32> to vector<2x8x8x128xf32>
    %51 = arith.mulf %50, %49 : vector<2x8x8x128xf32>
    %52 = arith.addf %43, %51 : vector<2x8x8x128xf32>
    %c5 = arith.constant 5 : index
    %c0_28 = arith.constant 0 : index
    %53 = vector.load %arg3[%c5, %c0_28] : memref<27x128xf32, #tpu.memory_space<vmem>>, vector<1x128xf32>
    %54 = vector.shape_cast %53 : vector<1x128xf32> to vector<128xf32>
    %55 = vector.shape_cast %54 : vector<128xf32> to vector<1x1x1x128xf32>
    %c0_i32_29 = arith.constant 0 : i32
    %56 = arith.addi %3, %c0_i32_29 : i32
    %57 = arith.index_cast %56 : i32 to index
    %c1_30 = arith.constant 1 : index
    %c2_31 = arith.constant 2 : index
    %c0_32 = arith.constant 0 : index
    %58 = vector.load %arg6[%57, %c1_30, %c2_31, %c0_32] : memref<6x10x10x128xf32, #tpu.memory_space<vmem>>, vector<2x8x8x128xf32>
    %59 = vector.broadcast %55 : vector<1x1x1x128xf32> to vector<2x8x8x128xf32>
    %60 = arith.mulf %59, %58 : vector<2x8x8x128xf32>
    %61 = arith.addf %52, %60 : vector<2x8x8x128xf32>
    %c6 = arith.constant 6 : index
    %c0_33 = arith.constant 0 : index
    %62 = vector.load %arg3[%c6, %c0_33] : memref<27x128xf32, #tpu.memory_space<vmem>>, vector<1x128xf32>
    %63 = vector.shape_cast %62 : vector<1x128xf32> to vector<128xf32>
    %64 = vector.shape_cast %63 : vector<128xf32> to vector<1x1x1x128xf32>
    %c0_i32_34 = arith.constant 0 : i32
    %65 = arith.addi %3, %c0_i32_34 : i32
    %66 = arith.index_cast %65 : i32 to index
    %c2_35 = arith.constant 2 : index
    %c0_36 = arith.constant 0 : index
    %c0_37 = arith.constant 0 : index
    %67 = vector.load %arg6[%66, %c2_35, %c0_36, %c0_37] : memref<6x10x10x128xf32, #tpu.memory_space<vmem>>, vector<2x8x8x128xf32>
    %68 = vector.broadcast %64 : vector<1x1x1x128xf32> to vector<2x8x8x128xf32>
    %69 = arith.mulf %68, %67 : vector<2x8x8x128xf32>
    %70 = arith.addf %61, %69 : vector<2x8x8x128xf32>
    %c7 = arith.constant 7 : index
    %c0_38 = arith.constant 0 : index
    %71 = vector.load %arg3[%c7, %c0_38] : memref<27x128xf32, #tpu.memory_space<vmem>>, vector<1x128xf32>
    %72 = vector.shape_cast %71 : vector<1x128xf32> to vector<128xf32>
    %73 = vector.shape_cast %72 : vector<128xf32> to vector<1x1x1x128xf32>
    %c0_i32_39 = arith.constant 0 : i32
    %74 = arith.addi %3, %c0_i32_39 : i32
    %75 = arith.index_cast %74 : i32 to index
    %c2_40 = arith.constant 2 : index
    %c1_41 = arith.constant 1 : index
    %c0_42 = arith.constant 0 : index
    %76 = vector.load %arg6[%75, %c2_40, %c1_41, %c0_42] : memref<6x10x10x128xf32, #tpu.memory_space<vmem>>, vector<2x8x8x128xf32>
    %77 = vector.broadcast %73 : vector<1x1x1x128xf32> to vector<2x8x8x128xf32>
    %78 = arith.mulf %77, %76 : vector<2x8x8x128xf32>
    %79 = arith.addf %70, %78 : vector<2x8x8x128xf32>
    %c8 = arith.constant 8 : index
    %c0_43 = arith.constant 0 : index
    %80 = vector.load %arg3[%c8, %c0_43] : memref<27x128xf32, #tpu.memory_space<vmem>>, vector<1x128xf32>
    %81 = vector.shape_cast %80 : vector<1x128xf32> to vector<128xf32>
    %82 = vector.shape_cast %81 : vector<128xf32> to vector<1x1x1x128xf32>
    %c0_i32_44 = arith.constant 0 : i32
    %83 = arith.addi %3, %c0_i32_44 : i32
    %84 = arith.index_cast %83 : i32 to index
    %c2_45 = arith.constant 2 : index
    %c2_46 = arith.constant 2 : index
    %c0_47 = arith.constant 0 : index
    %85 = vector.load %arg6[%84, %c2_45, %c2_46, %c0_47] : memref<6x10x10x128xf32, #tpu.memory_space<vmem>>, vector<2x8x8x128xf32>
    %86 = vector.broadcast %82 : vector<1x1x1x128xf32> to vector<2x8x8x128xf32>
    %87 = arith.mulf %86, %85 : vector<2x8x8x128xf32>
    %88 = arith.addf %79, %87 : vector<2x8x8x128xf32>
    %c9 = arith.constant 9 : index
    %c0_48 = arith.constant 0 : index
    %89 = vector.load %arg3[%c9, %c0_48] : memref<27x128xf32, #tpu.memory_space<vmem>>, vector<1x128xf32>
    %90 = vector.shape_cast %89 : vector<1x128xf32> to vector<128xf32>
    %91 = vector.shape_cast %90 : vector<128xf32> to vector<1x1x1x128xf32>
    %c1_i32 = arith.constant 1 : i32
    %92 = arith.addi %3, %c1_i32 : i32
    %93 = arith.index_cast %92 : i32 to index
    %c0_49 = arith.constant 0 : index
    %c0_50 = arith.constant 0 : index
    %c0_51 = arith.constant 0 : index
    %94 = vector.load %arg6[%93, %c0_49, %c0_50, %c0_51] : memref<6x10x10x128xf32, #tpu.memory_space<vmem>>, vector<2x8x8x128xf32>
    %95 = vector.broadcast %91 : vector<1x1x1x128xf32> to vector<2x8x8x128xf32>
    %96 = arith.mulf %95, %94 : vector<2x8x8x128xf32>
    %97 = arith.addf %88, %96 : vector<2x8x8x128xf32>
    %c10 = arith.constant 10 : index
    %c0_52 = arith.constant 0 : index
    %98 = vector.load %arg3[%c10, %c0_52] : memref<27x128xf32, #tpu.memory_space<vmem>>, vector<1x128xf32>
    %99 = vector.shape_cast %98 : vector<1x128xf32> to vector<128xf32>
    %100 = vector.shape_cast %99 : vector<128xf32> to vector<1x1x1x128xf32>
    %c1_i32_53 = arith.constant 1 : i32
    %101 = arith.addi %3, %c1_i32_53 : i32
    %102 = arith.index_cast %101 : i32 to index
    %c0_54 = arith.constant 0 : index
    %c1_55 = arith.constant 1 : index
    %c0_56 = arith.constant 0 : index
    %103 = vector.load %arg6[%102, %c0_54, %c1_55, %c0_56] : memref<6x10x10x128xf32, #tpu.memory_space<vmem>>, vector<2x8x8x128xf32>
    %104 = vector.broadcast %100 : vector<1x1x1x128xf32> to vector<2x8x8x128xf32>
    %105 = arith.mulf %104, %103 : vector<2x8x8x128xf32>
    %106 = arith.addf %97, %105 : vector<2x8x8x128xf32>
    %c11 = arith.constant 11 : index
    %c0_57 = arith.constant 0 : index
    %107 = vector.load %arg3[%c11, %c0_57] : memref<27x128xf32, #tpu.memory_space<vmem>>, vector<1x128xf32>
    %108 = vector.shape_cast %107 : vector<1x128xf32> to vector<128xf32>
    %109 = vector.shape_cast %108 : vector<128xf32> to vector<1x1x1x128xf32>
    %c1_i32_58 = arith.constant 1 : i32
    %110 = arith.addi %3, %c1_i32_58 : i32
    %111 = arith.index_cast %110 : i32 to index
    %c0_59 = arith.constant 0 : index
    %c2_60 = arith.constant 2 : index
    %c0_61 = arith.constant 0 : index
    %112 = vector.load %arg6[%111, %c0_59, %c2_60, %c0_61] : memref<6x10x10x128xf32, #tpu.memory_space<vmem>>, vector<2x8x8x128xf32>
    %113 = vector.broadcast %109 : vector<1x1x1x128xf32> to vector<2x8x8x128xf32>
    %114 = arith.mulf %113, %112 : vector<2x8x8x128xf32>
    %115 = arith.addf %106, %114 : vector<2x8x8x128xf32>
    %c12 = arith.constant 12 : index
    %c0_62 = arith.constant 0 : index
    %116 = vector.load %arg3[%c12, %c0_62] : memref<27x128xf32, #tpu.memory_space<vmem>>, vector<1x128xf32>
    %117 = vector.shape_cast %116 : vector<1x128xf32> to vector<128xf32>
    %118 = vector.shape_cast %117 : vector<128xf32> to vector<1x1x1x128xf32>
    %c1_i32_63 = arith.constant 1 : i32
    %119 = arith.addi %3, %c1_i32_63 : i32
    %120 = arith.index_cast %119 : i32 to index
    %c1_64 = arith.constant 1 : index
    %c0_65 = arith.constant 0 : index
    %c0_66 = arith.constant 0 : index
    %121 = vector.load %arg6[%120, %c1_64, %c0_65, %c0_66] : memref<6x10x10x128xf32, #tpu.memory_space<vmem>>, vector<2x8x8x128xf32>
    %122 = vector.broadcast %118 : vector<1x1x1x128xf32> to vector<2x8x8x128xf32>
    %123 = arith.mulf %122, %121 : vector<2x8x8x128xf32>
    %124 = arith.addf %115, %123 : vector<2x8x8x128xf32>
    %c13 = arith.constant 13 : index
    %c0_67 = arith.constant 0 : index
    %125 = vector.load %arg3[%c13, %c0_67] : memref<27x128xf32, #tpu.memory_space<vmem>>, vector<1x128xf32>
    %126 = vector.shape_cast %125 : vector<1x128xf32> to vector<128xf32>
    %127 = vector.shape_cast %126 : vector<128xf32> to vector<1x1x1x128xf32>
    %c1_i32_68 = arith.constant 1 : i32
    %128 = arith.addi %3, %c1_i32_68 : i32
    %129 = arith.index_cast %128 : i32 to index
    %c1_69 = arith.constant 1 : index
    %c1_70 = arith.constant 1 : index
    %c0_71 = arith.constant 0 : index
    %130 = vector.load %arg6[%129, %c1_69, %c1_70, %c0_71] : memref<6x10x10x128xf32, #tpu.memory_space<vmem>>, vector<2x8x8x128xf32>
    %131 = vector.broadcast %127 : vector<1x1x1x128xf32> to vector<2x8x8x128xf32>
    %132 = arith.mulf %131, %130 : vector<2x8x8x128xf32>
    %133 = arith.addf %124, %132 : vector<2x8x8x128xf32>
    %c14 = arith.constant 14 : index
    %c0_72 = arith.constant 0 : index
    %134 = vector.load %arg3[%c14, %c0_72] : memref<27x128xf32, #tpu.memory_space<vmem>>, vector<1x128xf32>
    %135 = vector.shape_cast %134 : vector<1x128xf32> to vector<128xf32>
    %136 = vector.shape_cast %135 : vector<128xf32> to vector<1x1x1x128xf32>
    %c1_i32_73 = arith.constant 1 : i32
    %137 = arith.addi %3, %c1_i32_73 : i32
    %138 = arith.index_cast %137 : i32 to index
    %c1_74 = arith.constant 1 : index
    %c2_75 = arith.constant 2 : index
    %c0_76 = arith.constant 0 : index
    %139 = vector.load %arg6[%138, %c1_74, %c2_75, %c0_76] : memref<6x10x10x128xf32, #tpu.memory_space<vmem>>, vector<2x8x8x128xf32>
    %140 = vector.broadcast %136 : vector<1x1x1x128xf32> to vector<2x8x8x128xf32>
    %141 = arith.mulf %140, %139 : vector<2x8x8x128xf32>
    %142 = arith.addf %133, %141 : vector<2x8x8x128xf32>
    %c15 = arith.constant 15 : index
    %c0_77 = arith.constant 0 : index
    %143 = vector.load %arg3[%c15, %c0_77] : memref<27x128xf32, #tpu.memory_space<vmem>>, vector<1x128xf32>
    %144 = vector.shape_cast %143 : vector<1x128xf32> to vector<128xf32>
    %145 = vector.shape_cast %144 : vector<128xf32> to vector<1x1x1x128xf32>
    %c1_i32_78 = arith.constant 1 : i32
    %146 = arith.addi %3, %c1_i32_78 : i32
    %147 = arith.index_cast %146 : i32 to index
    %c2_79 = arith.constant 2 : index
    %c0_80 = arith.constant 0 : index
    %c0_81 = arith.constant 0 : index
    %148 = vector.load %arg6[%147, %c2_79, %c0_80, %c0_81] : memref<6x10x10x128xf32, #tpu.memory_space<vmem>>, vector<2x8x8x128xf32>
    %149 = vector.broadcast %145 : vector<1x1x1x128xf32> to vector<2x8x8x128xf32>
    %150 = arith.mulf %149, %148 : vector<2x8x8x128xf32>
    %151 = arith.addf %142, %150 : vector<2x8x8x128xf32>
    %c16 = arith.constant 16 : index
    %c0_82 = arith.constant 0 : index
    %152 = vector.load %arg3[%c16, %c0_82] : memref<27x128xf32, #tpu.memory_space<vmem>>, vector<1x128xf32>
    %153 = vector.shape_cast %152 : vector<1x128xf32> to vector<128xf32>
    %154 = vector.shape_cast %153 : vector<128xf32> to vector<1x1x1x128xf32>
    %c1_i32_83 = arith.constant 1 : i32
    %155 = arith.addi %3, %c1_i32_83 : i32
    %156 = arith.index_cast %155 : i32 to index
    %c2_84 = arith.constant 2 : index
    %c1_85 = arith.constant 1 : index
    %c0_86 = arith.constant 0 : index
    %157 = vector.load %arg6[%156, %c2_84, %c1_85, %c0_86] : memref<6x10x10x128xf32, #tpu.memory_space<vmem>>, vector<2x8x8x128xf32>
    %158 = vector.broadcast %154 : vector<1x1x1x128xf32> to vector<2x8x8x128xf32>
    %159 = arith.mulf %158, %157 : vector<2x8x8x128xf32>
    %160 = arith.addf %151, %159 : vector<2x8x8x128xf32>
    %c17 = arith.constant 17 : index
    %c0_87 = arith.constant 0 : index
    %161 = vector.load %arg3[%c17, %c0_87] : memref<27x128xf32, #tpu.memory_space<vmem>>, vector<1x128xf32>
    %162 = vector.shape_cast %161 : vector<1x128xf32> to vector<128xf32>
    %163 = vector.shape_cast %162 : vector<128xf32> to vector<1x1x1x128xf32>
    %c1_i32_88 = arith.constant 1 : i32
    %164 = arith.addi %3, %c1_i32_88 : i32
    %165 = arith.index_cast %164 : i32 to index
    %c2_89 = arith.constant 2 : index
    %c2_90 = arith.constant 2 : index
    %c0_91 = arith.constant 0 : index
    %166 = vector.load %arg6[%165, %c2_89, %c2_90, %c0_91] : memref<6x10x10x128xf32, #tpu.memory_space<vmem>>, vector<2x8x8x128xf32>
    %167 = vector.broadcast %163 : vector<1x1x1x128xf32> to vector<2x8x8x128xf32>
    %168 = arith.mulf %167, %166 : vector<2x8x8x128xf32>
    %169 = arith.addf %160, %168 : vector<2x8x8x128xf32>
    %c18 = arith.constant 18 : index
    %c0_92 = arith.constant 0 : index
    %170 = vector.load %arg3[%c18, %c0_92] : memref<27x128xf32, #tpu.memory_space<vmem>>, vector<1x128xf32>
    %171 = vector.shape_cast %170 : vector<1x128xf32> to vector<128xf32>
    %172 = vector.shape_cast %171 : vector<128xf32> to vector<1x1x1x128xf32>
    %c2_i32_93 = arith.constant 2 : i32
    %173 = arith.addi %3, %c2_i32_93 : i32
    %174 = arith.index_cast %173 : i32 to index
    %c0_94 = arith.constant 0 : index
    %c0_95 = arith.constant 0 : index
    %c0_96 = arith.constant 0 : index
    %175 = vector.load %arg6[%174, %c0_94, %c0_95, %c0_96] : memref<6x10x10x128xf32, #tpu.memory_space<vmem>>, vector<2x8x8x128xf32>
    %176 = vector.broadcast %172 : vector<1x1x1x128xf32> to vector<2x8x8x128xf32>
    %177 = arith.mulf %176, %175 : vector<2x8x8x128xf32>
    %178 = arith.addf %169, %177 : vector<2x8x8x128xf32>
    %c19 = arith.constant 19 : index
    %c0_97 = arith.constant 0 : index
    %179 = vector.load %arg3[%c19, %c0_97] : memref<27x128xf32, #tpu.memory_space<vmem>>, vector<1x128xf32>
    %180 = vector.shape_cast %179 : vector<1x128xf32> to vector<128xf32>
    %181 = vector.shape_cast %180 : vector<128xf32> to vector<1x1x1x128xf32>
    %c2_i32_98 = arith.constant 2 : i32
    %182 = arith.addi %3, %c2_i32_98 : i32
    %183 = arith.index_cast %182 : i32 to index
    %c0_99 = arith.constant 0 : index
    %c1_100 = arith.constant 1 : index
    %c0_101 = arith.constant 0 : index
    %184 = vector.load %arg6[%183, %c0_99, %c1_100, %c0_101] : memref<6x10x10x128xf32, #tpu.memory_space<vmem>>, vector<2x8x8x128xf32>
    %185 = vector.broadcast %181 : vector<1x1x1x128xf32> to vector<2x8x8x128xf32>
    %186 = arith.mulf %185, %184 : vector<2x8x8x128xf32>
    %187 = arith.addf %178, %186 : vector<2x8x8x128xf32>
    %c20 = arith.constant 20 : index
    %c0_102 = arith.constant 0 : index
    %188 = vector.load %arg3[%c20, %c0_102] : memref<27x128xf32, #tpu.memory_space<vmem>>, vector<1x128xf32>
    %189 = vector.shape_cast %188 : vector<1x128xf32> to vector<128xf32>
    %190 = vector.shape_cast %189 : vector<128xf32> to vector<1x1x1x128xf32>
    %c2_i32_103 = arith.constant 2 : i32
    %191 = arith.addi %3, %c2_i32_103 : i32
    %192 = arith.index_cast %191 : i32 to index
    %c0_104 = arith.constant 0 : index
    %c2_105 = arith.constant 2 : index
    %c0_106 = arith.constant 0 : index
    %193 = vector.load %arg6[%192, %c0_104, %c2_105, %c0_106] : memref<6x10x10x128xf32, #tpu.memory_space<vmem>>, vector<2x8x8x128xf32>
    %194 = vector.broadcast %190 : vector<1x1x1x128xf32> to vector<2x8x8x128xf32>
    %195 = arith.mulf %194, %193 : vector<2x8x8x128xf32>
    %196 = arith.addf %187, %195 : vector<2x8x8x128xf32>
    %c21 = arith.constant 21 : index
    %c0_107 = arith.constant 0 : index
    %197 = vector.load %arg3[%c21, %c0_107] : memref<27x128xf32, #tpu.memory_space<vmem>>, vector<1x128xf32>
    %198 = vector.shape_cast %197 : vector<1x128xf32> to vector<128xf32>
    %199 = vector.shape_cast %198 : vector<128xf32> to vector<1x1x1x128xf32>
    %c2_i32_108 = arith.constant 2 : i32
    %200 = arith.addi %3, %c2_i32_108 : i32
    %201 = arith.index_cast %200 : i32 to index
    %c1_109 = arith.constant 1 : index
    %c0_110 = arith.constant 0 : index
    %c0_111 = arith.constant 0 : index
    %202 = vector.load %arg6[%201, %c1_109, %c0_110, %c0_111] : memref<6x10x10x128xf32, #tpu.memory_space<vmem>>, vector<2x8x8x128xf32>
    %203 = vector.broadcast %199 : vector<1x1x1x128xf32> to vector<2x8x8x128xf32>
    %204 = arith.mulf %203, %202 : vector<2x8x8x128xf32>
    %205 = arith.addf %196, %204 : vector<2x8x8x128xf32>
    %c22 = arith.constant 22 : index
    %c0_112 = arith.constant 0 : index
    %206 = vector.load %arg3[%c22, %c0_112] : memref<27x128xf32, #tpu.memory_space<vmem>>, vector<1x128xf32>
    %207 = vector.shape_cast %206 : vector<1x128xf32> to vector<128xf32>
    %208 = vector.shape_cast %207 : vector<128xf32> to vector<1x1x1x128xf32>
    %c2_i32_113 = arith.constant 2 : i32
    %209 = arith.addi %3, %c2_i32_113 : i32
    %210 = arith.index_cast %209 : i32 to index
    %c1_114 = arith.constant 1 : index
    %c1_115 = arith.constant 1 : index
    %c0_116 = arith.constant 0 : index
    %211 = vector.load %arg6[%210, %c1_114, %c1_115, %c0_116] : memref<6x10x10x128xf32, #tpu.memory_space<vmem>>, vector<2x8x8x128xf32>
    %212 = vector.broadcast %208 : vector<1x1x1x128xf32> to vector<2x8x8x128xf32>
    %213 = arith.mulf %212, %211 : vector<2x8x8x128xf32>
    %214 = arith.addf %205, %213 : vector<2x8x8x128xf32>
    %c23 = arith.constant 23 : index
    %c0_117 = arith.constant 0 : index
    %215 = vector.load %arg3[%c23, %c0_117] : memref<27x128xf32, #tpu.memory_space<vmem>>, vector<1x128xf32>
    %216 = vector.shape_cast %215 : vector<1x128xf32> to vector<128xf32>
    %217 = vector.shape_cast %216 : vector<128xf32> to vector<1x1x1x128xf32>
    %c2_i32_118 = arith.constant 2 : i32
    %218 = arith.addi %3, %c2_i32_118 : i32
    %219 = arith.index_cast %218 : i32 to index
    %c1_119 = arith.constant 1 : index
    %c2_120 = arith.constant 2 : index
    %c0_121 = arith.constant 0 : index
    %220 = vector.load %arg6[%219, %c1_119, %c2_120, %c0_121] : memref<6x10x10x128xf32, #tpu.memory_space<vmem>>, vector<2x8x8x128xf32>
    %221 = vector.broadcast %217 : vector<1x1x1x128xf32> to vector<2x8x8x128xf32>
    %222 = arith.mulf %221, %220 : vector<2x8x8x128xf32>
    %223 = arith.addf %214, %222 : vector<2x8x8x128xf32>
    %c24 = arith.constant 24 : index
    %c0_122 = arith.constant 0 : index
    %224 = vector.load %arg3[%c24, %c0_122] : memref<27x128xf32, #tpu.memory_space<vmem>>, vector<1x128xf32>
    %225 = vector.shape_cast %224 : vector<1x128xf32> to vector<128xf32>
    %226 = vector.shape_cast %225 : vector<128xf32> to vector<1x1x1x128xf32>
    %c2_i32_123 = arith.constant 2 : i32
    %227 = arith.addi %3, %c2_i32_123 : i32
    %228 = arith.index_cast %227 : i32 to index
    %c2_124 = arith.constant 2 : index
    %c0_125 = arith.constant 0 : index
    %c0_126 = arith.constant 0 : index
    %229 = vector.load %arg6[%228, %c2_124, %c0_125, %c0_126] : memref<6x10x10x128xf32, #tpu.memory_space<vmem>>, vector<2x8x8x128xf32>
    %230 = vector.broadcast %226 : vector<1x1x1x128xf32> to vector<2x8x8x128xf32>
    %231 = arith.mulf %230, %229 : vector<2x8x8x128xf32>
    %232 = arith.addf %223, %231 : vector<2x8x8x128xf32>
    %c25 = arith.constant 25 : index
    %c0_127 = arith.constant 0 : index
    %233 = vector.load %arg3[%c25, %c0_127] : memref<27x128xf32, #tpu.memory_space<vmem>>, vector<1x128xf32>
    %234 = vector.shape_cast %233 : vector<1x128xf32> to vector<128xf32>
    %235 = vector.shape_cast %234 : vector<128xf32> to vector<1x1x1x128xf32>
    %c2_i32_128 = arith.constant 2 : i32
    %236 = arith.addi %3, %c2_i32_128 : i32
    %237 = arith.index_cast %236 : i32 to index
    %c2_129 = arith.constant 2 : index
    %c1_130 = arith.constant 1 : index
    %c0_131 = arith.constant 0 : index
    %238 = vector.load %arg6[%237, %c2_129, %c1_130, %c0_131] : memref<6x10x10x128xf32, #tpu.memory_space<vmem>>, vector<2x8x8x128xf32>
    %239 = vector.broadcast %235 : vector<1x1x1x128xf32> to vector<2x8x8x128xf32>
    %240 = arith.mulf %239, %238 : vector<2x8x8x128xf32>
    %241 = arith.addf %232, %240 : vector<2x8x8x128xf32>
    %c26 = arith.constant 26 : index
    %c0_132 = arith.constant 0 : index
    %242 = vector.load %arg3[%c26, %c0_132] : memref<27x128xf32, #tpu.memory_space<vmem>>, vector<1x128xf32>
    %243 = vector.shape_cast %242 : vector<1x128xf32> to vector<128xf32>
    %244 = vector.shape_cast %243 : vector<128xf32> to vector<1x1x1x128xf32>
    %c2_i32_133 = arith.constant 2 : i32
    %245 = arith.addi %3, %c2_i32_133 : i32
    %246 = arith.index_cast %245 : i32 to index
    %c2_134 = arith.constant 2 : index
    %c2_135 = arith.constant 2 : index
    %c0_136 = arith.constant 0 : index
    %247 = vector.load %arg6[%246, %c2_134, %c2_135, %c0_136] : memref<6x10x10x128xf32, #tpu.memory_space<vmem>>, vector<2x8x8x128xf32>
    %248 = vector.broadcast %244 : vector<1x1x1x128xf32> to vector<2x8x8x128xf32>
    %249 = arith.mulf %248, %247 : vector<2x8x8x128xf32>
    %250 = arith.addf %241, %249 : vector<2x8x8x128xf32>
    %c0_137 = arith.constant 0 : index
    %c0_138 = arith.constant 0 : index
    %c0_139 = arith.constant 0 : index
    %c0_140 = arith.constant 0 : index
    %c0_141 = arith.constant 0 : index
    %251 = vector.load %arg5[%c0_137, %c0_138, %c0_139, %c0_140, %c0_141] : memref<1x2x8x8x128xf32, #tpu.memory_space<vmem>>, vector<1x2x8x8x128xf32>
    %252 = vector.shape_cast %251 : vector<1x2x8x8x128xf32> to vector<2x8x8x128xf32>
    %253 = vector.shape_cast %250 : vector<2x8x8x128xf32> to vector<1x2x8x8x128xf32>
    tpu.vector_store %arg5[%c0_137, %c0_138, %c0_139, %c0_140, %c0_141], %253 {strides = array<i32>} : memref<1x2x8x8x128xf32, #tpu.memory_space<vmem>>, vector<1x2x8x8x128xf32>,
    return
  }
  func.func @transform_0(%arg0: i32, %arg1: i32) -> (i32, i32, i32, i32, i32) {
    %c0_i32 = arith.constant 0 : i32
    %c0_i32_0 = arith.constant 0 : i32
    %c0_i32_1 = arith.constant 0 : i32
    %c0_i32_2 = arith.constant 0 : i32
    %c0_i32_3 = arith.constant 0 : i32
    return %arg0, %c0_i32, %c0_i32_0, %c0_i32_1, %c0_i32_2 : i32, i32, i32, i32, i32
  }
  func.func @transform_1(%arg0: i32, %arg1: i32) -> (i32, i32) {
    %c0_i32 = arith.constant 0 : i32
    %c0_i32_0 = arith.constant 0 : i32
    %c0_i32_1 = arith.constant 0 : i32
    return %c0_i32, %c0_i32_0 : i32, i32
  }
  func.func @transform_2(%arg0: i32, %arg1: i32) -> (i32, i32) {
    %c0_i32 = arith.constant 0 : i32
    %c0_i32_0 = arith.constant 0 : i32
    %c0_i32_1 = arith.constant 0 : i32
    return %c0_i32, %c0_i32_0 : i32, i32
  }
  func.func @transform_3(%arg0: i32, %arg1: i32) -> (i32, i32, i32, i32, i32) {
    %c0_i32 = arith.constant 0 : i32
    %c0_i32_0 = arith.constant 0 : i32
    %c0_i32_1 = arith.constant 0 : i32
    %c0_i32_2 = arith.constant 0 : i32
    return %arg0, %arg1, %c0_i32, %c0_i32_0, %c0_i32_1 : i32, i32, i32, i32, i32
  }
}

</mosaic_0001>

<bundles_post_ra>
// kernel: tpu_custom_call.1
= control target key start
LH: loop header
LB: loop body
LE: loop exit
PB: predicated region body
PF: predicated region fallthrough
CT: control target
= control target key end

     0   :  { %s4177_s0 = inlined_call_operand.hbm [shape: f32[2,4,8,8,128], index: 0, kind: input, shape index: {}]   ;;  %s4178_s1 = inlined_call_operand.hbm [shape: f32[27,128], index: 1, kind: input, shape index: {}]   ;;  %s4179_s2 = inlined_call_operand.vmem [shape: f32[1,128], index: 2, kind: input, shape index: {}]   ;;  %s4180_s3 = inlined_call_operand.hbm [shape: f32[2,4,8,8,128], index: 3, kind: output, shape index: {}]  }
   0x1   :  { %4347 = sst [smem:[#allocation56_spill]] %s4178_s1 }
   0x2   :  { %8 = vsyncpa [#allocation4], 0 }
   0x3   :  { %10 = vsyncpa [#allocation4 + $0x1], 0 }
   0x4   :  { %11 = vsyncpa [#allocation7], 0 }
   0x5   :  { %12 = vsyncpa [#allocation5], 0 }
   0x6   :  { %14 = vsyncpa [#allocation5 + $0x1], 0  ;;  %s2809_s12 = smov 0   ;;  %s2811_s13 = smov 0  }
   0x7   :  { %s2813_s14 = smov 0   ;;  %s2815_s15 = smov 0  }
   0x8   :  { %s2817_s16 = smov 0   ;;  %s2819_s17 = smov 0  }
   0x9   :  { %s2821_s18 = smov 0   ;;  %s2823_s19 = smov 0  }
   0xa   :  { %s2825_s20 = smov 0   ;;  %s2827_s21 = smov 0  }
   0xb   :  { %s2829_s22 = smov 0  }
   0xc LB: > { %4348 = sst [smem:[#allocation12_spill]] %s2739_s12  ;;  %s2029_s23 = sadd.s32 4294967295, %s2779_s22   ;;  %s2779_s22 = sphi %s2829_s22, %s20_s22   ;;  %s2775_s21 = sphi %s2827_s21, %s4630_s21   ;;  %s2771_s20 = sphi %s2825_s20, %s4621_s20   ;;  %s2767_s19 = sphi %s2823_s19, %s4629_s19   ;;  %s2763_s18 = sphi %s2821_s18, %s4620_s18   ;;  %s2759_s17 = sphi %s2819_s17, %s4628_s17   ;;  %s2755_s16 = sphi %s2817_s16, %s4627_s16   ;;  %s2751_s15 = sphi %s2815_s15, %s4626_s15   ;;  %s2747_s14 = sphi %s2813_s14, %s4625_s14   ;;  %s2743_s13 = sphi %s2811_s13, %s4624_s13   ;;  %s2739_s12 = sphi %s2809_s12, %s4623_s12  }
   0xd   : > { %4349 = sst [smem:[#allocation13_spill]] %s2771_s20  ;;  %s2030_s24 = sadd.s32 4294967294, %s2779_s22  }
   0xe   : > { %p52_p0 = scmp.ne.s32.totalorder %s2755_s16, %s2751_s15  ;;  %p2865_p1 = scmp.eq.s32.totalorder %s2029_s23, 0 }
   0xf   : > { %s109_s26 = sadd.s32 1, %s2747_s14  ;;  %p119_p2 = scmp.ne.s32.totalorder %s2747_s14, %s2743_s13 }
  0x10   : > { %s4350_s25 = scalar_select %p2865_p1, 1, 0 }
  0x11   : > { %p2874_p3 = por %p2865_p1, %p52_p0  ;;  %p120_p4 = scmp.eq.s32.totalorder %s2029_s23, 3 }
  0x12   : > { %p125_p5 = scmp.ne.s32.totalorder %s2743_s13, %s2739_s12  ;;  %p126_p6 = scmp.eq.s32.totalorder %s2030_s24, 3 }
  0x13   : > { %s4351_s27 = scalar_select %p2874_p3, 1, 0 }
  0x14   : > { %p2880_p7 = por %p120_p4, %p119_p2  ;;  %p2031_p8 = scmp.ge.s32.totalorder %s2779_s22, 1 }
  0x15   : > { %p2885_p9 = por %p126_p6, %p125_p5  ;;  %p133_p10 = scmp.lt.s32.totalorder %s2779_s22, 5 }
  0x16   : > { %s4352_s28 = scalar_select %p2880_p7, 1, 0 }
  0x17   : > { %s4353_s29 = scalar_select %p2885_p9, 1, 0 }
  0x18   : > { %p2890_p11 = pnand %p2031_p8, %p133_p10  ;;  %s2781_s4 = smov [#allocation6]  }
  0x19   : > { %4354 = sst [smem:[#allocation14_spill]] %s4353_s29  ;;  %s145_s5 = sshll.u32 %s2781_s4, 4  ;;  %s146_s5 = int_to_ptr.vmem [resolvable:$true] %s145_s5 }
  0x1a   : > { %s4355_s30 = scalar_select %p2890_p11, 1, 0 }
  0x1b   : > { %p2485_p12 = pneg %p2890_p11  ;;  %s4357_s1 = sld [smem:[#allocation56_spill]] }
  0x1d   : > { %p2898_p13 = pnand %p2485_p12, %p2865_p1 }
  0x1f   : > { %p2597_p2 = pneg %p2898_p13 }
  0x21   : > { %s2595_s9 = scalar_lea.hbm %s4357_s1, 512 }
  0x22   : > { %p2596_p0 = scmp.ne.s32.totalorder %s4357_s1, %s2595_s9  ;;  %p2602_p6 = scmp.lt.u32.totalorder %s2595_s9, %s4357_s1 }
  0x24   : > { %p2598_p4 = pnand %p2597_p2, %p2596_p0 }
  0x26   : > { %p2599_p5 = pneg %p2598_p4 }
  0x28   : > { %p2604_p8 = pnand %p2602_p6, %p2599_p5 }
  0x2a   : > { %2607 = shalt.err (!%p2604_p8)
}
  0x2b   : > { %s2608_s24 = scalar_lea.vmem %s146_s5, 512  ;;  %p2616_p7 = scmp.lt.s32.totalorder %s146_s5, %s146_s5 }
  0x2c   : > { %p2609_p10 = scmp.ne.s32.totalorder %s146_s5, %s2608_s24  ;;  %p2617_p1 = scmp.lt.s32.totalorder %s2608_s24, %s2608_s24 }
  0x2e   : > { %p2611_p12 = pnand %p2609_p10, %p2597_p2  ;;  %p2618_p3 = por %p2617_p1, %p2616_p7 }
  0x30   : > { %p2612_p9 = pneg %p2611_p12 }
  0x32   : > { %p2619_p11 = pnand %p2618_p3, %p2612_p9 }
  0x34   : > { %2622 = shalt.err (!%p2619_p11)
}
  0x35   : > { %s4186_s4 = smov 128   ;;  %s4187_s7 = smov 8  }
  0x36   : > { %2488 = dma.hbm_to_vmem [thread:$0]  (!%p2898_p13), %s4357_s1, 512, %s146_s5, [#allocation7], %s4186_s4, %s4186_s4, %s4187_s7  }
  0x37   : > { %s29_s10 = sadd.s32 1, %s2771_s20  ;;  %s32_s11 = sadd.s32 1, %s2775_s21 }
  0x38   : > { %p30_p1 = scmp.ge.s32.totalorder %s29_s10, 2  ;;  %s39_s15 = sadd.s32 1, %s2759_s17 }
  0x39   : > { %p46_p3 = scmp.ne.s32.totalorder %s2759_s17, %s2755_s16  ;;  %p47_p7 = scmp.eq.s32.totalorder %s2779_s22, 0 }
  0x3a   : > { %s4632_s10 = smov (%p30_p1, %s29_s10), 0  ;;  %s4634_s11 = smov (!%p30_p1, %s32_s11), %s2775_s21 }
  0x3b   : > { %4358 = sst [smem:[#allocation15_spill]] %s4632_s10  ;;  %s105_s6 = ssub.s32 %s2771_s20, %s4632_s10 }
  0x3c   : > { %p34_p9 = scmp.ge.s32.totalorder %s4634_s11, 2  ;;  %p2498_p11 = scmp.lt.s32.totalorder %s2779_s22, 4 }
  0x3d   : > { %p2933_p13 = por %p47_p7, %p46_p3  ;;  %s162_s23 = sand.u32 1, %s2759_s17  }
  0x3e   : > { %s4636_s11 = smov (%p34_p9, %s4634_s11), 0  ;;  %s2034_s24 = sshll.u32 %s162_s23, 8 }
  0x3f   : > { %4360 = sst [smem:[#allocation16_spill]] %s4636_s11  ;;  %s36_s8 = ssub.s32 %s2775_s21, %s4636_s11 }
  0x40   : > { %p37_p0 = scmp.eq.s32.totalorder %s36_s8, 0  ;;  %s106_s9 = sor.u32 %s105_s6, %s36_s8 }
  0x41   : > { %p107_p2 = scmp.eq.s32.totalorder %s106_s9, 0  ;;  %s2475_s4 = sshll.u32 %s2775_s21, 12 }
  0x42   : > { %s2944_s7 = scalar_select %p37_p0, %s2759_s17, %s39_s15  }
  0x43   : > { %s2949_s1 = scalar_select %p107_p2, %s2747_s14, %s109_s26  }
  0x44   : > { %s2954_s29 = scalar_lea.hbm %s4177_s0, %s2475_s4  ;;  %s166_s12 = scalar_lea.vmem [#allocation3], %s2034_s24 }
  0x45   : > { %s173_s11 = sshll.u32 %s166_s12, 4  ;;  %p2962_p4 = pnand %p2498_p11, %p2933_p13  ;;  %s2956_s11 = int_to_ptr.vmem [resolvable:$true] %s173_s11 }
  0x46   : > { %s2966_s26 = scalar_lea.sflag [#allocation4], %s162_s23  ;;  %s2623_s20 = scalar_lea.hbm %s2954_s29, 4096 }
  0x47   : > { %p2624_p5 = scmp.ne.s32.totalorder %s2954_s29, %s2623_s20  ;;  %p2625_p6 = pneg %p2962_p4 }
  0x48   : > { %s2628_s10 = scalar_lea.hbm %s4177_s0, 8192  ;;  %p2629_p12 = scmp.lt.u32.totalorder %s2954_s29, %s4177_s0 }
  0x49   : > { %p2626_p8 = pnand %p2625_p6, %p2624_p5  ;;  %p2630_p1 = scmp.lt.u32.totalorder %s2628_s10, %s2623_s20 }
  0x4a   : > { %p2632_p7 = scmp.lt.u32.totalorder %s2623_s20, %s2954_s29 }
  0x4b   : > { %p2627_p10 = pneg %p2626_p8  ;;  %p2631_p3 = por %p2630_p1, %p2629_p12 }
  0x4d   : > { %p2633_p9 = por %p2632_p7, %p2631_p3 }
  0x4f   : > { %p2634_p11 = pnand %p2633_p9, %p2627_p10 }
  0x51   : > { %2637 = shalt.err (!%p2634_p11)
}
  0x52   : > { %s2638_s23 = scalar_lea.vmem %s2956_s11, 4096  ;;  %s2784_s24 = smov [#allocation3]  }
  0x53   : > { %p2639_p13 = scmp.ne.s32.totalorder %s2956_s11, %s2638_s23  ;;  %s2643_s8 = sshll.u32 %s2784_s24, 4  ;;  %s2644_s8 = int_to_ptr.vmem [resolvable:$false] %s2643_s8 }
  0x54   : > { %s2645_s9 = scalar_lea.vmem %s2644_s8, 8192  ;;  %p2646_p5 = scmp.lt.s32.totalorder %s2956_s11, %s2644_s8 }
  0x55   : > { %p2641_p0 = pnand %p2639_p13, %p2625_p6  ;;  %p2647_p8 = scmp.lt.s32.totalorder %s2645_s9, %s2638_s23 }
  0x57   : > { %p2642_p2 = pneg %p2641_p0  ;;  %p2648_p12 = por %p2647_p8, %p2646_p5 }
  0x59   : > { %p2649_p1 = pnand %p2648_p12, %p2642_p2 }
  0x5b   : > { %2652 = shalt.err (!%p2649_p1)
}
  0x5c   : > { %s4362_s20 = smov 8   ;;  %s4363_s12 = smov 128  }
  0x5d   : > { %2492 = dma.hbm_to_vmem [thread:$0]  (!%p2962_p4), %s2954_s29, 4096, %s2956_s11, %s2966_s26, %s4363_s12, %s4363_s12, %s4362_s20  }
  0x5e   : > { %p4364_p6 = scmp.ne.s32.totalorder %s4355_s30, 0 }
  0x60   : > { %185 = sbr.rel (%p4364_p6) target bundleno = 439 (0x1b7), region = 32 }
  0x67   : > { %s187_s4 = sand.u32 1, %s2755_s16   ;;  %p4365_p10 = scmp.ne.s32.totalorder %s4351_s27, 0 }
  0x68   : > { %s2038_s10 = sshll.u32 %s187_s4, 8  ;;  %s188_s6 = scalar_lea.sflag [#allocation4], %s187_s4 }
  0x69   : > { %s3000_s5 = scalar_lea.vmem [#allocation3], %s2038_s10 }
  0x6a   : > { %2726 = dma.done.wait (%p4365_p10), %s188_s6, 4096  }
  0x6b   : > { %2728 = vsyncadd (%p4365_p10), %s188_s6, 4294963200  ;;  %p4366_p3 = scmp.ne.s32.totalorder %s4350_s25, 0 }
  0x6d   : > { %2730 = dma.done.wait (%p4366_p3), [#allocation7], 512  }
  0x6e   : > { %2732 = vsyncadd (%p4366_p3), [#allocation7], 4294966784  ;;  %s215_s29 = sand.u32 1, %s2743_s13   ;;  %p2041_p4 = scmp.ne.s32.totalorder %s2763_s18, 0 }
  0x6f   : > { %s2040_s30 = sshll.u32 %s215_s29, 7  ;;  %v3017_v0 = vld [vmem:[%s3000_s5] sm:$0xff] (!%p2041_p4)  ;;  %v3020_v1 = vld [vmem:[%s3000_s5 + $0x8] sm:$0xff] (!%p2041_p4)  ;;  %v3023_v2 = vld [vmem:[%s3000_s5 + $0x10] sm:$0xff] (!%p2041_p4)  ;;  %v2785_v3 = vmov (!%p2041_p4), 0.0  }
  0x70   : > { %s3013_s11 = scalar_lea.vmem [#allocation8], %s2040_s30  ;;  %222 = sbr.rel (%p2041_p4) target bundleno = 188 (0xbc), region = 44  ;;  %245 = vst [vmem:[#allocation2 + $0xb0] sm:$0xff] (!%p2041_p4), %v2785_v3  ;;  %223 = vst [vmem:[#allocation2] sm:$0xff] (!%p2041_p4), %v2785_v3  ;;  %v346_v4 = vld [vmem:[%s3000_s5 + $0x18] sm:$0xff] (!%p2041_p4)  ;;  %v347_v5 = vld [vmem:[%s3000_s5 + $0x20] sm:$0xff] (!%p2041_p4) }
  0x71   : > { %224 = vst [vmem:[#allocation2 + $0x8] sm:$0x3] (!%p2041_p4), %v2785_v3  ;;  %225 = vst [vmem:[#allocation2 + $0x10] sm:$0xff] (!%p2041_p4), %v2785_v3  ;;  %v348_v6 = vld [vmem:[%s3000_s5 + $0x28] sm:$0xff] (!%p2041_p4)  ;;  %v349_v7 = vld [vmem:[%s3000_s5 + $0x30] sm:$0xff] (!%p2041_p4) }
  0x72   : > { %226 = vst [vmem:[#allocation2 + $0x18] sm:$0x3] (!%p2041_p4), %v2785_v3  ;;  %227 = vst [vmem:[#allocation2 + $0x20] sm:$0xff] (!%p2041_p4), %v2785_v3  ;;  %v350_v8 = vld [vmem:[%s3000_s5 + $0x38] sm:$0xff] (!%p2041_p4)  ;;  %v351_v9 = vld [vmem:[%s3000_s5 + $0x40] sm:$0xff] (!%p2041_p4) }
  0x73   : > { %228 = vst [vmem:[#allocation2 + $0x28] sm:$0x3] (!%p2041_p4), %v2785_v3  ;;  %229 = vst [vmem:[#allocation2 + $0x30] sm:$0xff] (!%p2041_p4), %v2785_v3  ;;  %v352_v10 = vld [vmem:[%s3000_s5 + $0x48] sm:$0xff] (!%p2041_p4)  ;;  %v353_v11 = vld [vmem:[%s3000_s5 + $0x50] sm:$0xff] (!%p2041_p4) }
  0x74   : > { %230 = vst [vmem:[#allocation2 + $0x38] sm:$0x3] (!%p2041_p4), %v2785_v3  ;;  %231 = vst [vmem:[#allocation2 + $0x40] sm:$0xff] (!%p2041_p4), %v2785_v3  ;;  %v354_v12 = vld [vmem:[%s3000_s5 + $0x58] sm:$0xff] (!%p2041_p4)  ;;  %v355_v13 = vld [vmem:[%s3000_s5 + $0x60] sm:$0xff] (!%p2041_p4) }
  0x75   : > { %232 = vst [vmem:[#allocation2 + $0x48] sm:$0x3] (!%p2041_p4), %v2785_v3  ;;  %233 = vst [vmem:[#allocation2 + $0x50] sm:$0xff] (!%p2041_p4), %v2785_v3  ;;  %v356_v14 = vld [vmem:[%s3000_s5 + $0x68] sm:$0xff] (!%p2041_p4)  ;;  %v357_v15 = vld [vmem:[%s3000_s5 + $0x70] sm:$0xff] (!%p2041_p4) }
  0x76   : > { %234 = vst [vmem:[#allocation2 + $0x58] sm:$0x3] (!%p2041_p4), %v2785_v3  ;;  %235 = vst [vmem:[#allocation2 + $0x60] sm:$0xff] (!%p2041_p4), %v2785_v3  ;;  %v358_v16 = vld [vmem:[%s3000_s5 + $0x78] sm:$0xff] (!%p2041_p4)  ;;  %v359_v17 = vld [vmem:[%s3000_s5 + $0x80] sm:$0xff] (!%p2041_p4) }
  0x77   : > { %236 = vst [vmem:[#allocation2 + $0x68] sm:$0x3] %v2785_v3  ;;  %237 = vst [vmem:[#allocation2 + $0x70] sm:$0xff] %v2785_v3  ;;  %v360_v18 = vld [vmem:[%s3000_s5 + $0x88] sm:$0xff]  ;;  %v361_v19 = vld [vmem:[%s3000_s5 + $0x90] sm:$0xff] }
  0x78   : > { %238 = vst [vmem:[#allocation2 + $0x78] sm:$0x3] %v2785_v3  ;;  %239 = vst [vmem:[#allocation2 + $0x80] sm:$0xff] %v2785_v3  ;;  %v362_v20 = vld [vmem:[%s3000_s5 + $0x98] sm:$0xff]  ;;  %v363_v21 = vld [vmem:[%s3000_s5 + $0xa0] sm:$0xff] }
  0x79   : > { %240 = vst [vmem:[#allocation2 + $0x88] sm:$0x3] %v2785_v3  ;;  %241 = vst [vmem:[#allocation2 + $0x90] sm:$0xff] %v2785_v3  ;;  %v364_v22 = vld [vmem:[%s3000_s5 + $0xa8] sm:$0xff]  ;;  %v365_v23 = vld [vmem:[%s3000_s5 + $0xb0] sm:$0xff] }
  0x7a   : > { %242 = vst [vmem:[#allocation2 + $0x98] sm:$0x3] %v2785_v3  ;;  %243 = vst [vmem:[#allocation2 + $0xa0] sm:$0xff] %v2785_v3  ;;  %v366_v24 = vld [vmem:[%s3000_s5 + $0xb8] sm:$0xff]  ;;  %v367_v25 = vld [vmem:[%s3000_s5 + $0xc0] sm:$0xff] }
  0x7b   : > { %244 = vst [vmem:[#allocation2 + $0xa8] sm:$0x3] %v2785_v3  ;;  %246 = vst [vmem:[#allocation2 + $0xb8] sm:$0x3] %v2785_v3  ;;  %v368_v26 = vld [vmem:[%s3000_s5 + $0xc8] sm:$0xff]  ;;  %v369_v27 = vld [vmem:[%s3000_s5 + $0xd0] sm:$0xff] }
  0x7c   : > { %247 = vst [vmem:[#allocation2 + $0xc0] sm:$0xff] %v2785_v3  ;;  %248 = vst [vmem:[#allocation2 + $0xc8] sm:$0x3] %v2785_v3  ;;  %v370_v28 = vld [vmem:[%s3000_s5 + $0xd8] sm:$0xff]  ;;  %v371_v29 = vld [vmem:[%s3000_s5 + $0xe0] sm:$0xff] }
  0x7d   : > { %249 = vst [vmem:[#allocation2 + $0xd0] sm:$0xff] %v2785_v3  ;;  %250 = vst [vmem:[#allocation2 + $0xd8] sm:$0x3] %v2785_v3  ;;  %v372_v30 = vld [vmem:[%s3000_s5 + $0xe8] sm:$0xff]  ;;  %v373_v31 = vld [vmem:[%s3000_s5 + $0xf0] sm:$0xff] }
  0x7e   : > { %251 = vst [vmem:[#allocation2 + $0xe0] sm:$0xff] %v2785_v3  ;;  %252 = vst [vmem:[#allocation2 + $0xe8] sm:$0x3] %v2785_v3  ;;  %v374_v32 = vld [vmem:[%s3000_s5 + $0xf8] sm:$0xff] }
  0x7f   : > { %253 = vst [vmem:[#allocation2 + $0xf0] sm:$0xff] %v2785_v3  ;;  %254 = vst [vmem:[#allocation2 + $0xf8] sm:$0x3] %v2785_v3 }
  0x80   : > { %255 = vst [vmem:[#allocation2 + $0x100] sm:$0xff] %v2785_v3  ;;  %256 = vst [vmem:[#allocation2 + $0x108] sm:$0x3] %v2785_v3 }
  0x81   : > { %257 = vst [vmem:[#allocation2 + $0x110] sm:$0xff] %v2785_v3  ;;  %258 = vst [vmem:[#allocation2 + $0x118] sm:$0x3] %v2785_v3 }
  0x82   : > { %259 = vst [vmem:[#allocation2 + $0x120] sm:$0xff] %v2785_v3  ;;  %260 = vst [vmem:[#allocation2 + $0x128] sm:$0x3] %v2785_v3 }
  0x83   : > { %261 = vst [vmem:[#allocation2 + $0x130] sm:$0xff] %v2785_v3  ;;  %262 = vst [vmem:[#allocation2 + $0x138] sm:$0x3] %v2785_v3 }
  0x84   : > { %263 = vst [vmem:[#allocation2 + $0x140] sm:$0xff] %v2785_v3  ;;  %264 = vst [vmem:[#allocation2 + $0x148] sm:$0x3] %v2785_v3 }
  0x85   : > { %265 = vst [vmem:[#allocation2 + $0x150] sm:$0xff] %v2785_v3  ;;  %266 = vst [vmem:[#allocation2 + $0x158] sm:$0x3] %v2785_v3 }
  0x86   : > { %267 = vst [vmem:[#allocation2 + $0x160] sm:$0xff] %v2785_v3  ;;  %268 = vst [vmem:[#allocation2 + $0x168] sm:$0x3] %v2785_v3 }
  0x87   : > { %269 = vst [vmem:[#allocation2 + $0x170] sm:$0xff] %v2785_v3  ;;  %270 = vst [vmem:[#allocation2 + $0x178] sm:$0x3] %v2785_v3 }
  0x88   : > { %271 = vst [vmem:[#allocation2 + $0x180] sm:$0xff] %v2785_v3  ;;  %272 = vst [vmem:[#allocation2 + $0x188] sm:$0x3] %v2785_v3 }
  0x89   : > { %273 = vst [vmem:[#allocation2 + $0x190] sm:$0xff] %v2785_v3  ;;  %274 = vst [vmem:[#allocation2 + $0x198] sm:$0x3] %v2785_v3 }
  0x8a   : > { %275 = vst [vmem:[#allocation2 + $0x1a0] sm:$0xff] %v2785_v3  ;;  %276 = vst [vmem:[#allocation2 + $0x1a8] sm:$0x3] %v2785_v3 }
  0x8b   : > { %277 = vst [vmem:[#allocation2 + $0x1b0] sm:$0xff] %v2785_v3  ;;  %278 = vst [vmem:[#allocation2 + $0x1b8] sm:$0x3] %v2785_v3 }
  0x8c   : > { %279 = vst [vmem:[#allocation2 + $0x1c0] sm:$0xff] %v2785_v3  ;;  %280 = vst [vmem:[#allocation2 + $0x1c8] sm:$0x3] %v2785_v3 }
  0x8d   : > { %281 = vst [vmem:[#allocation2 + $0x1d0] sm:$0xff] %v2785_v3  ;;  %282 = vst [vmem:[#allocation2 + $0x1d8] sm:$0x3] %v2785_v3 }
  0x8e   : > { %283 = vst [vmem:[#allocation2 + $0x1e0] sm:$0xff] %v2785_v3  ;;  %284 = vst [vmem:[#allocation2 + $0x1e8] sm:$0x3] %v2785_v3 }
  0x8f   : > { %285 = vst [vmem:[#allocation2 + $0x1f0] sm:$0xff] %v2785_v3  ;;  %286 = vst [vmem:[#allocation2 + $0x1f8] sm:$0x3] %v2785_v3 }
  0x90   : > { %287 = vst [vmem:[#allocation2 + $0x200] sm:$0xff] %v2785_v3  ;;  %288 = vst [vmem:[#allocation2 + $0x208] sm:$0x3] %v2785_v3 }
  0x91   : > { %289 = vst [vmem:[#allocation2 + $0x210] sm:$0xff] %v2785_v3  ;;  %290 = vst [vmem:[#allocation2 + $0x218] sm:$0x3] %v2785_v3 }
  0x92   : > { %291 = vst [vmem:[#allocation2 + $0x220] sm:$0xff] %v2785_v3  ;;  %292 = vst [vmem:[#allocation2 + $0x228] sm:$0x3] %v2785_v3 }
  0x93   : > { %293 = vst [vmem:[#allocation2 + $0x230] sm:$0xff] %v2785_v3  ;;  %294 = vst [vmem:[#allocation2 + $0x238] sm:$0x3] %v2785_v3 }
  0x94   : > { %295 = vst [vmem:[#allocation2 + $0x240] sm:$0xff] %v2785_v3  ;;  %296 = vst [vmem:[#allocation2 + $0x248] sm:$0x3] %v2785_v3 }
  0x95   : > { %297 = vst [vmem:[#allocation2 + $0x250] sm:$0xff] %v2785_v3  ;;  %298 = vst [vmem:[#allocation2 + $0x258] sm:$0x3] %v2785_v3 }
  0x96   : > { %299 = vst [vmem:[#allocation2 + $0x260] sm:$0xff] %v2785_v3  ;;  %300 = vst [vmem:[#allocation2 + $0x268] sm:$0x3] %v2785_v3 }
  0x97   : > { %301 = vst [vmem:[#allocation2 + $0x270] sm:$0xff] %v2785_v3  ;;  %302 = vst [vmem:[#allocation2 + $0x278] sm:$0x3] %v2785_v3 }
  0x98   : > { %303 = vst [vmem:[#allocation2 + $0x280] sm:$0xff] %v2785_v3  ;;  %304 = vst [vmem:[#allocation2 + $0x288] sm:$0x3] %v2785_v3 }
  0x99   : > { %305 = vst [vmem:[#allocation2 + $0x290] sm:$0xff] %v2785_v3  ;;  %306 = vst [vmem:[#allocation2 + $0x298] sm:$0x3] %v2785_v3 }
  0x9a   : > { %307 = vst [vmem:[#allocation2 + $0x2a0] sm:$0xff] %v2785_v3  ;;  %308 = vst [vmem:[#allocation2 + $0x2a8] sm:$0x3] %v2785_v3 }
  0x9b   : > { %309 = vst [vmem:[#allocation2 + $0x2b0] sm:$0xff] %v2785_v3  ;;  %310 = vst [vmem:[#allocation2 + $0x2b8] sm:$0x3] %v2785_v3 }
  0x9c   : > { %311 = vst [vmem:[#allocation2 + $0x2c0] sm:$0xff] %v2785_v3  ;;  %312 = vst [vmem:[#allocation2 + $0x2c8] sm:$0x3] %v2785_v3 }
  0x9d   : > { %313 = vst [vmem:[#allocation2 + $0x2d0] sm:$0xff] %v2785_v3  ;;  %314 = vst [vmem:[#allocation2 + $0x2d8] sm:$0x3] %v2785_v3 }
  0x9e   : > { %315 = vst [vmem:[#allocation2 + $0x2e0] sm:$0xff] %v2785_v3  ;;  %316 = vst [vmem:[#allocation2 + $0x2e8] sm:$0x3] %v2785_v3 }
  0x9f   : > { %317 = vst [vmem:[#allocation2 + $0x2f0] sm:$0xff] %v2785_v3  ;;  %318 = vst [vmem:[#allocation2 + $0x2f8] sm:$0x3] %v2785_v3 }
  0xa0   : > { %319 = vst [vmem:[#allocation2 + $0x300] sm:$0xff] %v2785_v3  ;;  %320 = vst [vmem:[#allocation2 + $0x308] sm:$0x3] %v2785_v3 }
  0xa1   : > { %321 = vst [vmem:[#allocation2 + $0x310] sm:$0xff] %v2785_v3  ;;  %322 = vst [vmem:[#allocation2 + $0x318] sm:$0x3] %v2785_v3 }
  0xa2   : > { %323 = vst [vmem:[#allocation2 + $0x320] sm:$0xff] %v2785_v3  ;;  %324 = vst [vmem:[#allocation2 + $0x328] sm:$0x3] %v2785_v3 }
  0xa3   : > { %325 = vst [vmem:[#allocation2 + $0x330] sm:$0xff] %v2785_v3  ;;  %326 = vst [vmem:[#allocation2 + $0x338] sm:$0x3] %v2785_v3 }
  0xa4   : > { %327 = vst [vmem:[#allocation2 + $0x340] sm:$0xff] %v2785_v3  ;;  %328 = vst [vmem:[#allocation2 + $0x348] sm:$0x3] %v2785_v3 }
  0xa5   : > { %329 = vst [vmem:[#allocation2 + $0x350] sm:$0xff] %v2785_v3  ;;  %330 = vst [vmem:[#allocation2 + $0x358] sm:$0x3] %v2785_v3 }
  0xa6   : > { %331 = vst [vmem:[#allocation2 + $0x360] sm:$0xff] %v2785_v3  ;;  %332 = vst [vmem:[#allocation2 + $0x368] sm:$0x3] %v2785_v3 }
  0xa7   : > { %333 = vst [vmem:[#allocation2 + $0x370] sm:$0xff] %v2785_v3  ;;  %334 = vst [vmem:[#allocation2 + $0x378] sm:$0x3] %v2785_v3 }
  0xa8   : > { %335 = vst [vmem:[#allocation2 + $0x380] sm:$0xff] %v2785_v3  ;;  %336 = vst [vmem:[#allocation2 + $0x388] sm:$0x3] %v2785_v3 }
  0xa9   : > { %337 = vst [vmem:[#allocation2 + $0x390] sm:$0xff] %v2785_v3  ;;  %338 = vst [vmem:[#allocation2 + $0x398] sm:$0x3] %v2785_v3 }
  0xaa   : > { %339 = vst [vmem:[#allocation2 + $0x3a0] sm:$0xff] %v2785_v3  ;;  %340 = vst [vmem:[#allocation2 + $0x3a8] sm:$0x3] %v2785_v3 }
  0xab   : > { %341 = vst [vmem:[#allocation2 + $0x3b0] sm:$0xff] %v2785_v3  ;;  %342 = vst [vmem:[#allocation2 + $0x3b8] sm:$0x3] %v2785_v3 }
  0xac   : > { %376 = vst [vmem:[#allocation2 + $0xb1] sm:$0xff] %v3017_v0  ;;  %377 = vst [vmem:[#allocation2 + $0xc1] sm:$0xff] %v3020_v1 }
  0xad   : > { %378 = vst [vmem:[#allocation2 + $0xd1] sm:$0xff] %v3023_v2  ;;  %379 = vst [vmem:[#allocation2 + $0xe1] sm:$0xff] %v346_v4 }
  0xae   : > { %380 = vst [vmem:[#allocation2 + $0xf1] sm:$0xff] %v347_v5  ;;  %381 = vst [vmem:[#allocation2 + $0x101] sm:$0xff] %v348_v6 }
  0xaf   : > { %382 = vst [vmem:[#allocation2 + $0x111] sm:$0xff] %v349_v7  ;;  %383 = vst [vmem:[#allocation2 + $0x121] sm:$0xff] %v350_v8 }
  0xb0   : > { %384 = vst [vmem:[#allocation2 + $0x151] sm:$0xff] %v351_v9  ;;  %385 = vst [vmem:[#allocation2 + $0x161] sm:$0xff] %v352_v10 }
  0xb1   : > { %386 = vst [vmem:[#allocation2 + $0x171] sm:$0xff] %v353_v11  ;;  %387 = vst [vmem:[#allocation2 + $0x181] sm:$0xff] %v354_v12 }
  0xb2   : > { %388 = vst [vmem:[#allocation2 + $0x191] sm:$0xff] %v355_v13  ;;  %389 = vst [vmem:[#allocation2 + $0x1a1] sm:$0xff] %v356_v14 }
  0xb3   : > { %390 = vst [vmem:[#allocation2 + $0x1b1] sm:$0xff] %v357_v15  ;;  %391 = vst [vmem:[#allocation2 + $0x1c1] sm:$0xff] %v358_v16 }
  0xb4   : > { %392 = vst [vmem:[#allocation2 + $0x1f1] sm:$0xff] %v359_v17  ;;  %393 = vst [vmem:[#allocation2 + $0x201] sm:$0xff] %v360_v18 }
  0xb5   : > { %394 = vst [vmem:[#allocation2 + $0x211] sm:$0xff] %v361_v19  ;;  %395 = vst [vmem:[#allocation2 + $0x221] sm:$0xff] %v362_v20 }
  0xb6   : > { %396 = vst [vmem:[#allocation2 + $0x231] sm:$0xff] %v363_v21  ;;  %397 = vst [vmem:[#allocation2 + $0x241] sm:$0xff] %v364_v22 }
  0xb7   : > { %398 = vst [vmem:[#allocation2 + $0x251] sm:$0xff] %v365_v23  ;;  %399 = vst [vmem:[#allocation2 + $0x261] sm:$0xff] %v366_v24 }
  0xb8   : > { %400 = vst [vmem:[#allocation2 + $0x291] sm:$0xff] %v367_v25  ;;  %401 = vst [vmem:[#allocation2 + $0x2a1] sm:$0xff] %v368_v26 }
  0xb9   : > { %402 = vst [vmem:[#allocation2 + $0x2b1] sm:$0xff] %v369_v27  ;;  %403 = vst [vmem:[#allocation2 + $0x2c1] sm:$0xff] %v370_v28 }
  0xba   : > { %404 = vst [vmem:[#allocation2 + $0x2d1] sm:$0xff] %v371_v29  ;;  %405 = vst [vmem:[#allocation2 + $0x2e1] sm:$0xff] %v372_v30 }
  0xbb   : > { %406 = vst [vmem:[#allocation2 + $0x2f1] sm:$0xff] %v373_v31  ;;  %407 = vst [vmem:[#allocation2 + $0x301] sm:$0xff] %v374_v32 }
  0xbc PF: > { %s2044_s25 = smul.u32 320, %s2763_s18  ;;  %v2045_v33 = vld [vmem:[#allocation6] ss:$0 sm:$0xff]  ;;  %v3178_v34 = vld [vmem:[#allocation6 + $0x3] ss:$0 sm:$0xff]  ;;  %s2476_s23 = sshll.u32 %s2763_s18, 4 }
  0xbd   : > { %v3183_v35 = vld [vmem:[%s4179_s2] ss:$0 sm:$0xff]  ;;  %v2046_v3 = vld [vmem:[#allocation6 + $0x1] ss:$0 sm:$0xff]  ;;  %s2471_s24 = sshll.u32 %s2767_s19, 5  ;;  %s1900_s8 = sshll.u32 %s3013_s11, 4  ;;  %s4100_s8 = int_to_ptr.vmem [resolvable:$true] %s1900_s8 }
  0xbe   : > { %s3185_s26 = scalar_lea.vmem [#allocation2], %s2044_s25  ;;  %s4077_s18 = sadd.s32 %s2476_s23, %s2471_s24 }
  0xbf   : > { %s2472_s19 = sshll.u32 %s4077_s18, 7  ;;  %s4116_s4 = scalar_lea.sflag [#allocation5], %s215_s29 }
  0xc0   : > { %s4098_s12 = scalar_lea.hbm %s4180_s3, %s2472_s19  ;;  %s2653_s10 = scalar_lea.vmem %s4100_s8, 2048 }
  0xc1   : > { %p2654_p7 = scmp.ne.s32.totalorder %s4100_s8, %s2653_s10  ;;  %p4616_p9 = scmp.ne.s32.totalorder %s4352_s28, 0 }
  0xc2   : > { %v419_v36 = vld [vmem:[%s3185_s26] sm:$0xff]  ;;  %v420_v37 = vld [vmem:[%s3185_s26 + $0x10] sm:$0xff]  ;;  %s2786_s6 = smov [#allocation8]  }
  0xc3   : > { %v3190_v38 = vld [vmem:[%s3185_s26 + $0x20] sm:$0xff]  ;;  %v3193_v39 = vld [vmem:[%s3185_s26 + $0x30] sm:$0xff]  ;;  %v439_v42 = vmul.f32 %v2045_v33, %v419_v36  ;;  %v440_v43 = vmul.f32 %v2045_v33, %v420_v37  ;;  %v3203_v45 = vmul.f32 %v3178_v34, %v420_v37  ;;  %p2655_p11 = pnand %p2654_p7, %p4616_p9  ;;  %s2657_s5 = sshll.u32 %s2786_s6, 4  ;;  %s2658_s5 = int_to_ptr.vmem [resolvable:$false] %s2657_s5 }
  0xc4   : > { %4367 = vst [vmem:[#allocation17_spill] sm:$0xff] %v3190_v38  ;;  %v3196_v40 = vld [vmem:[%s3185_s26 + $0x40] sm:$0xff]  ;;  %v3199_v41 = vld [vmem:[%s3185_s26 + $0x50] sm:$0xff]  ;;  %v441_v44 = vmul.f32 %v2045_v33, %v3190_v38  ;;  %v442_v49 = vmul.f32 %v2045_v33, %v3193_v39  ;;  %v3219_v52 = vmul.f32 %v3178_v34, %v3190_v38  ;;  %s2659_s30 = scalar_lea.vmem %s2658_s5, 4096  ;;  %p2660_p0 = scmp.lt.s32.totalorder %s4100_s8, %s2658_s5 }
  0xc5   : > { %4368 = vst [vmem:[#allocation18_spill] sm:$0xff] %v3203_v45  ;;  %v3206_v46 = vld [vmem:[%s3185_s26 + $0x60] sm:$0xff]  ;;  %v3209_v47 = vld [vmem:[%s3185_s26 + $0x70] sm:$0xff]  ;;  %v443_v50 = vmul.f32 %v2045_v33, %v3196_v40  ;;  %v444_v51 = vmul.f32 %v2045_v33, %v3199_v41  ;;  %v455_v59 = vadd.f32 %v3183_v35, %v439_v42  ;;  %v456_v2 = vadd.f32 %v3183_v35, %v440_v43  ;;  %p2656_p13 = pneg %p2655_p11  ;;  %p2661_p2 = scmp.lt.s32.totalorder %s2659_s30, %s2653_s10 }
  0xc6   : > { %v3212_v48 = vld [vmem:[%s3185_s26 + $0xa0] sm:$0xff]  ;;  %4370 = vst [vmem:[#allocation20_spill] sm:$0xff] %v3219_v52  ;;  %v3222_v53 = vld [vmem:[%s3185_s26 + $0xb0] sm:$0xff]  ;;  %v445_v56 = vmul.f32 %v2045_v33, %v3206_v46  ;;  %v446_v57 = vmul.f32 %v2045_v33, %v3209_v47  ;;  %v457_v8 = vadd.f32 %v3183_v35, %v441_v44  ;;  %v458_v12 = vadd.f32 %v3183_v35, %v442_v49 }
  0xc7   : > { %4369 = vst [vmem:[#allocation19_spill] sm:$0xff] %v3212_v48  ;;  %4371 = vst [vmem:[#allocation21_spill] sm:$0xff] %v3222_v53  ;;  %v3225_v54 = vld [vmem:[%s3185_s26 + $0xc0] sm:$0xff]  ;;  %v3228_v55 = vld [vmem:[%s3185_s26 + $0xd0] sm:$0xff]  ;;  %v447_v58 = vmul.f32 %v2045_v33, %v3212_v48  ;;  %v448_v63 = vmul.f32 %v2045_v33, %v3222_v53  ;;  %v459_v13 = vadd.f32 %v3183_v35, %v443_v50  ;;  %p2662_p5 = por %p2661_p2, %p2660_p0 }
  0xc8   : > { %v3235_v60 = vld [vmem:[%s3185_s26 + $0xe0] sm:$0xff]  ;;  %v3238_v61 = vld [vmem:[%s3185_s26 + $0xf0] sm:$0xff]  ;;  %v449_v0 = vmul.f32 %v2045_v33, %v3225_v54  ;;  %v450_v1 = vmul.f32 %v2045_v33, %v3228_v55  ;;  %v460_v14 = vadd.f32 %v3183_v35, %v444_v51  ;;  %v461_v18 = vadd.f32 %v3183_v35, %v445_v56 }
  0xc9   : > { %v3241_v62 = vld [vmem:[%s3185_s26 + $0x100] sm:$0xff]  ;;  %v3248_v4 = vld [vmem:[%s3185_s26 + $0x110] sm:$0xff]  ;;  %v451_v5 = vmul.f32 %v2045_v33, %v3235_v60  ;;  %v452_v6 = vmul.f32 %v2045_v33, %v3238_v61  ;;  %v462_v19 = vadd.f32 %v3183_v35, %v446_v57  ;;  %v463_v20 = vadd.f32 %v3183_v35, %v447_v58  ;;  %p2663_p8 = pnand %p2662_p5, %p2656_p13 }
  0xca   : > { %v453_v7 = vmul.f32 %v2045_v33, %v3241_v62  ;;  %v472_v9 = vld [vmem:[%s3185_s26 + $0x1] sm:$0xff]  ;;  %v3256_v10 = vld [vmem:[%s3185_s26 + $0x11] sm:$0xff]  ;;  %v454_v11 = vmul.f32 %v2045_v33, %v3248_v4  ;;  %v464_v21 = vadd.f32 %v3183_v35, %v448_v63  ;;  %v465_v25 = vadd.f32 %v3183_v35, %v449_v0 }
  0xcb   : > { %4372 = vst [vmem:[#allocation22_spill] sm:$0xff] %v3256_v10  ;;  %v3263_v15 = vld [vmem:[%s3185_s26 + $0x21] sm:$0xff]  ;;  %v3266_v16 = vld [vmem:[%s3185_s26 + $0x31] sm:$0xff]  ;;  %v466_v26 = vadd.f32 %v3183_v35, %v450_v1  ;;  %v467_v27 = vadd.f32 %v3183_v35, %v451_v5  ;;  %v468_v28 = vadd.f32 %v3183_v35, %v452_v6  ;;  %v492_v43 = vmul.f32 %v2046_v3, %v472_v9 }
  0xcc   : > { %4373 = vst [vmem:[#allocation23_spill] sm:$0xff] %v3263_v15  ;;  %4374 = vst [vmem:[#allocation24_spill] sm:$0xff] %v3266_v16  ;;  %v3269_v17 = vld [vmem:[%s3185_s26 + $0x41] sm:$0xff]  ;;  %v3276_v22 = vld [vmem:[%s3185_s26 + $0x51] sm:$0xff]  ;;  %v469_v32 = vadd.f32 %v3183_v35, %v453_v7  ;;  %v470_v33 = vadd.f32 %v3183_v35, %v454_v11  ;;  %v493_v44 = vmul.f32 %v2046_v3, %v3256_v10 }
  0xcd   : > { %4375 = vst [vmem:[#allocation25_spill] sm:$0xff] %v3269_v17  ;;  %4376 = vst [vmem:[#allocation26_spill] sm:$0xff] %v3276_v22  ;;  %v3279_v23 = vld [vmem:[%s3185_s26 + $0x61] sm:$0xff]  ;;  %v3282_v24 = vld [vmem:[%s3185_s26 + $0x71] sm:$0xff]  ;;  %v494_v51 = vmul.f32 %v2046_v3, %v3263_v15  ;;  %v495_v56 = vmul.f32 %v2046_v3, %v3266_v16  ;;  %v496_v35 = vmul.f32 %v2046_v3, %v3269_v17 }
  0xce   : > { %4377 = vst [vmem:[#allocation27_spill] sm:$0xff] %v3279_v23  ;;  %4378 = vst [vmem:[#allocation28_spill] sm:$0xff] %v3282_v24  ;;  %v3289_v29 = vld [vmem:[%s3185_s26 + $0xa1] sm:$0xff]  ;;  %v3292_v30 = vld [vmem:[%s3185_s26 + $0xb1] sm:$0xff]  ;;  %v497_v57 = vmul.f32 %v2046_v3, %v3276_v22  ;;  %v498_v58 = vmul.f32 %v2046_v3, %v3279_v23  ;;  %v499_v63 = vmul.f32 %v2046_v3, %v3282_v24 }
  0xcf   : > { %4379 = vst [vmem:[#allocation29_spill] sm:$0xff] %v3289_v29  ;;  %4380 = vst [vmem:[#allocation30_spill] sm:$0xff] %v3292_v30  ;;  %v3295_v31 = vld [vmem:[%s3185_s26 + $0xc1] sm:$0xff]  ;;  %v3300_v36 = vld [vmem:[%s3185_s26 + $0xd1] sm:$0xff]  ;;  %v500_v0 = vmul.f32 %v2046_v3, %v3289_v29  ;;  %v501_v1 = vmul.f32 %v2046_v3, %v3292_v30  ;;  %v508_v38 = vadd.f32 %v492_v43, %v455_v59 }
  0xd0   : > { %4381 = vst [vmem:[#allocation31_spill] sm:$0xff] %v3295_v31  ;;  %4382 = vst [vmem:[#allocation32_spill] sm:$0xff] %v3300_v36  ;;  %v3303_v37 = vld [vmem:[%s3185_s26 + $0xe1] sm:$0xff]  ;;  %v3306_v42 = vld [vmem:[%s3185_s26 + $0xf1] sm:$0xff]  ;;  %v502_v5 = vmul.f32 %v2046_v3, %v3295_v31  ;;  %v503_v6 = vmul.f32 %v2046_v3, %v3300_v36  ;;  %v509_v29 = vadd.f32 %v493_v44, %v456_v2 }
  0xd1   : > { %4383 = vst [vmem:[#allocation33_spill] sm:$0xff] %v3303_v37  ;;  %4384 = vst [vmem:[#allocation34_spill] sm:$0xff] %v3306_v42  ;;  %v3310_v49 = vld [vmem:[%s3185_s26 + $0x101] sm:$0xff]  ;;  %v3313_v50 = vld [vmem:[%s3185_s26 + $0x111] sm:$0xff]  ;;  %v504_v7 = vmul.f32 %v2046_v3, %v3303_v37  ;;  %v505_v9 = vmul.f32 %v2046_v3, %v3306_v42  ;;  %v510_v23 = vadd.f32 %v494_v51, %v457_v8 }
  0xd2   : > { %4385 = vst [vmem:[#allocation35_spill] sm:$0xff] %v3310_v49  ;;  %4386 = vst [vmem:[#allocation36_spill] sm:$0xff] %v3313_v50  ;;  %v506_v11 = vmul.f32 %v2046_v3, %v3310_v49  ;;  %v507_v48 = vmul.f32 %v2046_v3, %v3313_v50  ;;  %v2047_v30 = vld [vmem:[#allocation6 + $0x2] ss:$0 sm:$0xff]  ;;  %v3331_v31 = vld [vmem:[%s3185_s26 + $0x12] sm:$0xff]  ;;  %v511_v36 = vadd.f32 %v495_v56, %v458_v12 }
  0xd3   : > { %v525_v24 = vld [vmem:[%s3185_s26 + $0x2] sm:$0xff]  ;;  %4387 = vst [vmem:[#allocation37_spill] sm:$0xff] %v3331_v31  ;;  %v512_v22 = vadd.f32 %v496_v35, %v459_v13  ;;  %v513_v37 = vadd.f32 %v497_v57, %v460_v14  ;;  %v3337_v49 = vld [vmem:[%s3185_s26 + $0x32] sm:$0xff]  ;;  %v514_v2 = vadd.f32 %v498_v58, %v461_v18  ;;  %v515_v3 = vadd.f32 %v499_v63, %v462_v19 }
  0xd4   : > { %v3334_v42 = vld [vmem:[%s3185_s26 + $0x22] sm:$0xff]  ;;  %4389 = vst [vmem:[#allocation39_spill] sm:$0xff] %v3337_v49  ;;  %v516_v43 = vadd.f32 %v500_v0, %v463_v20  ;;  %v517_v44 = vadd.f32 %v501_v1, %v464_v21  ;;  %v3343_v8 = vld [vmem:[%s3185_s26 + $0x52] sm:$0xff]  ;;  %v518_v14 = vadd.f32 %v502_v5, %v465_v25  ;;  %v519_v51 = vadd.f32 %v503_v6, %v466_v26 }
  0xd5   : > { %4388 = vst [vmem:[#allocation38_spill] sm:$0xff] %v3334_v42  ;;  %v3340_v59 = vld [vmem:[%s3185_s26 + $0x42] sm:$0xff]  ;;  %4391 = vst [vmem:[#allocation41_spill] sm:$0xff] %v3343_v8  ;;  %v3349_v13 = vld [vmem:[%s3185_s26 + $0x72] sm:$0xff]  ;;  %v520_v56 = vadd.f32 %v504_v7, %v467_v27  ;;  %v521_v35 = vadd.f32 %v505_v9, %v468_v28  ;;  %v522_v20 = vadd.f32 %v506_v11, %v469_v32 }
  0xd6   : > { %4390 = vst [vmem:[#allocation40_spill] sm:$0xff] %v3340_v59  ;;  %v3346_v12 = vld [vmem:[%s3185_s26 + $0x62] sm:$0xff]  ;;  %4393 = vst [vmem:[#allocation43_spill] sm:$0xff] %v3349_v13  ;;  %v3355_v18 = vld [vmem:[%s3185_s26 + $0xb2] sm:$0xff]  ;;  %v523_v21 = vadd.f32 %v507_v48, %v470_v33  ;;  %v545_v1 = vmul.f32 %v2047_v30, %v525_v24  ;;  %v546_v25 = vmul.f32 %v2047_v30, %v3331_v31 }
  0xd7   : > { %4392 = vst [vmem:[#allocation42_spill] sm:$0xff] %v3346_v12  ;;  %v3352_v57 = vld [vmem:[%s3185_s26 + $0xa2] sm:$0xff]  ;;  %4395 = vst [vmem:[#allocation45_spill] sm:$0xff] %v3355_v18  ;;  %v3361_v58 = vld [vmem:[%s3185_s26 + $0xd2] sm:$0xff]  ;;  %v547_v28 = vmul.f32 %v2047_v30, %v3334_v42  ;;  %v548_v5 = vmul.f32 %v2047_v30, %v3337_v49  ;;  %v549_v32 = vmul.f32 %v2047_v30, %v3340_v59 }
  0xd8   : > { %4394 = vst [vmem:[#allocation44_spill] sm:$0xff] %v3352_v57  ;;  %v3358_v19 = vld [vmem:[%s3185_s26 + $0xc2] sm:$0xff]  ;;  %4397 = vst [vmem:[#allocation47_spill] sm:$0xff] %v3361_v58  ;;  %v3367_v0 = vld [vmem:[%s3185_s26 + $0xf2] sm:$0xff]  ;;  %v550_v48 = vmul.f32 %v2047_v30, %v3343_v8  ;;  %v551_v33 = vmul.f32 %v2047_v30, %v3346_v12  ;;  %v552_v6 = vmul.f32 %v2047_v30, %v3349_v13 }
  0xd9   : > { %4396 = vst [vmem:[#allocation46_spill] sm:$0xff] %v3358_v19  ;;  %v3364_v63 = vld [vmem:[%s3185_s26 + $0xe2] sm:$0xff]  ;;  %4399 = vst [vmem:[#allocation49_spill] sm:$0xff] %v3367_v0  ;;  %v3374_v27 = vld [vmem:[%s3185_s26 + $0x112] sm:$0xff]  ;;  %v553_v24 = vmul.f32 %v2047_v30, %v3352_v57  ;;  %v554_v7 = vmul.f32 %v2047_v30, %v3355_v18  ;;  %v555_v9 = vmul.f32 %v2047_v30, %v3358_v19 }
  0xda   : > { %4398 = vst [vmem:[#allocation48_spill] sm:$0xff] %v3364_v63  ;;  %v3371_v26 = vld [vmem:[%s3185_s26 + $0x102] sm:$0xff]  ;;  %4401 = vst [vmem:[#allocation51_spill] sm:$0xff] %v3374_v27  ;;  %v556_v11 = vmul.f32 %v2047_v30, %v3361_v58  ;;  %v557_v42 = vmul.f32 %v2047_v30, %v3364_v63  ;;  %v558_v49 = vmul.f32 %v2047_v30, %v3367_v0 }
  0xdb   : > { %4400 = vst [vmem:[#allocation50_spill] sm:$0xff] %v3371_v26  ;;  %v559_v59 = vmul.f32 %v2047_v30, %v3371_v26  ;;  %v560_v8 = vmul.f32 %v2047_v30, %v3374_v27  ;;  %v561_v12 = vadd.f32 %v545_v1, %v508_v38  ;;  %v562_v31 = vadd.f32 %v546_v25, %v509_v29  ;;  %v3391_v58 = vld [vmem:[%s3185_s26 + $0x80] sm:$0xff] }
  0xdc   : > { %v563_v13 = vadd.f32 %v547_v28, %v510_v23  ;;  %v564_v57 = vadd.f32 %v548_v5, %v511_v36  ;;  %v565_v50 = vadd.f32 %v549_v32, %v512_v22  ;;  %v566_v18 = vadd.f32 %v550_v48, %v513_v37  ;;  %v3394_v30 = vld [vmem:[%s3185_s26 + $0x120] sm:$0xff] }
  0xdd   : > { %v567_v17 = vadd.f32 %v551_v33, %v514_v2  ;;  %v568_v19 = vadd.f32 %v552_v6, %v515_v3  ;;  %v569_v16 = vadd.f32 %v553_v24, %v516_v43  ;;  %v570_v15 = vadd.f32 %v554_v7, %v517_v44  ;;  %4402 = vst [vmem:[#allocation52_spill] sm:$0xff] %v3394_v30  ;;  %v2081_v32 = vld [vmem:[#allocation6 + $0x4] ss:$0 sm:$0xff] }
  0xde   : > { %v571_v63 = vadd.f32 %v555_v9, %v518_v14  ;;  %v572_v10 = vadd.f32 %v556_v11, %v519_v51  ;;  %v573_v0 = vadd.f32 %v557_v42, %v520_v56  ;;  %v574_v52 = vadd.f32 %v558_v49, %v521_v35  ;;  %v4403_v14 = vld [vmem:[#allocation18_spill] sm:$0xff]  ;;  %v4404_v56 = vld [vmem:[#allocation20_spill] sm:$0xff] }
  0xdf   : > { %v575_v26 = vadd.f32 %v559_v59, %v522_v20  ;;  %v576_v45 = vadd.f32 %v560_v8, %v523_v21  ;;  %v602_v38 = vmul.f32 %v3178_v34, %v3193_v39  ;;  %v603_v22 = vmul.f32 %v3178_v34, %v3196_v40  ;;  %v3427_v7 = vld [vmem:[%s3185_s26 + $0x81] sm:$0xff] }
  0xe0   : > { %v604_v23 = vmul.f32 %v3178_v34, %v3199_v41  ;;  %v605_v29 = vmul.f32 %v3178_v34, %v3206_v46  ;;  %v606_v36 = vmul.f32 %v3178_v34, %v3209_v47  ;;  %v607_v37 = vmul.f32 %v3178_v34, %v3391_v58  ;;  %4405 = vst [vmem:[#allocation18_spill] sm:$0xff] %v3427_v7 }
  0xe1   : > { %v608_v42 = vmul.f32 %v3178_v34, %v3222_v53  ;;  %v609_v49 = vmul.f32 %v3178_v34, %v3225_v54  ;;  %v610_v59 = vmul.f32 %v3178_v34, %v3228_v55  ;;  %v611_v2 = vmul.f32 %v3178_v34, %v3235_v60 }
  0xe2   : > { %v612_v3 = vmul.f32 %v3178_v34, %v3238_v61  ;;  %v613_v43 = vmul.f32 %v3178_v34, %v3241_v62  ;;  %v614_v44 = vmul.f32 %v3178_v34, %v3248_v4  ;;  %v615_v8 = vmul.f32 %v3178_v34, %v3394_v30 }
  0xe3   : > { %v616_v51 = vadd.f32 %v4403_v14, %v561_v12  ;;  %v617_v35 = vadd.f32 %v4404_v56, %v562_v31  ;;  %v618_v20 = vadd.f32 %v602_v38, %v563_v13  ;;  %v619_v21 = vadd.f32 %v603_v22, %v564_v57  ;;  %v3430_v14 = vld [vmem:[%s3185_s26 + $0x121] sm:$0xff]  ;;  %v4408_v57 = vld [vmem:[#allocation23_spill] sm:$0xff]  ;;  %v4413_v22 = vld [vmem:[#allocation28_spill] sm:$0xff] }
  0xe4   : > { %v620_v1 = vadd.f32 %v604_v23, %v565_v50  ;;  %v621_v25 = vadd.f32 %v605_v29, %v566_v18  ;;  %v622_v28 = vadd.f32 %v606_v36, %v567_v17  ;;  %v623_v5 = vadd.f32 %v607_v37, %v568_v19  ;;  %4406 = vst [vmem:[#allocation20_spill] sm:$0xff] %v3430_v14  ;;  %v4407_v31 = vld [vmem:[#allocation22_spill] sm:$0xff]  ;;  %v4409_v18 = vld [vmem:[#allocation24_spill] sm:$0xff]  ;;  %v4410_v19 = vld [vmem:[#allocation25_spill] sm:$0xff] }
  0xe5   : > { %v624_v48 = vadd.f32 %v608_v42, %v569_v16  ;;  %v625_v33 = vadd.f32 %v609_v49, %v570_v15  ;;  %v626_v6 = vadd.f32 %v610_v59, %v571_v63  ;;  %v627_v24 = vadd.f32 %v611_v2, %v572_v10  ;;  %v4411_v16 = vld [vmem:[#allocation26_spill] sm:$0xff]  ;;  %v4412_v63 = vld [vmem:[#allocation27_spill] sm:$0xff]  ;;  %v4416_v36 = vld [vmem:[#allocation32_spill] sm:$0xff] }
  0xe6   : > { %v628_v9 = vadd.f32 %v612_v3, %v573_v0  ;;  %v629_v34 = vadd.f32 %v613_v43, %v574_v52  ;;  %v630_v11 = vadd.f32 %v614_v44, %v575_v26  ;;  %v631_v12 = vadd.f32 %v615_v8, %v576_v45  ;;  %v4414_v0 = vld [vmem:[#allocation30_spill] sm:$0xff]  ;;  %v4415_v26 = vld [vmem:[#allocation31_spill] sm:$0xff]  ;;  %v4417_v42 = vld [vmem:[#allocation33_spill] sm:$0xff] }
  0xe7   : > { %v653_v13 = vmul.f32 %v2081_v32, %v4407_v31  ;;  %v654_v50 = vmul.f32 %v2081_v32, %v4408_v57  ;;  %v655_v17 = vmul.f32 %v2081_v32, %v4409_v18  ;;  %v656_v38 = vmul.f32 %v2081_v32, %v4410_v19  ;;  %v4418_v59 = vld [vmem:[#allocation34_spill] sm:$0xff]  ;;  %v4419_v3 = vld [vmem:[#allocation35_spill] sm:$0xff]  ;;  %v4420_v44 = vld [vmem:[#allocation36_spill] sm:$0xff] }
  0xe8   : > { %v657_v15 = vmul.f32 %v2081_v32, %v4411_v16  ;;  %v658_v10 = vmul.f32 %v2081_v32, %v4412_v63  ;;  %v659_v23 = vmul.f32 %v2081_v32, %v4413_v22  ;;  %v660_v52 = vmul.f32 %v2081_v32, %v3427_v7  ;;  %v2098_v16 = vld [vmem:[#allocation6 + $0x5] ss:$0 sm:$0xff] }
  0xe9   : > { %v661_v45 = vmul.f32 %v2081_v32, %v4414_v0  ;;  %v662_v29 = vmul.f32 %v2081_v32, %v4415_v26  ;;  %v663_v37 = vmul.f32 %v2081_v32, %v4416_v36  ;;  %v664_v49 = vmul.f32 %v2081_v32, %v4417_v42 }
  0xea   : > { %v665_v2 = vmul.f32 %v2081_v32, %v4418_v59  ;;  %v666_v43 = vmul.f32 %v2081_v32, %v4419_v3  ;;  %v667_v8 = vmul.f32 %v2081_v32, %v4420_v44  ;;  %v668_v56 = vmul.f32 %v2081_v32, %v3430_v14  ;;  %v3449_v3 = vld [vmem:[%s3185_s26 + $0x82] sm:$0xff] }
  0xeb   : > { %v669_v31 = vadd.f32 %v653_v13, %v616_v51  ;;  %v670_v53 = vadd.f32 %v654_v50, %v617_v35  ;;  %v671_v7 = vadd.f32 %v655_v17, %v618_v20  ;;  %v672_v0 = vadd.f32 %v656_v38, %v619_v21  ;;  %4421 = vst [vmem:[#allocation22_spill] sm:$0xff] %v3449_v3  ;;  %v3452_v51 = vld [vmem:[%s3185_s26 + $0x122] sm:$0xff]  ;;  %v4429_v50 = vld [vmem:[#allocation43_spill] sm:$0xff] }
  0xec   : > { %v673_v22 = vadd.f32 %v657_v15, %v620_v1  ;;  %v674_v26 = vadd.f32 %v658_v10, %v621_v25  ;;  %v675_v63 = vadd.f32 %v659_v23, %v622_v28  ;;  %v676_v36 = vadd.f32 %v660_v52, %v623_v5  ;;  %4422 = vst [vmem:[#allocation53_spill] sm:$0xff] %v3452_v51  ;;  %v4423_v35 = vld [vmem:[#allocation37_spill] sm:$0xff]  ;;  %v4424_v21 = vld [vmem:[#allocation38_spill] sm:$0xff]  ;;  %v4425_v25 = vld [vmem:[#allocation39_spill] sm:$0xff] }
  0xed   : > { %v677_v42 = vadd.f32 %v661_v45, %v624_v48  ;;  %v678_v19 = vadd.f32 %v662_v29, %v625_v33  ;;  %v679_v59 = vadd.f32 %v663_v37, %v626_v6  ;;  %v680_v18 = vadd.f32 %v664_v49, %v627_v24  ;;  %v4426_v5 = vld [vmem:[#allocation40_spill] sm:$0xff]  ;;  %v4427_v48 = vld [vmem:[#allocation41_spill] sm:$0xff]  ;;  %v4428_v6 = vld [vmem:[#allocation42_spill] sm:$0xff] }
  0xee   : > { %v681_v57 = vadd.f32 %v665_v2, %v628_v9  ;;  %v682_v44 = vadd.f32 %v666_v43, %v629_v34  ;;  %v683_v30 = vadd.f32 %v667_v8, %v630_v11  ;;  %v684_v32 = vadd.f32 %v668_v56, %v631_v12  ;;  %v4430_v34 = vld [vmem:[#allocation45_spill] sm:$0xff]  ;;  %v4431_v12 = vld [vmem:[#allocation46_spill] sm:$0xff]  ;;  %v4432_v15 = vld [vmem:[#allocation47_spill] sm:$0xff] }
  0xef   : > { %v706_v20 = vmul.f32 %v2098_v16, %v4423_v35  ;;  %v707_v1 = vmul.f32 %v2098_v16, %v4424_v21  ;;  %v708_v28 = vmul.f32 %v2098_v16, %v4425_v25  ;;  %v709_v13 = vmul.f32 %v2098_v16, %v4426_v5  ;;  %v4433_v23 = vld [vmem:[#allocation48_spill] sm:$0xff]  ;;  %v4434_v45 = vld [vmem:[#allocation49_spill] sm:$0xff]  ;;  %v4435_v37 = vld [vmem:[#allocation50_spill] sm:$0xff] }
  0xf0   : > { %v710_v33 = vmul.f32 %v2098_v16, %v4427_v48  ;;  %v711_v24 = vmul.f32 %v2098_v16, %v4428_v6  ;;  %v712_v17 = vmul.f32 %v2098_v16, %v4429_v50  ;;  %v713_v9 = vmul.f32 %v2098_v16, %v3449_v3  ;;  %v2115_v6 = vld [vmem:[#allocation6 + $0x6] ss:$0 sm:$0xff] }
  0xf1   : > { %v714_v11 = vmul.f32 %v2098_v16, %v4430_v34  ;;  %v715_v38 = vmul.f32 %v2098_v16, %v4431_v12  ;;  %v716_v10 = vmul.f32 %v2098_v16, %v4432_v15  ;;  %v717_v52 = vmul.f32 %v2098_v16, %v4433_v23 }
  0xf2   : > { %v718_v29 = vmul.f32 %v2098_v16, %v4434_v45  ;;  %v719_v49 = vmul.f32 %v2098_v16, %v4435_v37  ;;  %v720_v2 = vmul.f32 %v2098_v16, %v3374_v27  ;;  %v721_v43 = vmul.f32 %v2098_v16, %v3452_v51  ;;  %v2106_v37 = vld [vmem:[%s3185_s26 + $0x90] sm:$0xff] }
  0xf3   : > { %v722_v8 = vadd.f32 %v706_v20, %v669_v31  ;;  %v723_v56 = vadd.f32 %v707_v1, %v670_v53  ;;  %v724_v35 = vadd.f32 %v708_v28, %v671_v7  ;;  %v725_v34 = vadd.f32 %v709_v13, %v672_v0  ;;  %v3472_v16 = vld [vmem:[%s3185_s26 + $0x130] sm:$0xff]  ;;  %v4437_v53 = vld [vmem:[#allocation17_spill] sm:$0xff] }
  0xf4   : > { %v726_v3 = vadd.f32 %v710_v33, %v673_v22  ;;  %v727_v12 = vadd.f32 %v711_v24, %v674_v26  ;;  %v728_v50 = vadd.f32 %v712_v17, %v675_v63  ;;  %v729_v15 = vadd.f32 %v713_v9, %v676_v36  ;;  %4436 = vst [vmem:[#allocation37_spill] sm:$0xff] %v3472_v16  ;;  %v2132_v33 = vld [vmem:[#allocation6 + $0x7] ss:$0 sm:$0xff] }
  0xf5   : > { %v730_v23 = vadd.f32 %v714_v11, %v677_v42  ;;  %v731_v48 = vadd.f32 %v715_v38, %v678_v19  ;;  %v732_v45 = vadd.f32 %v716_v10, %v679_v59  ;;  %v733_v5 = vadd.f32 %v717_v52, %v680_v18  ;;  %v2123_v38 = vld [vmem:[%s3185_s26 + $0x91] sm:$0xff] }
  0xf6   : > { %v734_v25 = vadd.f32 %v718_v29, %v681_v57  ;;  %v735_v21 = vadd.f32 %v719_v49, %v682_v44  ;;  %v736_v27 = vadd.f32 %v720_v2, %v683_v30  ;;  %v737_v14 = vadd.f32 %v721_v43, %v684_v32  ;;  %v4440_v49 = vld [vmem:[#allocation23_spill] sm:$0xff]  ;;  %v4441_v43 = vld [vmem:[#allocation24_spill] sm:$0xff] }
  0xf7   : > { %v761_v7 = vmul.f32 %v2115_v6, %v4437_v53  ;;  %v762_v0 = vmul.f32 %v2115_v6, %v3193_v39  ;;  %v763_v22 = vmul.f32 %v2115_v6, %v3196_v40  ;;  %v764_v63 = vmul.f32 %v2115_v6, %v3199_v41  ;;  %v4438_v41 = vld [vmem:[#allocation52_spill] sm:$0xff]  ;;  %v4449_v53 = vld [vmem:[#allocation33_spill] sm:$0xff] }
  0xf8   : > { %v765_v26 = vmul.f32 %v2115_v6, %v3206_v46  ;;  %v766_v19 = vmul.f32 %v2115_v6, %v3209_v47  ;;  %v767_v18 = vmul.f32 %v2115_v6, %v3391_v58  ;;  %v768_v57 = vmul.f32 %v2115_v6, %v2106_v37 }
  0xf9   : > { %v769_v30 = vmul.f32 %v2115_v6, %v3225_v54  ;;  %v770_v36 = vmul.f32 %v2115_v6, %v3228_v55  ;;  %v771_v42 = vmul.f32 %v2115_v6, %v3235_v60  ;;  %v772_v59 = vmul.f32 %v2115_v6, %v3238_v61 }
  0xfa   : > { %v773_v39 = vmul.f32 %v2115_v6, %v3241_v62  ;;  %v774_v40 = vmul.f32 %v2115_v6, %v3248_v4  ;;  %v775_v46 = vmul.f32 %v2115_v6, %v4438_v41  ;;  %v776_v47 = vmul.f32 %v2115_v6, %v3472_v16  ;;  %v3491_v6 = vld [vmem:[%s3185_s26 + $0x131] sm:$0xff] }
  0xfb   : > { %v777_v44 = vadd.f32 %v761_v7, %v722_v8  ;;  %v778_v58 = vadd.f32 %v762_v0, %v723_v56  ;;  %v779_v31 = vadd.f32 %v763_v22, %v724_v35  ;;  %v780_v32 = vadd.f32 %v764_v63, %v725_v34  ;;  %4439 = vst [vmem:[#allocation17_spill] sm:$0xff] %v3491_v6  ;;  %v4444_v8 = vld [vmem:[#allocation27_spill] sm:$0xff]  ;;  %v4450_v0 = vld [vmem:[#allocation34_spill] sm:$0xff] }
  0xfc   : > { %v781_v20 = vadd.f32 %v765_v26, %v726_v3  ;;  %v782_v1 = vadd.f32 %v766_v19, %v727_v12  ;;  %v783_v28 = vadd.f32 %v767_v18, %v728_v50  ;;  %v784_v13 = vadd.f32 %v768_v57, %v729_v15  ;;  %v4442_v3 = vld [vmem:[#allocation25_spill] sm:$0xff]  ;;  %v4443_v50 = vld [vmem:[#allocation26_spill] sm:$0xff]  ;;  %v4451_v63 = vld [vmem:[#allocation35_spill] sm:$0xff] }
  0xfd   : > { %v785_v24 = vadd.f32 %v769_v30, %v730_v23  ;;  %v786_v17 = vadd.f32 %v770_v36, %v731_v48  ;;  %v787_v9 = vadd.f32 %v771_v42, %v732_v45  ;;  %v788_v11 = vadd.f32 %v772_v59, %v733_v5  ;;  %v4445_v48 = vld [vmem:[#allocation28_spill] sm:$0xff]  ;;  %v4446_v5 = vld [vmem:[#allocation18_spill] sm:$0xff] }
  0xfe   : > { %v789_v10 = vadd.f32 %v773_v39, %v734_v25  ;;  %v790_v52 = vadd.f32 %v774_v40, %v735_v21  ;;  %v791_v29 = vadd.f32 %v775_v46, %v736_v27  ;;  %v792_v37 = vadd.f32 %v776_v47, %v737_v14  ;;  %v4447_v21 = vld [vmem:[#allocation31_spill] sm:$0xff]  ;;  %v4448_v14 = vld [vmem:[#allocation32_spill] sm:$0xff] }
  0xff   : > { %v814_v2 = vmul.f32 %v2132_v33, %v4440_v49  ;;  %v815_v34 = vmul.f32 %v2132_v33, %v4441_v43  ;;  %v816_v12 = vmul.f32 %v2132_v33, %v4442_v3  ;;  %v817_v15 = vmul.f32 %v2132_v33, %v4443_v50  ;;  %v4452_v19 = vld [vmem:[#allocation36_spill] sm:$0xff]  ;;  %v2149_v43 = vld [vmem:[#allocation6 + $0x8] ss:$0 sm:$0xff] }
 0x100   : > { %v818_v23 = vmul.f32 %v2132_v33, %v4444_v8  ;;  %v819_v45 = vmul.f32 %v2132_v33, %v4445_v48  ;;  %v820_v56 = vmul.f32 %v2132_v33, %v4446_v5  ;;  %v821_v25 = vmul.f32 %v2132_v33, %v2123_v38  ;;  %v4453_v57 = vld [vmem:[#allocation20_spill] sm:$0xff] }
 0x101   : > { %v822_v27 = vmul.f32 %v2132_v33, %v4447_v21  ;;  %v823_v35 = vmul.f32 %v2132_v33, %v4448_v14  ;;  %v824_v7 = vmul.f32 %v2132_v33, %v4449_v53  ;;  %v825_v22 = vmul.f32 %v2132_v33, %v4450_v0  ;;  %v2140_v5 = vld [vmem:[%s3185_s26 + $0x92] sm:$0xff] }
 0x102   : > { %v826_v26 = vmul.f32 %v2132_v33, %v4451_v63  ;;  %v827_v18 = vmul.f32 %v2132_v33, %v4452_v19  ;;  %v828_v30 = vmul.f32 %v2132_v33, %v4453_v57  ;;  %v829_v36 = vmul.f32 %v2132_v33, %v3491_v6  ;;  %v3510_v33 = vld [vmem:[%s3185_s26 + $0x132] sm:$0xff] }
 0x103   : > { %v830_v42 = vadd.f32 %v814_v2, %v777_v44  ;;  %v831_v59 = vadd.f32 %v815_v34, %v778_v58  ;;  %v832_v39 = vadd.f32 %v816_v12, %v779_v31  ;;  %v833_v40 = vadd.f32 %v817_v15, %v780_v32  ;;  %4454 = vst [vmem:[#allocation23_spill] sm:$0xff] %v3510_v33  ;;  %v4455_v44 = vld [vmem:[#allocation38_spill] sm:$0xff]  ;;  %v4456_v31 = vld [vmem:[#allocation39_spill] sm:$0xff]  ;;  %v4464_v15 = vld [vmem:[#allocation48_spill] sm:$0xff] }
 0x104   : > { %v834_v46 = vadd.f32 %v818_v23, %v781_v20  ;;  %v835_v47 = vadd.f32 %v819_v45, %v782_v1  ;;  %v836_v38 = vadd.f32 %v820_v56, %v783_v28  ;;  %v837_v49 = vadd.f32 %v821_v25, %v784_v13  ;;  %v4457_v20 = vld [vmem:[#allocation40_spill] sm:$0xff]  ;;  %v4458_v28 = vld [vmem:[#allocation41_spill] sm:$0xff]  ;;  %v4459_v2 = vld [vmem:[#allocation42_spill] sm:$0xff] }
 0x105   : > { %v838_v3 = vadd.f32 %v822_v27, %v785_v24  ;;  %v839_v50 = vadd.f32 %v823_v35, %v786_v17  ;;  %v840_v8 = vadd.f32 %v824_v7, %v787_v9  ;;  %v841_v48 = vadd.f32 %v825_v22, %v788_v11  ;;  %v4460_v17 = vld [vmem:[#allocation43_spill] sm:$0xff]  ;;  %v4461_v11 = vld [vmem:[#allocation22_spill] sm:$0xff]  ;;  %v4465_v45 = vld [vmem:[#allocation49_spill] sm:$0xff] }
 0x106   : > { %v842_v16 = vadd.f32 %v826_v26, %v789_v10  ;;  %v843_v41 = vadd.f32 %v827_v18, %v790_v52  ;;  %v844_v57 = vadd.f32 %v828_v30, %v791_v29  ;;  %v845_v19 = vadd.f32 %v829_v36, %v792_v37  ;;  %v4462_v52 = vld [vmem:[#allocation46_spill] sm:$0xff]  ;;  %v4463_v37 = vld [vmem:[#allocation47_spill] sm:$0xff] }
 0x107   : > { %v867_v58 = vmul.f32 %v2149_v43, %v4455_v44  ;;  %v868_v32 = vmul.f32 %v2149_v43, %v4456_v31  ;;  %v869_v1 = vmul.f32 %v2149_v43, %v4457_v20  ;;  %v870_v13 = vmul.f32 %v2149_v43, %v4458_v28  ;;  %v4466_v25 = vld [vmem:[#allocation50_spill] sm:$0xff]  ;;  %v4467_v35 = vld [vmem:[#allocation51_spill] sm:$0xff] }
 0x108   : > { %v871_v24 = vmul.f32 %v2149_v43, %v4459_v2  ;;  %v872_v9 = vmul.f32 %v2149_v43, %v4460_v17  ;;  %v873_v34 = vmul.f32 %v2149_v43, %v4461_v11  ;;  %v874_v10 = vmul.f32 %v2149_v43, %v2140_v5  ;;  %v2168_v2 = vld [vmem:[#allocation6 + $0x9] ss:$0 sm:$0xff] }
 0x109   : > { %v875_v29 = vmul.f32 %v2149_v43, %v4462_v52  ;;  %v876_v12 = vmul.f32 %v2149_v43, %v4463_v37  ;;  %v877_v23 = vmul.f32 %v2149_v43, %v4464_v15  ;;  %v878_v56 = vmul.f32 %v2149_v43, %v4465_v45 }
 0x10a   : > { %v879_v27 = vmul.f32 %v2149_v43, %v4466_v25  ;;  %v880_v7 = vmul.f32 %v2149_v43, %v4467_v35  ;;  %v881_v22 = vmul.f32 %v2149_v43, %v3452_v51  ;;  %v882_v26 = vmul.f32 %v2149_v43, %v3510_v33  ;;  %v3528_v43 = vld [vmem:[%s3185_s26 + $0x140] sm:$0xff] }
 0x10b   : > { %v883_v18 = vadd.f32 %v867_v58, %v830_v42  ;;  %v884_v30 = vadd.f32 %v868_v32, %v831_v59  ;;  %v885_v36 = vadd.f32 %v869_v1, %v832_v39  ;;  %v886_v5 = vadd.f32 %v870_v13, %v833_v40  ;;  %4468 = vst [vmem:[#allocation24_spill] sm:$0xff] %v3528_v43  ;;  %v3531_v42 = vld [vmem:[%s3185_s26 + $0x150] sm:$0xff]  ;;  %v4477_v32 = vld [vmem:[#allocation21_spill] sm:$0xff] }
 0x10c   : > { %v887_v44 = vadd.f32 %v871_v24, %v834_v46  ;;  %v888_v31 = vadd.f32 %v872_v9, %v835_v47  ;;  %v889_v20 = vadd.f32 %v873_v34, %v836_v38  ;;  %v890_v28 = vadd.f32 %v874_v10, %v837_v49  ;;  %4469 = vst [vmem:[#allocation25_spill] sm:$0xff] %v3531_v42  ;;  %v3534_v47 = vld [vmem:[%s3185_s26 + $0x160] sm:$0xff]  ;;  %v3537_v38 = vld [vmem:[%s3185_s26 + $0x170] sm:$0xff] }
 0x10d   : > { %v891_v17 = vadd.f32 %v875_v29, %v838_v3  ;;  %v892_v11 = vadd.f32 %v876_v12, %v839_v50  ;;  %v893_v6 = vadd.f32 %v877_v23, %v840_v8  ;;  %v894_v51 = vadd.f32 %v878_v56, %v841_v48  ;;  %4470 = vst [vmem:[#allocation26_spill] sm:$0xff] %v3534_v47  ;;  %v3540_v49 = vld [vmem:[%s3185_s26 + $0x180] sm:$0xff]  ;;  %v3543_v58 = vld [vmem:[%s3185_s26 + $0x190] sm:$0xff] }
 0x10e   : > { %v895_v59 = vadd.f32 %v879_v27, %v842_v16  ;;  %v896_v39 = vadd.f32 %v880_v7, %v843_v41  ;;  %v897_v40 = vadd.f32 %v881_v22, %v844_v57  ;;  %v898_v46 = vadd.f32 %v882_v26, %v845_v19  ;;  %4471 = vst [vmem:[#allocation27_spill] sm:$0xff] %v3537_v38  ;;  %v3546_v3 = vld [vmem:[%s3185_s26 + $0x1a0] sm:$0xff]  ;;  %v3549_v50 = vld [vmem:[%s3185_s26 + $0x1b0] sm:$0xff]  ;;  %v2185_v26 = vld [vmem:[#allocation6 + $0xa] ss:$0 sm:$0xff] }
 0x10f   : > { %4472 = vst [vmem:[#allocation28_spill] sm:$0xff] %v3540_v49  ;;  %4473 = vst [vmem:[#allocation18_spill] sm:$0xff] %v3543_v58  ;;  %v4476_v8 = vld [vmem:[#allocation19_spill] sm:$0xff]  ;;  %v924_v1 = vmul.f32 %v2168_v2, %v4477_v32  ;;  %v925_v16 = vmul.f32 %v2168_v2, %v3225_v54  ;;  %v926_v41 = vmul.f32 %v2168_v2, %v3228_v55 }
 0x110   : > { %4474 = vst [vmem:[#allocation31_spill] sm:$0xff] %v3546_v3  ;;  %4475 = vst [vmem:[#allocation32_spill] sm:$0xff] %v3549_v50  ;;  %v923_v48 = vmul.f32 %v2168_v2, %v4476_v8  ;;  %v927_v19 = vmul.f32 %v2168_v2, %v3235_v60  ;;  %v928_v57 = vmul.f32 %v2168_v2, %v3238_v61 }
 0x111   : > { %v929_v13 = vmul.f32 %v2168_v2, %v3241_v62  ;;  %v930_v24 = vmul.f32 %v2168_v2, %v3248_v4  ;;  %v931_v9 = vmul.f32 %v2168_v2, %v3528_v43  ;;  %v932_v34 = vmul.f32 %v2168_v2, %v3531_v42 }
 0x112   : > { %v933_v10 = vmul.f32 %v2168_v2, %v3534_v47  ;;  %v934_v29 = vmul.f32 %v2168_v2, %v3537_v38  ;;  %v935_v54 = vmul.f32 %v2168_v2, %v3540_v49  ;;  %v936_v55 = vmul.f32 %v2168_v2, %v3543_v58 }
 0x113   : > { %v937_v60 = vmul.f32 %v2168_v2, %v3546_v3  ;;  %v938_v61 = vmul.f32 %v2168_v2, %v3549_v50  ;;  %v939_v62 = vadd.f32 %v923_v48, %v883_v18  ;;  %v940_v4 = vadd.f32 %v924_v1, %v884_v30  ;;  %v3568_v2 = vld [vmem:[%s3185_s26 + $0x141] sm:$0xff]  ;;  %v3571_v18 = vld [vmem:[%s3185_s26 + $0x151] sm:$0xff] }
 0x114   : > { %v941_v12 = vadd.f32 %v925_v16, %v885_v36  ;;  %v942_v23 = vadd.f32 %v926_v41, %v886_v5  ;;  %v943_v56 = vadd.f32 %v927_v19, %v887_v44  ;;  %v944_v27 = vadd.f32 %v928_v57, %v888_v31  ;;  %4478 = vst [vmem:[#allocation33_spill] sm:$0xff] %v3568_v2  ;;  %v3574_v31 = vld [vmem:[%s3185_s26 + $0x161] sm:$0xff]  ;;  %v3583_v48 = vld [vmem:[%s3185_s26 + $0x191] sm:$0xff] }
 0x115   : > { %v945_v7 = vadd.f32 %v929_v13, %v889_v20  ;;  %v946_v22 = vadd.f32 %v930_v24, %v890_v28  ;;  %v947_v8 = vadd.f32 %v931_v9, %v891_v17  ;;  %v948_v32 = vadd.f32 %v932_v34, %v892_v11  ;;  %4479 = vst [vmem:[#allocation34_spill] sm:$0xff] %v3571_v18  ;;  %v3577_v20 = vld [vmem:[%s3185_s26 + $0x171] sm:$0xff]  ;;  %v3580_v28 = vld [vmem:[%s3185_s26 + $0x181] sm:$0xff] }
 0x116   : > { %v949_v43 = vadd.f32 %v933_v10, %v893_v6  ;;  %v950_v33 = vadd.f32 %v934_v29, %v894_v51  ;;  %v951_v30 = vadd.f32 %v935_v54, %v895_v59  ;;  %v952_v36 = vadd.f32 %v936_v55, %v896_v39  ;;  %4480 = vst [vmem:[#allocation35_spill] sm:$0xff] %v3574_v31  ;;  %v3586_v17 = vld [vmem:[%s3185_s26 + $0x1a1] sm:$0xff]  ;;  %v3589_v6 = vld [vmem:[%s3185_s26 + $0x1b1] sm:$0xff] }
 0x117   : > { %v953_v5 = vadd.f32 %v937_v60, %v897_v40  ;;  %v954_v44 = vadd.f32 %v938_v61, %v898_v46  ;;  %4481 = vst [vmem:[#allocation38_spill] sm:$0xff] %v3577_v20  ;;  %4482 = vst [vmem:[#allocation39_spill] sm:$0xff] %v3580_v28  ;;  %v4486_v51 = vld [vmem:[#allocation29_spill] sm:$0xff]  ;;  %v4487_v1 = vld [vmem:[#allocation30_spill] sm:$0xff]  ;;  %v978_v59 = vmul.f32 %v2185_v26, %v4447_v21 }
 0x118   : > { %4483 = vst [vmem:[#allocation40_spill] sm:$0xff] %v3583_v48  ;;  %4484 = vst [vmem:[#allocation41_spill] sm:$0xff] %v3586_v17  ;;  %v976_v11 = vmul.f32 %v2185_v26, %v4486_v51  ;;  %v977_v16 = vmul.f32 %v2185_v26, %v4487_v1  ;;  %v979_v39 = vmul.f32 %v2185_v26, %v4448_v14  ;;  %v4488_v19 = vld [vmem:[#allocation36_spill] sm:$0xff]  ;;  %v2202_v1 = vld [vmem:[#allocation6 + $0xb] ss:$0 sm:$0xff] }
 0x119   : > { %4485 = vst [vmem:[#allocation42_spill] sm:$0xff] %v3589_v6  ;;  %v980_v40 = vmul.f32 %v2185_v26, %v4449_v53  ;;  %v981_v46 = vmul.f32 %v2185_v26, %v4450_v0  ;;  %v982_v41 = vmul.f32 %v2185_v26, %v4451_v63  ;;  %v983_v57 = vmul.f32 %v2185_v26, %v4488_v19 }
 0x11a   : > { %v984_v13 = vmul.f32 %v2185_v26, %v3568_v2  ;;  %v985_v24 = vmul.f32 %v2185_v26, %v3571_v18  ;;  %v986_v9 = vmul.f32 %v2185_v26, %v3574_v31  ;;  %v987_v34 = vmul.f32 %v2185_v26, %v3577_v20 }
 0x11b   : > { %v988_v21 = vmul.f32 %v2185_v26, %v3580_v28  ;;  %v989_v14 = vmul.f32 %v2185_v26, %v3583_v48  ;;  %v990_v53 = vmul.f32 %v2185_v26, %v3586_v17  ;;  %v991_v0 = vmul.f32 %v2185_v26, %v3589_v6  ;;  %v3608_v26 = vld [vmem:[%s3185_s26 + $0x142] sm:$0xff] }
 0x11c   : > { %v992_v63 = vadd.f32 %v976_v11, %v939_v62  ;;  %v993_v10 = vadd.f32 %v977_v16, %v940_v4  ;;  %v994_v29 = vadd.f32 %v978_v59, %v941_v12  ;;  %v995_v54 = vadd.f32 %v979_v39, %v942_v23  ;;  %4489 = vst [vmem:[#allocation43_spill] sm:$0xff] %v3608_v26  ;;  %v3611_v62 = vld [vmem:[%s3185_s26 + $0x152] sm:$0xff]  ;;  %v4498_v16 = vld [vmem:[#allocation45_spill] sm:$0xff] }
 0x11d   : > { %v996_v55 = vadd.f32 %v980_v40, %v943_v56  ;;  %v997_v60 = vadd.f32 %v981_v46, %v944_v27  ;;  %v998_v61 = vadd.f32 %v982_v41, %v945_v7  ;;  %v999_v51 = vadd.f32 %v983_v57, %v946_v22  ;;  %4490 = vst [vmem:[#allocation22_spill] sm:$0xff] %v3611_v62  ;;  %v3614_v27 = vld [vmem:[%s3185_s26 + $0x162] sm:$0xff]  ;;  %v3617_v7 = vld [vmem:[%s3185_s26 + $0x172] sm:$0xff] }
 0x11e   : > { %v1000_v19 = vadd.f32 %v984_v13, %v947_v8  ;;  %v1001_v2 = vadd.f32 %v985_v24, %v948_v32  ;;  %v1002_v17 = vadd.f32 %v986_v9, %v949_v43  ;;  %v1003_v48 = vadd.f32 %v987_v34, %v950_v33  ;;  %4491 = vst [vmem:[#allocation46_spill] sm:$0xff] %v3614_v27  ;;  %v3620_v22 = vld [vmem:[%s3185_s26 + $0x182] sm:$0xff]  ;;  %v3623_v11 = vld [vmem:[%s3185_s26 + $0x192] sm:$0xff]  ;;  %v2221_v34 = vld [vmem:[#allocation6 + $0xc] ss:$0 sm:$0xff] }
 0x11f   : > { %v1004_v4 = vadd.f32 %v988_v21, %v951_v30  ;;  %v1005_v12 = vadd.f32 %v989_v14, %v952_v36  ;;  %v1006_v23 = vadd.f32 %v990_v53, %v953_v5  ;;  %v1007_v56 = vadd.f32 %v991_v0, %v954_v44  ;;  %4492 = vst [vmem:[#allocation47_spill] sm:$0xff] %v3617_v7  ;;  %v3626_v8 = vld [vmem:[%s3185_s26 + $0x1a2] sm:$0xff]  ;;  %v3629_v43 = vld [vmem:[%s3185_s26 + $0x1b2] sm:$0xff] }
 0x120   : > { %4493 = vst [vmem:[#allocation48_spill] sm:$0xff] %v3620_v22  ;;  %4494 = vst [vmem:[#allocation49_spill] sm:$0xff] %v3623_v11  ;;  %v4497_v33 = vld [vmem:[#allocation44_spill] sm:$0xff]  ;;  %v1030_v59 = vmul.f32 %v2202_v1, %v4498_v16  ;;  %v1031_v30 = vmul.f32 %v2202_v1, %v4462_v52  ;;  %v1032_v36 = vmul.f32 %v2202_v1, %v4463_v37  ;;  %v2205_v21 = vld [vmem:[%s3185_s26 + $0xb0] sm:$0xff] }
 0x121   : > { %4495 = vst [vmem:[#allocation50_spill] sm:$0xff] %v3626_v8  ;;  %4496 = vst [vmem:[#allocation51_spill] sm:$0xff] %v3629_v43  ;;  %v1029_v32 = vmul.f32 %v2202_v1, %v4497_v33  ;;  %v1033_v5 = vmul.f32 %v2202_v1, %v4464_v15  ;;  %v1034_v44 = vmul.f32 %v2202_v1, %v4465_v45  ;;  %v3649_v16 = vld [vmem:[%s3185_s26 + $0xc0] sm:$0xff] }
 0x122   : > { %v1035_v39 = vmul.f32 %v2202_v1, %v4466_v25  ;;  %v1036_v40 = vmul.f32 %v2202_v1, %v4467_v35  ;;  %v1037_v46 = vmul.f32 %v2202_v1, %v3608_v26  ;;  %v1038_v41 = vmul.f32 %v2202_v1, %v3611_v62  ;;  %v3652_v26 = vld [vmem:[%s3185_s26 + $0xd0] sm:$0xff] }
 0x123   : > { %v1039_v57 = vmul.f32 %v2202_v1, %v3614_v27  ;;  %v1040_v52 = vmul.f32 %v2202_v1, %v3617_v7  ;;  %v1041_v37 = vmul.f32 %v2202_v1, %v3620_v22  ;;  %v1042_v15 = vmul.f32 %v2202_v1, %v3623_v11 }
 0x124   : > { %v1043_v45 = vmul.f32 %v2202_v1, %v3626_v8  ;;  %v1044_v25 = vmul.f32 %v2202_v1, %v3629_v43  ;;  %v1045_v35 = vadd.f32 %v1029_v32, %v992_v63  ;;  %v1046_v13 = vadd.f32 %v1030_v59, %v993_v10  ;;  %v3655_v8 = vld [vmem:[%s3185_s26 + $0xe0] sm:$0xff]  ;;  %v3658_v32 = vld [vmem:[%s3185_s26 + $0xf0] sm:$0xff] }
 0x125   : > { %v1047_v24 = vadd.f32 %v1031_v30, %v994_v29  ;;  %v1048_v9 = vadd.f32 %v1032_v36, %v995_v54  ;;  %v1049_v14 = vadd.f32 %v1033_v5, %v996_v55  ;;  %v1050_v53 = vadd.f32 %v1034_v44, %v997_v60  ;;  %v3661_v54 = vld [vmem:[%s3185_s26 + $0x100] sm:$0xff]  ;;  %v3664_v59 = vld [vmem:[%s3185_s26 + $0x110] sm:$0xff] }
 0x126   : > { %v1051_v0 = vadd.f32 %v1035_v39, %v998_v61  ;;  %v1052_v33 = vadd.f32 %v1036_v40, %v999_v51  ;;  %v1053_v63 = vadd.f32 %v1037_v46, %v1000_v19  ;;  %v1054_v10 = vadd.f32 %v1038_v41, %v1001_v2  ;;  %v3667_v30 = vld [vmem:[%s3185_s26 + $0x1c0] sm:$0xff] }
 0x127   : > { %v1055_v1 = vadd.f32 %v1039_v57, %v1002_v17  ;;  %v1056_v29 = vadd.f32 %v1040_v52, %v1003_v48  ;;  %v1057_v55 = vadd.f32 %v1041_v37, %v1004_v4  ;;  %v1058_v60 = vadd.f32 %v1042_v15, %v1005_v12  ;;  %4499 = vst [vmem:[#allocation19_spill] sm:$0xff] %v3667_v30  ;;  %v4500_v4 = vld [vmem:[#allocation52_spill] sm:$0xff] }
 0x128   : > { %v1059_v61 = vadd.f32 %v1043_v45, %v1006_v23  ;;  %v1060_v51 = vadd.f32 %v1044_v25, %v1007_v56  ;;  %v1084_v36 = vmul.f32 %v2221_v34, %v2205_v21  ;;  %v1085_v5 = vmul.f32 %v2221_v34, %v3649_v16  ;;  %v2238_v21 = vld [vmem:[#allocation6 + $0xd] ss:$0 sm:$0xff] }
 0x129   : > { %v1086_v19 = vmul.f32 %v2221_v34, %v3652_v26  ;;  %v1087_v2 = vmul.f32 %v2221_v34, %v3655_v8  ;;  %v1088_v48 = vmul.f32 %v2221_v34, %v3658_v32  ;;  %v1089_v17 = vmul.f32 %v2221_v34, %v3661_v54 }
 0x12a   : > { %v1090_v44 = vmul.f32 %v2221_v34, %v3664_v59  ;;  %v1091_v12 = vmul.f32 %v2221_v34, %v4500_v4  ;;  %v1092_v23 = vmul.f32 %v2221_v34, %v3531_v42  ;;  %v1093_v56 = vmul.f32 %v2221_v34, %v3534_v47  ;;  %v2222_v4 = vld [vmem:[%s3185_s26 + $0xb1] sm:$0xff]  ;;  %v3686_v47 = vld [vmem:[%s3185_s26 + $0xc1] sm:$0xff] }
 0x12b   : > { %v1094_v39 = vmul.f32 %v2221_v34, %v3537_v38  ;;  %v1095_v40 = vmul.f32 %v2221_v34, %v3540_v49  ;;  %v1096_v46 = vmul.f32 %v2221_v34, %v3543_v58  ;;  %v1097_v41 = vmul.f32 %v2221_v34, %v3546_v3  ;;  %v3689_v3 = vld [vmem:[%s3185_s26 + $0xd1] sm:$0xff] }
 0x12c   : > { %v1098_v57 = vmul.f32 %v2221_v34, %v3549_v50  ;;  %v1099_v52 = vmul.f32 %v2221_v34, %v3667_v30  ;;  %v1100_v37 = vadd.f32 %v1084_v36, %v1045_v35  ;;  %v1101_v15 = vadd.f32 %v1085_v5, %v1046_v13  ;;  %v3692_v50 = vld [vmem:[%s3185_s26 + $0xe1] sm:$0xff]  ;;  %v3695_v36 = vld [vmem:[%s3185_s26 + $0xf1] sm:$0xff] }
 0x12d   : > { %v1102_v45 = vadd.f32 %v1086_v19, %v1047_v24  ;;  %v1103_v25 = vadd.f32 %v1087_v2, %v1048_v9  ;;  %v1104_v42 = vadd.f32 %v1088_v48, %v1049_v14  ;;  %v1105_v49 = vadd.f32 %v1089_v17, %v1050_v53  ;;  %v3698_v9 = vld [vmem:[%s3185_s26 + $0x101] sm:$0xff]  ;;  %v3701_v5 = vld [vmem:[%s3185_s26 + $0x111] sm:$0xff] }
 0x12e   : > { %v1106_v38 = vadd.f32 %v1090_v44, %v1051_v0  ;;  %v1107_v58 = vadd.f32 %v1091_v12, %v1052_v33  ;;  %v1108_v35 = vadd.f32 %v1092_v23, %v1053_v63  ;;  %v1109_v13 = vadd.f32 %v1093_v56, %v1054_v10  ;;  %4501 = vst [vmem:[#allocation21_spill] sm:$0xff] %v3698_v9  ;;  %v3704_v19 = vld [vmem:[%s3185_s26 + $0x1c1] sm:$0xff]  ;;  %v4505_v23 = vld [vmem:[#allocation40_spill] sm:$0xff] }
 0x12f   : > { %v1110_v34 = vadd.f32 %v1094_v39, %v1055_v1  ;;  %v1111_v24 = vadd.f32 %v1095_v40, %v1056_v29  ;;  %4502 = vst [vmem:[#allocation29_spill] sm:$0xff] %v3701_v5  ;;  %v1112_v14 = vadd.f32 %v1096_v46, %v1057_v55  ;;  %v1113_v53 = vadd.f32 %v1097_v41, %v1058_v60  ;;  %v4504_v55 = vld [vmem:[#allocation20_spill] sm:$0xff]  ;;  %v4506_v39 = vld [vmem:[#allocation41_spill] sm:$0xff] }
 0x130   : > { %v1114_v0 = vadd.f32 %v1098_v57, %v1059_v61  ;;  %v1115_v33 = vadd.f32 %v1099_v52, %v1060_v51  ;;  %4503 = vst [vmem:[#allocation30_spill] sm:$0xff] %v3704_v19  ;;  %v1137_v2 = vmul.f32 %v2238_v21, %v2222_v4  ;;  %v1138_v48 = vmul.f32 %v2238_v21, %v3686_v47 }
 0x131   : > { %v1139_v63 = vmul.f32 %v2238_v21, %v3689_v3  ;;  %v1140_v10 = vmul.f32 %v2238_v21, %v3692_v50  ;;  %v1141_v1 = vmul.f32 %v2238_v21, %v3695_v36  ;;  %v1142_v29 = vmul.f32 %v2238_v21, %v3698_v9  ;;  %v3723_v9 = vld [vmem:[%s3185_s26 + $0xc2] sm:$0xff] }
 0x132   : > { %v1143_v17 = vmul.f32 %v2238_v21, %v3701_v5  ;;  %v1144_v60 = vmul.f32 %v2238_v21, %v4504_v55  ;;  %v1145_v61 = vmul.f32 %v2238_v21, %v3571_v18  ;;  %v1146_v51 = vmul.f32 %v2238_v21, %v3574_v31  ;;  %v2255_v18 = vld [vmem:[#allocation6 + $0xe] ss:$0 sm:$0xff]  ;;  %4507 = vst [vmem:[#allocation36_spill] sm:$0xff] %v3723_v9 }
 0x133   : > { %v1147_v44 = vmul.f32 %v2238_v21, %v3577_v20  ;;  %v1148_v12 = vmul.f32 %v2238_v21, %v3580_v28  ;;  %v1149_v56 = vmul.f32 %v2238_v21, %v4505_v23  ;;  %v1150_v40 = vmul.f32 %v2238_v21, %v4506_v39  ;;  %v2239_v20 = vld [vmem:[%s3185_s26 + $0xb2] sm:$0xff] }
 0x134   : > { %v1151_v46 = vmul.f32 %v2238_v21, %v3589_v6  ;;  %v1152_v41 = vmul.f32 %v2238_v21, %v3704_v19  ;;  %v1153_v57 = vadd.f32 %v1137_v2, %v1100_v37  ;;  %v1154_v52 = vadd.f32 %v1138_v48, %v1101_v15  ;;  %v3726_v39 = vld [vmem:[%s3185_s26 + $0xd2] sm:$0xff]  ;;  %v3729_v6 = vld [vmem:[%s3185_s26 + $0xe2] sm:$0xff] }
 0x135   : > { %v1155_v4 = vadd.f32 %v1139_v63, %v1102_v45  ;;  %v1156_v55 = vadd.f32 %v1140_v10, %v1103_v25  ;;  %v1157_v28 = vadd.f32 %v1141_v1, %v1104_v42  ;;  %v1158_v31 = vadd.f32 %v1142_v29, %v1105_v49  ;;  %4508 = vst [vmem:[#allocation44_spill] sm:$0xff] %v3726_v39  ;;  %v3732_v2 = vld [vmem:[%s3185_s26 + $0xf2] sm:$0xff]  ;;  %v3735_v25 = vld [vmem:[%s3185_s26 + $0x102] sm:$0xff] }
 0x136   : > { %v1159_v5 = vadd.f32 %v1143_v17, %v1106_v38  ;;  %v1160_v23 = vadd.f32 %v1144_v60, %v1107_v58  ;;  %4509 = vst [vmem:[#allocation45_spill] sm:$0xff] %v3729_v6  ;;  %v1161_v37 = vadd.f32 %v1145_v61, %v1108_v35  ;;  %v1162_v15 = vadd.f32 %v1146_v51, %v1109_v13  ;;  %v3738_v48 = vld [vmem:[%s3185_s26 + $0x112] sm:$0xff]  ;;  %v3741_v63 = vld [vmem:[%s3185_s26 + $0x1c2] sm:$0xff] }
 0x137   : > { %v1163_v21 = vadd.f32 %v1147_v44, %v1110_v34  ;;  %v1164_v45 = vadd.f32 %v1148_v12, %v1111_v24  ;;  %4510 = vst [vmem:[#allocation52_spill] sm:$0xff] %v3732_v2  ;;  %4511 = vst [vmem:[#allocation20_spill] sm:$0xff] %v3735_v25  ;;  %v1165_v42 = vadd.f32 %v1149_v56, %v1112_v14  ;;  %v4514_v17 = vld [vmem:[#allocation53_spill] sm:$0xff]  ;;  %v4515_v61 = vld [vmem:[#allocation50_spill] sm:$0xff] }
 0x138   : > { %4512 = vst [vmem:[#allocation54_spill] sm:$0xff] %v3738_v48  ;;  %v1166_v38 = vadd.f32 %v1150_v40, %v1113_v53  ;;  %v1167_v49 = vadd.f32 %v1151_v46, %v1114_v0  ;;  %v1168_v58 = vadd.f32 %v1152_v41, %v1115_v33  ;;  %4513 = vst [vmem:[#allocation55_spill] sm:$0xff] %v3741_v63 }
 0x139   : > { %v1190_v10 = vmul.f32 %v2255_v18, %v2239_v20  ;;  %v1191_v1 = vmul.f32 %v2255_v18, %v3723_v9  ;;  %v1192_v35 = vmul.f32 %v2255_v18, %v3726_v39  ;;  %v1193_v13 = vmul.f32 %v2255_v18, %v3729_v6 }
 0x13a   : > { %v1194_v34 = vmul.f32 %v2255_v18, %v3732_v2  ;;  %v1195_v24 = vmul.f32 %v2255_v18, %v3735_v25  ;;  %v1196_v29 = vmul.f32 %v2255_v18, %v3738_v48  ;;  %v1197_v14 = vmul.f32 %v2255_v18, %v4514_v17  ;;  %v2274_v48 = vld [vmem:[#allocation6 + $0xf] ss:$0 sm:$0xff] }
 0x13b   : > { %v1198_v53 = vmul.f32 %v2255_v18, %v3611_v62  ;;  %v1199_v0 = vmul.f32 %v2255_v18, %v3614_v27  ;;  %v1200_v20 = vmul.f32 %v2255_v18, %v3617_v7  ;;  %v1201_v33 = vmul.f32 %v2255_v18, %v3620_v22 }
 0x13c   : > { %v1202_v60 = vmul.f32 %v2255_v18, %v3623_v11  ;;  %v1203_v51 = vmul.f32 %v2255_v18, %v4515_v61  ;;  %v1204_v44 = vmul.f32 %v2255_v18, %v3629_v43  ;;  %v1205_v12 = vmul.f32 %v2255_v18, %v3741_v63  ;;  %v2264_v61 = vld [vmem:[%s3185_s26 + $0x120] sm:$0xff]  ;;  %v3760_v18 = vld [vmem:[%s3185_s26 + $0x1d0] sm:$0xff] }
 0x13d   : > { %v1206_v56 = vadd.f32 %v1190_v10, %v1153_v57  ;;  %v1207_v40 = vadd.f32 %v1191_v1, %v1154_v52  ;;  %v1208_v46 = vadd.f32 %v1192_v35, %v1155_v4  ;;  %v1209_v41 = vadd.f32 %v1193_v13, %v1156_v55  ;;  %4516 = vst [vmem:[#allocation53_spill] sm:$0xff] %v3760_v18  ;;  %v4517_v55 = vld [vmem:[#allocation37_spill] sm:$0xff] }
 0x13e   : > { %v1210_v17 = vadd.f32 %v1194_v34, %v1157_v28  ;;  %v1211_v62 = vadd.f32 %v1195_v24, %v1158_v31  ;;  %v1212_v27 = vadd.f32 %v1196_v29, %v1159_v5  ;;  %v1213_v7 = vadd.f32 %v1197_v14, %v1160_v23 }
 0x13f   : > { %v1214_v22 = vadd.f32 %v1198_v53, %v1161_v37  ;;  %v1215_v25 = vadd.f32 %v1199_v0, %v1162_v15  ;;  %v1216_v11 = vadd.f32 %v1200_v20, %v1163_v21  ;;  %v1217_v2 = vadd.f32 %v1201_v33, %v1164_v45  ;;  %v4518_v15 = vld [vmem:[#allocation26_spill] sm:$0xff]  ;;  %v4519_v45 = vld [vmem:[#allocation27_spill] sm:$0xff] }
 0x140   : > { %v1218_v6 = vadd.f32 %v1202_v60, %v1165_v42  ;;  %v1219_v39 = vadd.f32 %v1203_v51, %v1166_v38  ;;  %v1220_v43 = vadd.f32 %v1204_v44, %v1167_v49  ;;  %v1221_v9 = vadd.f32 %v1205_v12, %v1168_v58  ;;  %v4520_v38 = vld [vmem:[#allocation28_spill] sm:$0xff]  ;;  %v2291_v0 = vld [vmem:[#allocation6 + $0x10] ss:$0 sm:$0xff]  ;;  %v2281_v51 = vld [vmem:[%s3185_s26 + $0x121] sm:$0xff] }
 0x141   : > { %v1245_v57 = vmul.f32 %v2274_v48, %v3649_v16  ;;  %v1246_v52 = vmul.f32 %v2274_v48, %v3652_v26  ;;  %v1247_v31 = vmul.f32 %v2274_v48, %v3655_v8  ;;  %v1248_v28 = vmul.f32 %v2274_v48, %v3658_v32  ;;  %v4521_v16 = vld [vmem:[#allocation18_spill] sm:$0xff]  ;;  %v4522_v26 = vld [vmem:[#allocation31_spill] sm:$0xff]  ;;  %v4523_v8 = vld [vmem:[#allocation32_spill] sm:$0xff] }
 0x142   : > { %v1249_v5 = vmul.f32 %v2274_v48, %v3661_v54  ;;  %v1250_v23 = vmul.f32 %v2274_v48, %v3664_v59  ;;  %v1251_v4 = vmul.f32 %v2274_v48, %v2264_v61  ;;  %v1252_v37 = vmul.f32 %v2274_v48, %v4517_v55 }
 0x143   : > { %v1253_v21 = vmul.f32 %v2274_v48, %v4518_v15  ;;  %v1254_v42 = vmul.f32 %v2274_v48, %v4519_v45  ;;  %v1255_v49 = vmul.f32 %v2274_v48, %v4520_v38  ;;  %v1256_v58 = vmul.f32 %v2274_v48, %v4521_v16 }
 0x144   : > { %v1257_v10 = vmul.f32 %v2274_v48, %v4522_v26  ;;  %v1258_v1 = vmul.f32 %v2274_v48, %v4523_v8  ;;  %v1259_v32 = vmul.f32 %v2274_v48, %v3667_v30  ;;  %v1260_v54 = vmul.f32 %v2274_v48, %v3760_v18  ;;  %v3779_v48 = vld [vmem:[%s3185_s26 + $0x1d1] sm:$0xff] }
 0x145   : > { %v1261_v59 = vadd.f32 %v1245_v57, %v1206_v56  ;;  %v1262_v35 = vadd.f32 %v1246_v52, %v1207_v40  ;;  %v1263_v13 = vadd.f32 %v1247_v31, %v1208_v46  ;;  %v1264_v34 = vadd.f32 %v1248_v28, %v1209_v41  ;;  %4524 = vst [vmem:[#allocation37_spill] sm:$0xff] %v3779_v48  ;;  %v4527_v46 = vld [vmem:[#allocation17_spill] sm:$0xff] }
 0x146   : > { %v1265_v24 = vadd.f32 %v1249_v5, %v1210_v17  ;;  %v1266_v29 = vadd.f32 %v1250_v23, %v1211_v62  ;;  %v1267_v14 = vadd.f32 %v1251_v4, %v1212_v27  ;;  %v1268_v53 = vadd.f32 %v1252_v37, %v1213_v7  ;;  %v4525_v7 = vld [vmem:[#allocation21_spill] sm:$0xff]  ;;  %v4530_v17 = vld [vmem:[#allocation39_spill] sm:$0xff] }
 0x147   : > { %v1269_v20 = vadd.f32 %v1253_v21, %v1214_v22  ;;  %v1270_v33 = vadd.f32 %v1254_v42, %v1215_v25  ;;  %v1271_v60 = vadd.f32 %v1255_v49, %v1216_v11  ;;  %v1272_v61 = vadd.f32 %v1256_v58, %v1217_v2  ;;  %v4526_v25 = vld [vmem:[#allocation29_spill] sm:$0xff] }
 0x148   : > { %v1273_v44 = vadd.f32 %v1257_v10, %v1218_v6  ;;  %v1274_v12 = vadd.f32 %v1258_v1, %v1219_v39  ;;  %v1275_v55 = vadd.f32 %v1259_v32, %v1220_v43  ;;  %v1276_v30 = vadd.f32 %v1260_v54, %v1221_v9  ;;  %v4528_v39 = vld [vmem:[#allocation35_spill] sm:$0xff]  ;;  %v4529_v9 = vld [vmem:[#allocation38_spill] sm:$0xff] }
 0x149   : > { %v1298_v56 = vmul.f32 %v2291_v0, %v3686_v47  ;;  %v1299_v40 = vmul.f32 %v2291_v0, %v3689_v3  ;;  %v1300_v62 = vmul.f32 %v2291_v0, %v3692_v50  ;;  %v1301_v27 = vmul.f32 %v2291_v0, %v3695_v36  ;;  %v4531_v47 = vld [vmem:[#allocation40_spill] sm:$0xff]  ;;  %v4532_v3 = vld [vmem:[#allocation41_spill] sm:$0xff]  ;;  %v4533_v50 = vld [vmem:[#allocation42_spill] sm:$0xff] }
 0x14a   : > { %v1302_v22 = vmul.f32 %v2291_v0, %v4525_v7  ;;  %v1303_v11 = vmul.f32 %v2291_v0, %v4526_v25  ;;  %v1304_v2 = vmul.f32 %v2291_v0, %v2281_v51  ;;  %v1305_v6 = vmul.f32 %v2291_v0, %v4527_v46  ;;  %v2308_v1 = vld [vmem:[#allocation6 + $0x11] ss:$0 sm:$0xff]  ;;  %v2298_v25 = vld [vmem:[%s3185_s26 + $0x122] sm:$0xff] }
 0x14b   : > { %v1306_v43 = vmul.f32 %v2291_v0, %v4528_v39  ;;  %v1307_v41 = vmul.f32 %v2291_v0, %v4529_v9  ;;  %v1308_v57 = vmul.f32 %v2291_v0, %v4530_v17  ;;  %v1309_v52 = vmul.f32 %v2291_v0, %v4531_v47 }
 0x14c   : > { %v1310_v31 = vmul.f32 %v2291_v0, %v4532_v3  ;;  %v1311_v28 = vmul.f32 %v2291_v0, %v4533_v50  ;;  %v1312_v36 = vmul.f32 %v2291_v0, %v3704_v19  ;;  %v1313_v5 = vmul.f32 %v2291_v0, %v3779_v48  ;;  %v3798_v0 = vld [vmem:[%s3185_s26 + $0x1d2] sm:$0xff] }
 0x14d   : > { %v1314_v23 = vadd.f32 %v1298_v56, %v1261_v59  ;;  %v1315_v4 = vadd.f32 %v1299_v40, %v1262_v35  ;;  %v1316_v37 = vadd.f32 %v1300_v62, %v1263_v13  ;;  %v1317_v21 = vadd.f32 %v1301_v27, %v1264_v34  ;;  %4534 = vst [vmem:[#allocation26_spill] sm:$0xff] %v3798_v0  ;;  %v4535_v59 = vld [vmem:[#allocation36_spill] sm:$0xff]  ;;  %v4541_v40 = vld [vmem:[#allocation23_spill] sm:$0xff] }
 0x14e   : > { %v1318_v42 = vadd.f32 %v1302_v22, %v1265_v24  ;;  %v1319_v49 = vadd.f32 %v1303_v11, %v1266_v29  ;;  %v1320_v58 = vadd.f32 %v1304_v2, %v1267_v14  ;;  %v1321_v10 = vadd.f32 %v1305_v6, %v1268_v53  ;;  %v4536_v13 = vld [vmem:[#allocation44_spill] sm:$0xff]  ;;  %v4537_v24 = vld [vmem:[#allocation45_spill] sm:$0xff]  ;;  %v4546_v6 = vld [vmem:[#allocation50_spill] sm:$0xff] }
 0x14f   : > { %v1322_v32 = vadd.f32 %v1306_v43, %v1269_v20  ;;  %v1323_v54 = vadd.f32 %v1307_v41, %v1270_v33  ;;  %v1324_v51 = vadd.f32 %v1308_v57, %v1271_v60  ;;  %v1325_v7 = vadd.f32 %v1309_v52, %v1272_v61  ;;  %v4538_v14 = vld [vmem:[#allocation52_spill] sm:$0xff]  ;;  %v4540_v33 = vld [vmem:[#allocation54_spill] sm:$0xff]  ;;  %v4545_v11 = vld [vmem:[#allocation49_spill] sm:$0xff] }
 0x150   : > { %v1326_v46 = vadd.f32 %v1310_v31, %v1273_v44  ;;  %v1327_v18 = vadd.f32 %v1311_v28, %v1274_v12  ;;  %v1328_v19 = vadd.f32 %v1312_v36, %v1275_v55  ;;  %v1329_v50 = vadd.f32 %v1313_v5, %v1276_v30  ;;  %v4539_v56 = vld [vmem:[#allocation20_spill] sm:$0xff]  ;;  %v4542_v12 = vld [vmem:[#allocation46_spill] sm:$0xff]  ;;  %v4543_v30 = vld [vmem:[#allocation47_spill] sm:$0xff] }
 0x151   : > { %v1351_v35 = vmul.f32 %v2308_v1, %v4535_v59  ;;  %v1352_v34 = vmul.f32 %v2308_v1, %v4536_v13  ;;  %v1353_v29 = vmul.f32 %v2308_v1, %v4537_v24  ;;  %v1354_v53 = vmul.f32 %v2308_v1, %v4538_v14  ;;  %v4544_v27 = vld [vmem:[#allocation48_spill] sm:$0xff]  ;;  %v4547_v41 = vld [vmem:[#allocation51_spill] sm:$0xff] }
 0x152   : > { %v1355_v20 = vmul.f32 %v2308_v1, %v4539_v56  ;;  %v1356_v60 = vmul.f32 %v2308_v1, %v4540_v33  ;;  %v1357_v61 = vmul.f32 %v2308_v1, %v2298_v25  ;;  %v1358_v44 = vmul.f32 %v2308_v1, %v4541_v40  ;;  %v2327_v56 = vld [vmem:[#allocation6 + $0x12] ss:$0 sm:$0xff] }
 0x153   : > { %v1359_v55 = vmul.f32 %v2308_v1, %v4542_v12  ;;  %v1360_v62 = vmul.f32 %v2308_v1, %v4543_v30  ;;  %v1361_v22 = vmul.f32 %v2308_v1, %v4544_v27  ;;  %v1362_v2 = vmul.f32 %v2308_v1, %v4545_v11 }
 0x154   : > { %v1363_v43 = vmul.f32 %v2308_v1, %v4546_v6  ;;  %v1364_v57 = vmul.f32 %v2308_v1, %v4547_v41  ;;  %v1365_v52 = vmul.f32 %v2308_v1, %v3741_v63  ;;  %v1366_v31 = vmul.f32 %v2308_v1, %v3798_v0  ;;  %v2319_v1 = vld [vmem:[%s3185_s26 + $0x1e0] sm:$0xff] }
 0x155   : > { %v1367_v28 = vadd.f32 %v1351_v35, %v1314_v23  ;;  %v1368_v36 = vadd.f32 %v1352_v34, %v1315_v4  ;;  %v1369_v5 = vadd.f32 %v1353_v29, %v1316_v37  ;;  %v1370_v25 = vadd.f32 %v1354_v53, %v1317_v21  ;;  %v3817_v23 = vld [vmem:[%s3185_s26 + $0x1f0] sm:$0xff]  ;;  %v3820_v35 = vld [vmem:[%s3185_s26 + $0x200] sm:$0xff] }
 0x156   : > { %v1371_v59 = vadd.f32 %v1355_v20, %v1318_v42  ;;  %v1372_v13 = vadd.f32 %v1356_v60, %v1319_v49  ;;  %v1373_v24 = vadd.f32 %v1357_v61, %v1320_v58  ;;  %v1374_v14 = vadd.f32 %v1358_v44, %v1321_v10  ;;  %4548 = vst [vmem:[#allocation27_spill] sm:$0xff] %v3820_v35  ;;  %v3823_v49 = vld [vmem:[%s3185_s26 + $0x210] sm:$0xff]  ;;  %v3826_v58 = vld [vmem:[%s3185_s26 + $0x220] sm:$0xff] }
 0x157   : > { %v1375_v33 = vadd.f32 %v1359_v55, %v1322_v32  ;;  %v1376_v40 = vadd.f32 %v1360_v62, %v1323_v54  ;;  %v1377_v48 = vadd.f32 %v1361_v22, %v1324_v51  ;;  %v1378_v63 = vadd.f32 %v1362_v2, %v1325_v7  ;;  %4549 = vst [vmem:[#allocation28_spill] sm:$0xff] %v3823_v49  ;;  %v3829_v10 = vld [vmem:[%s3185_s26 + $0x230] sm:$0xff]  ;;  %v3832_v34 = vld [vmem:[%s3185_s26 + $0x240] sm:$0xff]  ;;  %v4554_v54 = vld [vmem:[#allocation24_spill] sm:$0xff] }
 0x158   : > { %v1379_v4 = vadd.f32 %v1363_v43, %v1326_v46  ;;  %v1380_v37 = vadd.f32 %v1364_v57, %v1327_v18  ;;  %v1381_v21 = vadd.f32 %v1365_v52, %v1328_v19  ;;  %v1382_v42 = vadd.f32 %v1366_v31, %v1329_v50  ;;  %4550 = vst [vmem:[#allocation18_spill] sm:$0xff] %v3826_v58  ;;  %v3835_v32 = vld [vmem:[%s3185_s26 + $0x250] sm:$0xff]  ;;  %v4555_v7 = vld [vmem:[#allocation25_spill] sm:$0xff] }
 0x159   : > { %4551 = vst [vmem:[#allocation31_spill] sm:$0xff] %v3829_v10  ;;  %4552 = vst [vmem:[#allocation32_spill] sm:$0xff] %v3832_v34  ;;  %v1407_v51 = vmul.f32 %v2327_v56, %v4554_v54  ;;  %v1408_v29 = vmul.f32 %v2327_v56, %v4555_v7  ;;  %v1409_v18 = vmul.f32 %v2327_v56, %v4518_v15  ;;  %v2344_v31 = vld [vmem:[#allocation6 + $0x13] ss:$0 sm:$0xff] }
 0x15a   : > { %4553 = vst [vmem:[#allocation21_spill] sm:$0xff] %v3835_v32  ;;  %v1410_v19 = vmul.f32 %v2327_v56, %v4519_v45  ;;  %v1411_v50 = vmul.f32 %v2327_v56, %v4520_v38  ;;  %v1412_v46 = vmul.f32 %v2327_v56, %v4521_v16  ;;  %v1413_v53 = vmul.f32 %v2327_v56, %v4522_v26 }
 0x15b   : > { %v1414_v20 = vmul.f32 %v2327_v56, %v4523_v8  ;;  %v1415_v60 = vmul.f32 %v2327_v56, %v2319_v1  ;;  %v1416_v61 = vmul.f32 %v2327_v56, %v3817_v23  ;;  %v1417_v44 = vmul.f32 %v2327_v56, %v3820_v35 }
 0x15c   : > { %v1418_v55 = vmul.f32 %v2327_v56, %v3823_v49  ;;  %v1419_v62 = vmul.f32 %v2327_v56, %v3826_v58  ;;  %v1420_v15 = vmul.f32 %v2327_v56, %v3829_v10  ;;  %v1421_v45 = vmul.f32 %v2327_v56, %v3832_v34 }
 0x15d   : > { %v1422_v38 = vmul.f32 %v2327_v56, %v3835_v32  ;;  %v1423_v16 = vadd.f32 %v1407_v51, %v1367_v28  ;;  %v1424_v26 = vadd.f32 %v1408_v29, %v1368_v36  ;;  %v1425_v8 = vadd.f32 %v1409_v18, %v1369_v5  ;;  %v2336_v56 = vld [vmem:[%s3185_s26 + $0x1e1] sm:$0xff]  ;;  %v3854_v28 = vld [vmem:[%s3185_s26 + $0x1f1] sm:$0xff] }
 0x15e   : > { %v1426_v22 = vadd.f32 %v1410_v19, %v1370_v25  ;;  %v1427_v2 = vadd.f32 %v1411_v50, %v1371_v59  ;;  %v1428_v43 = vadd.f32 %v1412_v46, %v1372_v13  ;;  %v1429_v57 = vadd.f32 %v1413_v53, %v1373_v24  ;;  %v3857_v51 = vld [vmem:[%s3185_s26 + $0x201] sm:$0xff]  ;;  %v3860_v13 = vld [vmem:[%s3185_s26 + $0x211] sm:$0xff] }
 0x15f   : > { %v1430_v52 = vadd.f32 %v1414_v20, %v1374_v14  ;;  %v1431_v1 = vadd.f32 %v1415_v60, %v1375_v33  ;;  %v1432_v54 = vadd.f32 %v1416_v61, %v1376_v40  ;;  %v1433_v7 = vadd.f32 %v1417_v44, %v1377_v48  ;;  %4556 = vst [vmem:[#allocation29_spill] sm:$0xff] %v3857_v51  ;;  %v3863_v24 = vld [vmem:[%s3185_s26 + $0x221] sm:$0xff]  ;;  %v3866_v14 = vld [vmem:[%s3185_s26 + $0x231] sm:$0xff] }
 0x160   : > { %v1434_v0 = vadd.f32 %v1418_v55, %v1378_v63  ;;  %v1435_v36 = vadd.f32 %v1419_v62, %v1379_v4  ;;  %v1436_v5 = vadd.f32 %v1420_v15, %v1380_v37  ;;  %v1437_v25 = vadd.f32 %v1421_v45, %v1381_v21  ;;  %4557 = vst [vmem:[#allocation17_spill] sm:$0xff] %v3860_v13  ;;  %v3869_v29 = vld [vmem:[%s3185_s26 + $0x241] sm:$0xff]  ;;  %v3872_v33 = vld [vmem:[%s3185_s26 + $0x251] sm:$0xff] }
 0x161   : > { %v1438_v59 = vadd.f32 %v1422_v38, %v1382_v42  ;;  %4558 = vst [vmem:[#allocation35_spill] sm:$0xff] %v3863_v24  ;;  %4559 = vst [vmem:[#allocation38_spill] sm:$0xff] %v3866_v14  ;;  %v4562_v63 = vld [vmem:[#allocation33_spill] sm:$0xff]  ;;  %v4563_v40 = vld [vmem:[#allocation34_spill] sm:$0xff]  ;;  %v1462_v4 = vmul.f32 %v2344_v31, %v4528_v39  ;;  %v1463_v37 = vmul.f32 %v2344_v31, %v4529_v9 }
 0x162   : > { %4560 = vst [vmem:[#allocation39_spill] sm:$0xff] %v3869_v29  ;;  %4561 = vst [vmem:[#allocation40_spill] sm:$0xff] %v3872_v33  ;;  %v1460_v48 = vmul.f32 %v2344_v31, %v4562_v63  ;;  %v1461_v18 = vmul.f32 %v2344_v31, %v4563_v40  ;;  %v1464_v21 = vmul.f32 %v2344_v31, %v4530_v17  ;;  %v4564_v50 = vld [vmem:[#allocation42_spill] sm:$0xff]  ;;  %v2361_v63 = vld [vmem:[#allocation6 + $0x14] ss:$0 sm:$0xff] }
 0x163   : > { %v1465_v42 = vmul.f32 %v2344_v31, %v4531_v47  ;;  %v1466_v19 = vmul.f32 %v2344_v31, %v4532_v3  ;;  %v1467_v46 = vmul.f32 %v2344_v31, %v4564_v50  ;;  %v1468_v53 = vmul.f32 %v2344_v31, %v2336_v56 }
 0x164   : > { %v1469_v20 = vmul.f32 %v2344_v31, %v3854_v28  ;;  %v1470_v60 = vmul.f32 %v2344_v31, %v3857_v51  ;;  %v1471_v61 = vmul.f32 %v2344_v31, %v3860_v13  ;;  %v1472_v44 = vmul.f32 %v2344_v31, %v3863_v24 }
 0x165   : > { %v1473_v39 = vmul.f32 %v2344_v31, %v3866_v14  ;;  %v1474_v9 = vmul.f32 %v2344_v31, %v3869_v29  ;;  %v1475_v17 = vmul.f32 %v2344_v31, %v3872_v33  ;;  %v1476_v47 = vadd.f32 %v1460_v48, %v1423_v16  ;;  %v2353_v31 = vld [vmem:[%s3185_s26 + $0x1e2] sm:$0xff]  ;;  %v3891_v16 = vld [vmem:[%s3185_s26 + $0x1f2] sm:$0xff] }
 0x166   : > { %v1477_v3 = vadd.f32 %v1461_v18, %v1424_v26  ;;  %v1478_v55 = vadd.f32 %v1462_v4, %v1425_v8  ;;  %v1479_v62 = vadd.f32 %v1463_v37, %v1426_v22  ;;  %v1480_v15 = vadd.f32 %v1464_v21, %v1427_v2  ;;  %v3894_v48 = vld [vmem:[%s3185_s26 + $0x202] sm:$0xff] }
 0x167   : > { %v1481_v45 = vadd.f32 %v1465_v42, %v1428_v43  ;;  %v1482_v38 = vadd.f32 %v1466_v19, %v1429_v57  ;;  %v1483_v56 = vadd.f32 %v1467_v46, %v1430_v52  ;;  %v1484_v40 = vadd.f32 %v1468_v53, %v1431_v1  ;;  %4565 = vst [vmem:[#allocation41_spill] sm:$0xff] %v3894_v48  ;;  %v3897_v43 = vld [vmem:[%s3185_s26 + $0x212] sm:$0xff]  ;;  %v3900_v57 = vld [vmem:[%s3185_s26 + $0x222] sm:$0xff] }
 0x168   : > { %v1485_v50 = vadd.f32 %v1469_v20, %v1432_v54  ;;  %v1486_v29 = vadd.f32 %v1470_v60, %v1433_v7  ;;  %v1487_v14 = vadd.f32 %v1471_v61, %v1434_v0  ;;  %v1488_v26 = vadd.f32 %v1472_v44, %v1435_v36  ;;  %4566 = vst [vmem:[#allocation36_spill] sm:$0xff] %v3897_v43  ;;  %v3903_v52 = vld [vmem:[%s3185_s26 + $0x232] sm:$0xff]  ;;  %v3906_v18 = vld [vmem:[%s3185_s26 + $0x242] sm:$0xff] }
 0x169   : > { %v1489_v8 = vadd.f32 %v1473_v39, %v1436_v5  ;;  %v1490_v22 = vadd.f32 %v1474_v9, %v1437_v25  ;;  %v1491_v2 = vadd.f32 %v1475_v17, %v1438_v59  ;;  %4567 = vst [vmem:[#allocation44_spill] sm:$0xff] %v3900_v57  ;;  %4568 = vst [vmem:[#allocation45_spill] sm:$0xff] %v3903_v52  ;;  %v3909_v1 = vld [vmem:[%s3185_s26 + $0x252] sm:$0xff]  ;;  %v4572_v7 = vld [vmem:[#allocation22_spill] sm:$0xff] }
 0x16a   : > { %4569 = vst [vmem:[#allocation52_spill] sm:$0xff] %v3906_v18  ;;  %4570 = vst [vmem:[#allocation20_spill] sm:$0xff] %v3909_v1  ;;  %v4571_v0 = vld [vmem:[#allocation43_spill] sm:$0xff]  ;;  %v1514_v4 = vmul.f32 %v2361_v63, %v4572_v7  ;;  %v1515_v36 = vmul.f32 %v2361_v63, %v4542_v12  ;;  %v1516_v5 = vmul.f32 %v2361_v63, %v4543_v30 }
 0x16b   : > { %v1513_v54 = vmul.f32 %v2361_v63, %v4571_v0  ;;  %v1517_v25 = vmul.f32 %v2361_v63, %v4544_v27  ;;  %v1518_v59 = vmul.f32 %v2361_v63, %v4545_v11  ;;  %v1519_v37 = vmul.f32 %v2361_v63, %v4546_v6  ;;  %v2380_v61 = vld [vmem:[#allocation6 + $0x15] ss:$0 sm:$0xff]  ;;  %v3928_v0 = vld [vmem:[%s3185_s26 + $0x160] sm:$0xff] }
 0x16c   : > { %v1520_v21 = vmul.f32 %v2361_v63, %v4547_v41  ;;  %v1521_v42 = vmul.f32 %v2361_v63, %v2353_v31  ;;  %v1522_v19 = vmul.f32 %v2361_v63, %v3891_v16  ;;  %v1523_v46 = vmul.f32 %v2361_v63, %v3894_v48  ;;  %v2364_v44 = vld [vmem:[%s3185_s26 + $0x150] sm:$0xff] }
 0x16d   : > { %v1524_v53 = vmul.f32 %v2361_v63, %v3897_v43  ;;  %v1525_v12 = vmul.f32 %v2361_v63, %v3900_v57  ;;  %v1526_v30 = vmul.f32 %v2361_v63, %v3903_v52  ;;  %v1527_v27 = vmul.f32 %v2361_v63, %v3906_v18  ;;  %v3931_v7 = vld [vmem:[%s3185_s26 + $0x170] sm:$0xff]  ;;  %v3934_v18 = vld [vmem:[%s3185_s26 + $0x180] sm:$0xff] }
 0x16e   : > { %v1528_v11 = vmul.f32 %v2361_v63, %v3909_v1  ;;  %v1529_v6 = vadd.f32 %v1513_v54, %v1476_v47  ;;  %v1530_v41 = vadd.f32 %v1514_v4, %v1477_v3  ;;  %v1531_v20 = vadd.f32 %v1515_v36, %v1478_v55  ;;  %v3937_v54 = vld [vmem:[%s3185_s26 + $0x190] sm:$0xff]  ;;  %v3946_v36 = vld [vmem:[%s3185_s26 + $0x260] sm:$0xff] }
 0x16f   : > { %v1532_v60 = vadd.f32 %v1516_v5, %v1479_v62  ;;  %v1533_v39 = vadd.f32 %v1517_v25, %v1480_v15  ;;  %v1534_v9 = vadd.f32 %v1518_v59, %v1481_v45  ;;  %v1535_v17 = vadd.f32 %v1519_v37, %v1482_v38  ;;  %v3940_v62 = vld [vmem:[%s3185_s26 + $0x1a0] sm:$0xff]  ;;  %v3943_v4 = vld [vmem:[%s3185_s26 + $0x1b0] sm:$0xff] }
 0x170   : > { %v1536_v31 = vadd.f32 %v1520_v21, %v1483_v56  ;;  %v1537_v47 = vadd.f32 %v1521_v42, %v1484_v40  ;;  %v1538_v3 = vadd.f32 %v1522_v19, %v1485_v50  ;;  %v1539_v63 = vadd.f32 %v1523_v46, %v1486_v29 }
 0x171   : > { %v1540_v55 = vadd.f32 %v1524_v53, %v1487_v14  ;;  %v1541_v15 = vadd.f32 %v1525_v12, %v1488_v26  ;;  %v1542_v45 = vadd.f32 %v1526_v30, %v1489_v8  ;;  %v1543_v38 = vadd.f32 %v1527_v27, %v1490_v22  ;;  %v4573_v26 = vld [vmem:[#allocation19_spill] sm:$0xff] }
 0x172   : > { %v1544_v56 = vadd.f32 %v1528_v11, %v1491_v2  ;;  %v1568_v5 = vmul.f32 %v2380_v61, %v2364_v44  ;;  %v1569_v25 = vmul.f32 %v2380_v61, %v3928_v0  ;;  %v1570_v40 = vmul.f32 %v2380_v61, %v3931_v7  ;;  %v2397_v11 = vld [vmem:[#allocation6 + $0x16] ss:$0 sm:$0xff] }
 0x173   : > { %v1571_v29 = vmul.f32 %v2380_v61, %v3934_v18  ;;  %v1572_v14 = vmul.f32 %v2380_v61, %v3937_v54  ;;  %v1573_v50 = vmul.f32 %v2380_v61, %v3940_v62  ;;  %v1574_v59 = vmul.f32 %v2380_v61, %v3943_v4  ;;  %v2381_v44 = vld [vmem:[%s3185_s26 + $0x151] sm:$0xff] }
 0x174   : > { %v1575_v8 = vmul.f32 %v2380_v61, %v4573_v26  ;;  %v1576_v22 = vmul.f32 %v2380_v61, %v3817_v23  ;;  %v1577_v2 = vmul.f32 %v2380_v61, %v3820_v35  ;;  %v1578_v37 = vmul.f32 %v2380_v61, %v3823_v49  ;;  %v3965_v35 = vld [vmem:[%s3185_s26 + $0x161] sm:$0xff] }
 0x175   : > { %v1579_v21 = vmul.f32 %v2380_v61, %v3826_v58  ;;  %v1580_v42 = vmul.f32 %v2380_v61, %v3829_v10  ;;  %v1581_v19 = vmul.f32 %v2380_v61, %v3832_v34  ;;  %v1582_v46 = vmul.f32 %v2380_v61, %v3835_v32  ;;  %v3968_v34 = vld [vmem:[%s3185_s26 + $0x171] sm:$0xff]  ;;  %v3971_v32 = vld [vmem:[%s3185_s26 + $0x181] sm:$0xff] }
 0x176   : > { %v1583_v53 = vmul.f32 %v2380_v61, %v3946_v36  ;;  %v1584_v12 = vadd.f32 %v1568_v5, %v1529_v6  ;;  %v1585_v30 = vadd.f32 %v1569_v25, %v1530_v41  ;;  %v1586_v23 = vadd.f32 %v1570_v40, %v1531_v20  ;;  %v3974_v5 = vld [vmem:[%s3185_s26 + $0x191] sm:$0xff]  ;;  %v3983_v40 = vld [vmem:[%s3185_s26 + $0x261] sm:$0xff] }
 0x177   : > { %v1587_v27 = vadd.f32 %v1571_v29, %v1532_v60  ;;  %v1588_v26 = vadd.f32 %v1572_v14, %v1533_v39  ;;  %v1589_v58 = vadd.f32 %v1573_v50, %v1534_v9  ;;  %v1590_v49 = vadd.f32 %v1574_v59, %v1535_v17  ;;  %v3977_v60 = vld [vmem:[%s3185_s26 + $0x1a1] sm:$0xff]  ;;  %v3980_v25 = vld [vmem:[%s3185_s26 + $0x1b1] sm:$0xff] }
 0x178   : > { %v1591_v10 = vadd.f32 %v1575_v8, %v1536_v31  ;;  %v1592_v6 = vadd.f32 %v1576_v22, %v1537_v47  ;;  %v1593_v41 = vadd.f32 %v1577_v2, %v1538_v3  ;;  %v1594_v61 = vadd.f32 %v1578_v37, %v1539_v63  ;;  %4574 = vst [vmem:[#allocation54_spill] sm:$0xff] %v3977_v60  ;;  %v4577_v22 = vld [vmem:[#allocation38_spill] sm:$0xff]  ;;  %v4578_v37 = vld [vmem:[#allocation39_spill] sm:$0xff] }
 0x179   : > { %v1595_v20 = vadd.f32 %v1579_v21, %v1540_v55  ;;  %4575 = vst [vmem:[#allocation23_spill] sm:$0xff] %v3980_v25  ;;  %v1596_v39 = vadd.f32 %v1580_v42, %v1541_v15  ;;  %v1597_v9 = vadd.f32 %v1581_v19, %v1542_v45  ;;  %v1598_v17 = vadd.f32 %v1582_v46, %v1543_v38  ;;  %v4576_v15 = vld [vmem:[#allocation30_spill] sm:$0xff] }
 0x17a   : > { %v1599_v31 = vadd.f32 %v1583_v53, %v1544_v56  ;;  %v1621_v29 = vmul.f32 %v2397_v11, %v2381_v44  ;;  %v1622_v14 = vmul.f32 %v2397_v11, %v3965_v35  ;;  %v1623_v47 = vmul.f32 %v2397_v11, %v3968_v34 }
 0x17b   : > { %v1624_v3 = vmul.f32 %v2397_v11, %v3971_v32  ;;  %v1625_v63 = vmul.f32 %v2397_v11, %v3974_v5  ;;  %v1626_v55 = vmul.f32 %v2397_v11, %v3977_v60  ;;  %v1627_v50 = vmul.f32 %v2397_v11, %v3980_v25  ;;  %v4002_v60 = vld [vmem:[%s3185_s26 + $0x162] sm:$0xff] }
 0x17c   : > { %v1628_v45 = vmul.f32 %v2397_v11, %v4576_v15  ;;  %v1629_v38 = vmul.f32 %v2397_v11, %v3854_v28  ;;  %v1630_v56 = vmul.f32 %v2397_v11, %v3857_v51  ;;  %v1631_v59 = vmul.f32 %v2397_v11, %v3860_v13  ;;  %v2414_v15 = vld [vmem:[#allocation6 + $0x17] ss:$0 sm:$0xff]  ;;  %4579 = vst [vmem:[#allocation46_spill] sm:$0xff] %v4002_v60 }
 0x17d   : > { %v1632_v8 = vmul.f32 %v2397_v11, %v3863_v24  ;;  %v1633_v2 = vmul.f32 %v2397_v11, %v4577_v22  ;;  %v1634_v21 = vmul.f32 %v2397_v11, %v4578_v37  ;;  %v1635_v42 = vmul.f32 %v2397_v11, %v3872_v33  ;;  %v2398_v13 = vld [vmem:[%s3185_s26 + $0x152] sm:$0xff]  ;;  %v4008_v33 = vld [vmem:[%s3185_s26 + $0x182] sm:$0xff] }
 0x17e   : > { %v1636_v19 = vmul.f32 %v2397_v11, %v3983_v40  ;;  %v1637_v46 = vadd.f32 %v1621_v29, %v1584_v12  ;;  %v1638_v53 = vadd.f32 %v1622_v14, %v1585_v30  ;;  %v1639_v28 = vadd.f32 %v1623_v47, %v1586_v23  ;;  %v4005_v37 = vld [vmem:[%s3185_s26 + $0x172] sm:$0xff]  ;;  %4581 = vst [vmem:[#allocation48_spill] sm:$0xff] %v4008_v33  ;;  %v4020_v47 = vld [vmem:[%s3185_s26 + $0x262] sm:$0xff] }
 0x17f   : > { %v1640_v44 = vadd.f32 %v1624_v3, %v1587_v27  ;;  %v1641_v24 = vadd.f32 %v1625_v63, %v1588_v26  ;;  %v1642_v51 = vadd.f32 %v1626_v55, %v1589_v58  ;;  %v1643_v25 = vadd.f32 %v1627_v50, %v1590_v49  ;;  %4580 = vst [vmem:[#allocation47_spill] sm:$0xff] %v4005_v37  ;;  %v4011_v29 = vld [vmem:[%s3185_s26 + $0x192] sm:$0xff]  ;;  %v4014_v27 = vld [vmem:[%s3185_s26 + $0x1a2] sm:$0xff] }
 0x180   : > { %v1644_v22 = vadd.f32 %v1628_v45, %v1591_v10  ;;  %v1645_v12 = vadd.f32 %v1629_v38, %v1592_v6  ;;  %v1646_v30 = vadd.f32 %v1630_v56, %v1593_v41  ;;  %v1647_v11 = vadd.f32 %v1631_v59, %v1594_v61  ;;  %4582 = vst [vmem:[#allocation49_spill] sm:$0xff] %v4011_v29  ;;  %v4017_v14 = vld [vmem:[%s3185_s26 + $0x1b2] sm:$0xff] }
 0x181   : > { %v1648_v23 = vadd.f32 %v1632_v8, %v1595_v20  ;;  %4583 = vst [vmem:[#allocation50_spill] sm:$0xff] %v4014_v27  ;;  %4584 = vst [vmem:[#allocation51_spill] sm:$0xff] %v4017_v14  ;;  %v1649_v58 = vadd.f32 %v1633_v2, %v1596_v39  ;;  %v1650_v49 = vadd.f32 %v1634_v21, %v1597_v9  ;;  %v4585_v50 = vld [vmem:[#allocation55_spill] sm:$0xff]  ;;  %v4586_v38 = vld [vmem:[#allocation52_spill] sm:$0xff] }
 0x182   : > { %v1651_v26 = vadd.f32 %v1635_v42, %v1598_v17  ;;  %v1652_v10 = vadd.f32 %v1636_v19, %v1599_v31  ;;  %v1674_v3 = vmul.f32 %v2414_v15, %v2398_v13  ;;  %v1675_v63 = vmul.f32 %v2414_v15, %v4002_v60 }
 0x183   : > { %v1676_v6 = vmul.f32 %v2414_v15, %v4005_v37  ;;  %v1677_v41 = vmul.f32 %v2414_v15, %v4008_v33  ;;  %v1678_v61 = vmul.f32 %v2414_v15, %v4011_v29  ;;  %v1679_v20 = vmul.f32 %v2414_v15, %v4014_v27 }
 0x184   : > { %v1680_v55 = vmul.f32 %v2414_v15, %v4017_v14  ;;  %v1681_v39 = vmul.f32 %v2414_v15, %v4585_v50  ;;  %v1682_v9 = vmul.f32 %v2414_v15, %v3891_v16  ;;  %v1683_v17 = vmul.f32 %v2414_v15, %v3894_v48  ;;  %v2433_v14 = vld [vmem:[#allocation6 + $0x18] ss:$0 sm:$0xff] }
 0x185   : > { %v1684_v13 = vmul.f32 %v2414_v15, %v3897_v43  ;;  %v1685_v31 = vmul.f32 %v2414_v15, %v3900_v57  ;;  %v1686_v45 = vmul.f32 %v2414_v15, %v3903_v52  ;;  %v1687_v56 = vmul.f32 %v2414_v15, %v4586_v38  ;;  %v2423_v38 = vld [vmem:[%s3185_s26 + $0x1c0] sm:$0xff] }
 0x186   : > { %v1688_v59 = vmul.f32 %v2414_v15, %v3909_v1  ;;  %v1689_v8 = vmul.f32 %v2414_v15, %v4020_v47  ;;  %v1690_v2 = vadd.f32 %v1674_v3, %v1637_v46  ;;  %v1691_v21 = vadd.f32 %v1675_v63, %v1638_v53  ;;  %v2432_v15 = vld [vmem:[%s3185_s26 + $0x270] sm:$0xff] }
 0x187   : > { %v1692_v42 = vadd.f32 %v1676_v6, %v1639_v28  ;;  %v1693_v16 = vadd.f32 %v1677_v41, %v1640_v44  ;;  %v1694_v19 = vadd.f32 %v1678_v61, %v1641_v24  ;;  %v1695_v50 = vadd.f32 %v1679_v20, %v1642_v51  ;;  %v4587_v44 = vld [vmem:[#allocation53_spill] sm:$0xff] }
 0x188   : > { %v1696_v48 = vadd.f32 %v1680_v55, %v1643_v25  ;;  %v1697_v43 = vadd.f32 %v1681_v39, %v1644_v22  ;;  %v1698_v57 = vadd.f32 %v1682_v9, %v1645_v12  ;;  %v1699_v27 = vadd.f32 %v1683_v17, %v1646_v30  ;;  %v4588_v30 = vld [vmem:[#allocation27_spill] sm:$0xff]  ;;  %v2450_v17 = vld [vmem:[#allocation6 + $0x19] ss:$0 sm:$0xff] }
 0x189   : > { %v1700_v52 = vadd.f32 %v1684_v13, %v1647_v11  ;;  %v1701_v29 = vadd.f32 %v1685_v31, %v1648_v23  ;;  %v1702_v33 = vadd.f32 %v1686_v45, %v1649_v58  ;;  %v1703_v37 = vadd.f32 %v1687_v56, %v1650_v49  ;;  %v4589_v23 = vld [vmem:[#allocation28_spill] sm:$0xff]  ;;  %v4590_v49 = vld [vmem:[#allocation18_spill] sm:$0xff] }
 0x18a   : > { %v1704_v1 = vadd.f32 %v1688_v59, %v1651_v26  ;;  %v1705_v60 = vadd.f32 %v1689_v8, %v1652_v10  ;;  %v1729_v46 = vmul.f32 %v2433_v14, %v3928_v0  ;;  %v1730_v53 = vmul.f32 %v2433_v14, %v3931_v7  ;;  %v4591_v0 = vld [vmem:[#allocation31_spill] sm:$0xff]  ;;  %v4592_v7 = vld [vmem:[#allocation32_spill] sm:$0xff]  ;;  %v2440_v56 = vld [vmem:[%s3185_s26 + $0x1c1] sm:$0xff] }
 0x18b   : > { %v1731_v24 = vmul.f32 %v2433_v14, %v3934_v18  ;;  %v1732_v51 = vmul.f32 %v2433_v14, %v3937_v54  ;;  %v1733_v25 = vmul.f32 %v2433_v14, %v3940_v62  ;;  %v1734_v22 = vmul.f32 %v2433_v14, %v3943_v4  ;;  %v4593_v18 = vld [vmem:[#allocation21_spill] sm:$0xff] }
 0x18c   : > { %v1735_v28 = vmul.f32 %v2433_v14, %v2423_v38  ;;  %v1736_v12 = vmul.f32 %v2433_v14, %v4587_v44  ;;  %v1737_v11 = vmul.f32 %v2433_v14, %v4588_v30  ;;  %v1738_v58 = vmul.f32 %v2433_v14, %v4589_v23 }
 0x18d   : > { %v1739_v26 = vmul.f32 %v2433_v14, %v4590_v49  ;;  %v1740_v10 = vmul.f32 %v2433_v14, %v4591_v0  ;;  %v1741_v3 = vmul.f32 %v2433_v14, %v4592_v7  ;;  %v1742_v63 = vmul.f32 %v2433_v14, %v4593_v18  ;;  %v2467_v49 = vld [vmem:[#allocation6 + $0x1a] ss:$0 sm:$0xff] }
 0x18e   : > { %v1743_v54 = vmul.f32 %v2433_v14, %v3946_v36  ;;  %v1744_v62 = vmul.f32 %v2433_v14, %v2432_v15  ;;  %v1745_v4 = vadd.f32 %v1729_v46, %v1690_v2  ;;  %v1746_v6 = vadd.f32 %v1730_v53, %v1691_v21  ;;  %v2449_v14 = vld [vmem:[%s3185_s26 + $0x271] sm:$0xff]  ;;  %v4600_v15 = vld [vmem:[#allocation38_spill] sm:$0xff] }
 0x18f   : > { %v1747_v41 = vadd.f32 %v1731_v24, %v1692_v42  ;;  %v1748_v61 = vadd.f32 %v1732_v51, %v1693_v16  ;;  %v1749_v20 = vadd.f32 %v1733_v25, %v1694_v19  ;;  %v1750_v55 = vadd.f32 %v1734_v22, %v1695_v50  ;;  %v4599_v50 = vld [vmem:[#allocation35_spill] sm:$0xff] }
 0x190   : > { %v1751_v39 = vadd.f32 %v1735_v28, %v1696_v48  ;;  %v1752_v9 = vadd.f32 %v1736_v12, %v1697_v43  ;;  %v1753_v13 = vadd.f32 %v1737_v11, %v1698_v57  ;;  %v1754_v31 = vadd.f32 %v1738_v58, %v1699_v27  ;;  %v4594_v43 = vld [vmem:[#allocation54_spill] sm:$0xff]  ;;  %v4595_v57 = vld [vmem:[#allocation23_spill] sm:$0xff] }
 0x191   : > { %v1755_v45 = vadd.f32 %v1739_v26, %v1700_v52  ;;  %v1756_v38 = vadd.f32 %v1740_v10, %v1701_v29  ;;  %v1757_v59 = vadd.f32 %v1741_v3, %v1702_v33  ;;  %v1758_v8 = vadd.f32 %v1742_v63, %v1703_v37  ;;  %v4596_v29 = vld [vmem:[#allocation37_spill] sm:$0xff] }
 0x192   : > { %v1759_v44 = vadd.f32 %v1743_v54, %v1704_v1  ;;  %v1760_v36 = vadd.f32 %v1744_v62, %v1705_v60  ;;  %v1782_v2 = vmul.f32 %v2450_v17, %v3965_v35  ;;  %v1783_v21 = vmul.f32 %v2450_v17, %v3968_v34  ;;  %v4597_v33 = vld [vmem:[#allocation29_spill] sm:$0xff]  ;;  %v2466_v62 = vld [vmem:[%s3185_s26 + $0x272] sm:$0xff] }
 0x193   : > { %v1784_v42 = vmul.f32 %v2450_v17, %v3971_v32  ;;  %v1785_v48 = vmul.f32 %v2450_v17, %v3974_v5  ;;  %v1786_v16 = vmul.f32 %v2450_v17, %v4594_v43  ;;  %v1787_v27 = vmul.f32 %v2450_v17, %v4595_v57  ;;  %v4598_v1 = vld [vmem:[#allocation17_spill] sm:$0xff]  ;;  %v4601_v32 = vld [vmem:[#allocation39_spill] sm:$0xff]  ;;  %v4602_v5 = vld [vmem:[#allocation40_spill] sm:$0xff] }
 0x194   : > { %v1788_v52 = vmul.f32 %v2450_v17, %v2440_v56  ;;  %v1789_v19 = vmul.f32 %v2450_v17, %v4596_v29  ;;  %v1790_v37 = vmul.f32 %v2450_v17, %v4597_v33  ;;  %v1791_v60 = vmul.f32 %v2450_v17, %v4598_v1  ;;  %v2457_v3 = vld [vmem:[%s3185_s26 + $0x1c2] sm:$0xff]  ;;  %v4614_v43 = vld [vmem:[#allocation52_spill] sm:$0xff] }
 0x195   : > { %v1792_v35 = vmul.f32 %v2450_v17, %v4599_v50  ;;  %v1793_v34 = vmul.f32 %v2450_v17, %v4600_v15  ;;  %v1794_v46 = vmul.f32 %v2450_v17, %v4601_v32  ;;  %v1795_v53 = vmul.f32 %v2450_v17, %v4602_v5  ;;  %v4609_v56 = vld [vmem:[#allocation26_spill] sm:$0xff]  ;;  %v4615_v57 = vld [vmem:[#allocation20_spill] sm:$0xff] }
 0x196   : > { %v1796_v24 = vmul.f32 %v2450_v17, %v3983_v40  ;;  %v1797_v51 = vmul.f32 %v2450_v17, %v2449_v14  ;;  %v1798_v25 = vadd.f32 %v1782_v2, %v1745_v4  ;;  %v1799_v22 = vadd.f32 %v1783_v21, %v1746_v6  ;;  %v4603_v4 = vld [vmem:[#allocation46_spill] sm:$0xff]  ;;  %v4612_v2 = vld [vmem:[#allocation44_spill] sm:$0xff] }
 0x197   : > { %v1800_v28 = vadd.f32 %v1784_v42, %v1747_v41  ;;  %v1801_v12 = vadd.f32 %v1785_v48, %v1748_v61  ;;  %v1802_v30 = vadd.f32 %v1786_v16, %v1749_v20  ;;  %v1803_v11 = vadd.f32 %v1787_v27, %v1750_v55  ;;  %v4604_v41 = vld [vmem:[#allocation47_spill] sm:$0xff]  ;;  %v4605_v20 = vld [vmem:[#allocation48_spill] sm:$0xff]  ;;  %v4607_v17 = vld [vmem:[#allocation50_spill] sm:$0xff] }
 0x198   : > { %v1804_v23 = vadd.f32 %v1788_v52, %v1751_v39  ;;  %v1805_v58 = vadd.f32 %v1789_v19, %v1752_v9  ;;  %v1806_v26 = vadd.f32 %v1790_v37, %v1753_v13  ;;  %v1807_v0 = vadd.f32 %v1791_v60, %v1754_v31  ;;  %v4606_v39 = vld [vmem:[#allocation49_spill] sm:$0xff]  ;;  %v4608_v31 = vld [vmem:[#allocation51_spill] sm:$0xff] }
 0x199   : > { %v1808_v10 = vadd.f32 %v1792_v35, %v1755_v45  ;;  %v1809_v7 = vadd.f32 %v1793_v34, %v1756_v38  ;;  %v1810_v40 = vadd.f32 %v1794_v46, %v1757_v59  ;;  %v1811_v18 = vadd.f32 %v1795_v53, %v1758_v8  ;;  %v4610_v8 = vld [vmem:[#allocation41_spill] sm:$0xff] }
 0x19a   : > { %v1812_v63 = vadd.f32 %v1796_v24, %v1759_v44  ;;  %v1813_v54 = vadd.f32 %v1797_v51, %v1760_v36  ;;  %v1835_v6 = vmul.f32 %v2467_v49, %v4603_v4  ;;  %v1836_v61 = vmul.f32 %v2467_v49, %v4604_v41  ;;  %v4611_v36 = vld [vmem:[#allocation36_spill] sm:$0xff]  ;;  %v4613_v42 = vld [vmem:[#allocation45_spill] sm:$0xff] }
 0x19b   : > { %v1837_v55 = vmul.f32 %v2467_v49, %v4605_v20  ;;  %v1838_v9 = vmul.f32 %v2467_v49, %v4606_v39  ;;  %v1839_v13 = vmul.f32 %v2467_v49, %v4607_v17  ;;  %v1840_v45 = vmul.f32 %v2467_v49, %v4608_v31 }
 0x19c   : > { %v1841_v38 = vmul.f32 %v2467_v49, %v2457_v3  ;;  %v1842_v59 = vmul.f32 %v2467_v49, %v4609_v56  ;;  %v1843_v44 = vmul.f32 %v2467_v49, %v4610_v8  ;;  %v1844_v14 = vmul.f32 %v2467_v49, %v4611_v36 }
 0x19d   : > { %v1845_v21 = vmul.f32 %v2467_v49, %v4612_v2  ;;  %v1846_v48 = vmul.f32 %v2467_v49, %v4613_v42  ;;  %v1847_v16 = vmul.f32 %v2467_v49, %v4614_v43  ;;  %v1848_v27 = vmul.f32 %v2467_v49, %v4615_v57 }
 0x19e   : > { %v1849_v52 = vmul.f32 %v2467_v49, %v4020_v47  ;;  %v1850_v29 = vmul.f32 %v2467_v49, %v2466_v62  ;;  %v1851_v19 = vadd.f32 %v1835_v6, %v1798_v25  ;;  %v1852_v33 = vadd.f32 %v1836_v61, %v1799_v22 }
 0x19f   : > { %v1853_v37 = vadd.f32 %v1837_v55, %v1800_v28  ;;  %v1854_v1 = vadd.f32 %v1838_v9, %v1801_v12  ;;  %v1855_v60 = vadd.f32 %v1839_v13, %v1802_v30  ;;  %v1856_v50 = vadd.f32 %v1840_v45, %v1803_v11 }
 0x1a0   : > { %v1857_v35 = vadd.f32 %v1841_v38, %v1804_v23  ;;  %v1858_v15 = vadd.f32 %v1842_v59, %v1805_v58  ;;  %v1859_v34 = vadd.f32 %v1843_v44, %v1806_v26  ;;  %v1860_v47 = vadd.f32 %v1844_v14, %v1807_v0  ;;  %1867 = vst [vmem:[%s3013_s11] sm:$0xff] %v1851_v19 }
 0x1a1   : > { %v1861_v32 = vadd.f32 %v1845_v21, %v1808_v10  ;;  %v1862_v46 = vadd.f32 %v1846_v48, %v1809_v7  ;;  %1868 = vst [vmem:[%s3013_s11 + $0x8] sm:$0xff] %v1852_v33  ;;  %1869 = vst [vmem:[%s3013_s11 + $0x10] sm:$0xff] %v1853_v37  ;;  %v1863_v5 = vadd.f32 %v1847_v16, %v1810_v40 }
 0x1a2   : > { %1870 = vst [vmem:[%s3013_s11 + $0x18] sm:$0xff] %v1854_v1  ;;  %v1864_v53 = vadd.f32 %v1848_v27, %v1811_v18  ;;  %v1865_v24 = vadd.f32 %v1849_v52, %v1812_v63  ;;  %v1866_v51 = vadd.f32 %v1850_v29, %v1813_v54  ;;  %1871 = vst [vmem:[%s3013_s11 + $0x20] sm:$0xff] %v1855_v60 }
 0x1a3   : > { %1872 = vst [vmem:[%s3013_s11 + $0x28] sm:$0xff] %v1856_v50  ;;  %1873 = vst [vmem:[%s3013_s11 + $0x30] sm:$0xff] %v1857_v35 }
 0x1a4   : > { %1874 = vst [vmem:[%s3013_s11 + $0x38] sm:$0xff] %v1858_v15  ;;  %1875 = vst [vmem:[%s3013_s11 + $0x40] sm:$0xff] %v1859_v34 }
 0x1a5   : > { %1876 = vst [vmem:[%s3013_s11 + $0x48] sm:$0xff] %v1860_v47  ;;  %1877 = vst [vmem:[%s3013_s11 + $0x50] sm:$0xff] %v1861_v32 }
 0x1a6   : > { %1878 = vst [vmem:[%s3013_s11 + $0x58] sm:$0xff] %v1862_v46  ;;  %1879 = vst [vmem:[%s3013_s11 + $0x60] sm:$0xff] %v1863_v5 }
 0x1a7   : > { %1880 = vst [vmem:[%s3013_s11 + $0x68] sm:$0xff] %v1864_v53  ;;  %1881 = vst [vmem:[%s3013_s11 + $0x70] sm:$0xff] %v1865_v24 }
 0x1a8   : > { %1882 = vst [vmem:[%s3013_s11 + $0x78] sm:$0xff] %v1866_v51 }
 0x1a9   : > { %2666 = shalt.err (!%p2663_p8)
}
 0x1aa   : > { %s2667_s29 = scalar_lea.hbm %s4098_s12, 2048  ;;  %s2671_s27 = scalar_lea.hbm %s4180_s3, 8192 }
 0x1ab   : > { %p2668_p12 = scmp.ne.s32.totalorder %s4098_s12, %s2667_s29  ;;  %p2672_p10 = scmp.lt.u32.totalorder %s4098_s12, %s4180_s3 }
 0x1ac   : > { %p2673_p3 = scmp.lt.u32.totalorder %s2671_s27, %s2667_s29  ;;  %p2675_p7 = scmp.lt.u32.totalorder %s2667_s29, %s4098_s12 }
 0x1ad   : > { %p2669_p1 = pnand %p2668_p12, %p4616_p9 }
 0x1ae   : > { %p2674_p4 = por %p2673_p3, %p2672_p10 }
 0x1af   : > { %p2670_p6 = pneg %p2669_p1 }
 0x1b0   : > { %p2676_p11 = por %p2675_p7, %p2674_p4 }
 0x1b2   : > { %p2677_p13 = pnand %p2676_p11, %p2670_p6 }
 0x1b4   : > { %2680 = shalt.err (!%p2677_p13)
}
 0x1b5   : > { %s2787_s23 = smov 128   ;;  %s2788_s24 = smov 8  }
 0x1b6   : > { %2483 = dma.vmem_to_hbm [thread:$0]  (%p4616_p9), %s4100_s8, 2048, %s4098_s12, %s4116_s4, %s2787_s23, %s2787_s23, %s2788_s24  }
 0x1b7 PF: > { %s4617_s18 = sld [smem:[#allocation12_spill]]  ;;  %s4618_s19 = sld [smem:[#allocation14_spill]] }
 0x1b8   : > { %p2500_p0 = scmp.ge.s32.totalorder %s2779_s22, 2 }
 0x1bd   : > { %s1915_s9 = sand.u32 1, %s4617_s18   ;;  %p4619_p2 = scmp.ne.s32.totalorder %s4618_s19, 0 }
 0x1be   : > { %s1916_s20 = scalar_lea.sflag [#allocation5], %s1915_s9 }
 0x1bf   : > { %p2494_p5 = pnand %p2500_p0, %p4619_p2 }
 0x1c1   : > { %2734 = dma.done.wait (!%p2494_p5), %s1916_s20, 2048  }
 0x1c2   : > { %2736 = vsyncadd (!%p2494_p5), %s1916_s20, 4294965248  ;;  %s20_s22 = sadd.s32 1, %s2779_s22   ;;  %s4620_s18 = sld [smem:[#allocation13_spill]] }
 0x1c3   : > { %p17_p8 = scmp.ge.s32.totalorder %s20_s22, 6   ;;  %s4621_s20 = sld [smem:[#allocation15_spill]] }
 0x1c4   : > { %s4622_s28 = sld [smem:[#allocation16_spill]]  ;;  %s4623_s12 = smov %s2743_s13 }
 0x1c5   : > { %s4624_s13 = smov %s2747_s14  ;;  %s4625_s14 = smov %s2949_s1 }
 0x1c6   : > { %s4626_s15 = smov %s2755_s16  ;;  %s4627_s16 = smov %s2759_s17 }
 0x1c7   : > { %s4628_s17 = smov %s2944_s7  ;;  %s4629_s19 = smov %s2775_s21 }
 0x1c8   :  { %19 = sbr.rel (!%p17_p8) target bundleno = 12 (0xc), region = 95 }
 0x1ca   : > { %s4630_s21 = smov %s4622_s28 }
 0x1cf   :  { %1921 = vsyncpa [#allocation4], 1 }
 0x1d0   :  { %1923 = vsyncpa [#allocation4 + $0x1], 1 }
 0x1d1   :  { %1924 = vsyncpa [#allocation7], 1 }
 0x1d2   :  { %1925 = vsyncpa [#allocation5], 1 }
 0x1d3   :  { %1927 = vsyncpa [#allocation5 + $0x1], 1 }

</bundles_post_ra>
